<compile_context>
chip_gen: v7x
topology: tpu7x:2x2x1
jax: 0.10.0
libtpu: 0.0.40
codegen_flags: <defaults>
</compile_context>

<pallas_src>
import functools

import jax
import jax.numpy as jnp
from jax import lax
from jax.experimental import pallas as pl
from jax.experimental.pallas import tpu as pltpu

# ---------------------------------------------------------------------------
# Model hyper-parameters (synthetic, deterministic init below)
# ---------------------------------------------------------------------------
N = 2              # batch
C_IN = 4           # input channels
H = 16             # spatial
W = 16
C_EMB = 32         # backbone embedding channels (conv out channels)
NUM_CLASSES = 8
KH = KW = 3        # conv kernel
USE_WEIGHT = True  # model_cfg.use_weight

# ---------------------------------------------------------------------------
# Fused-conv layout constants
#   Image is zero-padded to [Hp, Wp] with Wp a power of two so the pooling mask
#   can be built with shifts/ands only.  All N padded images are flattened back
#   to back on the lane axis; conv output column t corresponds to flat padded
#   position q = t + OFF, and tap (kh, kw) reads x[:, t + kh*Wp + kw].
# ---------------------------------------------------------------------------
HP = H + 2                                 # padded height (18)
WP = 32                                    # padded width (power of two)
P = HP * WP                                # padded pixels per image (576)
L = N * P                                  # total flattened padded pixels (1152)
OFF = WP + 1                               # flat index of first interior pixel
LW = (N - 1) * P + H * WP + W - OFF + 1    # conv/pool window width (1072)
K_RAW = KH * KW * C_IN                     # 36 (no padding to 128 anymore)

# params/labels slab layout ([SLAB_ROWS, 128] f32) -- one input DMA
SLAB_ROWS = 48
CB_C = K_RAW                   # [0:32, 36]      conv bias column
CW_R0 = C_EMB                  # [32:40, 0:32]   classifier weight^T
CLB_C = C_EMB                  # [32:40, 32]     classifier bias column
TGT_C0 = C_EMB + 2             # [32:40, 34:36]  target distribution^T (one_hot path)
MISC_R = C_EMB + NUM_CLASSES   # row 40
LBL_C0 = 0                     # labels (as f32) at [40, 0:N]
LWT_C0 = 4                     # loss weights    at [40, 4:4+N]

# output slab layout ([OUT_ROWS, 128] f32) -- one output DMA
OUT_ROWS = C_EMB + NUM_CLASSES             # 40
LOSS_R, LOSS_C = C_EMB, 4                  # loss scalar at [32, 4]


# ---------------------------------------------------------------------------
# Fused kernel: conv (im2col fused) + bias + ReLU + GAP + classifier + CE
#   x_ref    [C_IN, L]        f32  padded, channel-major, flattened activations
#   slab_ref [SLAB_ROWS, 128] f32  packed params / labels / loss weights
#   out_ref  [OUT_ROWS, 128]  f32  pooled^T | logits^T | loss
# ---------------------------------------------------------------------------
def _fused_recognizer_kernel(x_ref, slab_ref, out_ref, *, one_hot_labels):
    # ---- load once, cast MXU operands to bf16 (accumulation stays f32) -----
    x = x_ref[...].astype(jnp.bfloat16)                         # [C_IN, L]
    wT = slab_ref[0:C_EMB, 0:K_RAW].astype(jnp.bfloat16)        # [C_EMB, 36]
    conv_b = slab_ref[0:C_EMB, CB_C:CB_C + 1]                   # [C_EMB, 1] f32

    # ---- conv as 9 shifted-window matmuls (im2col fused, lane-dense) -------
    acc = jnp.zeros((C_EMB, LW), jnp.float32)
    for kh in range(KH):
        for kw in range(KW):
            k = kh * KW + kw
            off = kh * WP + kw                                   # static
            xk = x[:, off:off + LW]                              # [C_IN, LW]
            wk = wT[:, k * C_IN:(k + 1) * C_IN]                  # [C_EMB, C_IN]
            acc = acc + jnp.dot(wk, xk, preferred_element_type=jnp.float32)
    conv = jnp.maximum(acc + conv_b, 0.0)                        # bias + ReLU

    # ---- global average pool: [C_EMB, LW] x [LW, N] bf16 MXU matmul --------
    # interior(q, n) <=> q belongs to image n and its (row, col) within the
    # padded grid are in [1, H] x [1, W]; only shifts/ands, no div/mod.
    q = lax.broadcasted_iota(jnp.int32, (LW, N), 0) + OFF
    img = lax.broadcasted_iota(jnp.int32, (LW, N), 1)
    rel = q - img * P
    member = (rel >= 0) & (rel < P)
    row = rel >> 5                                               # WP == 32
    col = q & (WP - 1)
    interior = member & (row >= 1) & (row <= H) & (col >= 1) & (col <= W)
    pool = jnp.where(interior, jnp.float32(1.0 / (H * W)),
                     jnp.float32(0.0)).astype(jnp.bfloat16)      # [LW, N]
    pooledT = jnp.dot(conv.astype(jnp.bfloat16), pool,
                      preferred_element_type=jnp.float32)        # [C_EMB, N]

    # ---- head: linear classifier (transposed: classes on sublanes) ---------
    cls_wT = slab_ref[CW_R0:CW_R0 + NUM_CLASSES, 0:C_EMB]        # [NC, C_EMB]
    cls_b = slab_ref[CW_R0:CW_R0 + NUM_CLASSES, CLB_C:CLB_C + 1]  # [NC, 1]
    logitsT = jnp.dot(cls_wT, pooledT,
                      preferred_element_type=jnp.float32) + cls_b  # [NC, N]

    # ---- (weighted) softmax cross-entropy over the class (sublane) axis ----
    if one_hot_labels:
        targetT = slab_ref[CW_R0:CW_R0 + NUM_CLASSES, TGT_C0:TGT_C0 + N]
    else:
        labels_row = slab_ref[MISC_R:MISC_R + 1, LBL_C0:LBL_C0 + N]   # [1, N]
        cls_iota = lax.broadcasted_iota(
            jnp.int32, (NUM_CLASSES, N), 0).astype(jnp.float32)
        targetT = jnp.where(cls_iota == labels_row,
                            jnp.float32(1.0), jnp.float32(0.0))       # [NC, N]

    mx = jnp.max(logitsT, axis=0, keepdims=True)                 # [1, N]
    lse = mx + jnp.log(jnp.sum(jnp.exp(logitsT - mx), axis=0, keepdims=True))
    logp = logitsT - lse                                         # [NC, N]
    ce = -jnp.sum(targetT * logp, axis=0, keepdims=True)         # [1, N]
    lw = slab_ref[MISC_R:MISC_R + 1, LWT_C0:LWT_C0 + N]          # [1, N]
    num = jnp.sum(ce * lw, axis=1, keepdims=True)                # [1, 1]
    # NOTE: loss = 0 (not NaN) when all loss weights are zero -- deliberate.
    den = jnp.maximum(jnp.sum(lw, axis=1, keepdims=True), jnp.float32(1e-8))
    loss = num / den

    # ---- single consolidated output slab ------------------------------------
    out_ref[...] = jnp.zeros((OUT_ROWS, 128), jnp.float32)
    out_ref[0:C_EMB, 0:N] = pooledT
    out_ref[C_EMB:C_EMB + NUM_CLASSES, 0:N] = logitsT
    out_ref[LOSS_R:LOSS_R + 1, LOSS_C:LOSS_C + 1] = loss


def fused_recognizer(xs, slab, *, one_hot_labels):
    kernel = functools.partial(_fused_recognizer_kernel,
                               one_hot_labels=one_hot_labels)
    flops = (2 * C_EMB * C_IN * LW * KH * KW       # conv taps
             + 2 * C_EMB * LW * N                  # pooling matmul
             + 2 * NUM_CLASSES * C_EMB * N)        # classifier
    bytes_accessed = (int(xs.size) * xs.dtype.itemsize
                      + int(slab.size) * slab.dtype.itemsize
                      + OUT_ROWS * 128 * 4)
    return pl.pallas_call(
        kernel,
        out_shape=jax.ShapeDtypeStruct((OUT_ROWS, 128), jnp.float32),
        in_specs=[pl.BlockSpec(memory_space=pltpu.MemorySpace.VMEM)] * 2,
        out_specs=pl.BlockSpec(memory_space=pltpu.MemorySpace.VMEM),
        cost_estimate=pl.CostEstimate(
            flops=flops,
            transcendentals=NUM_CLASSES * N + N,
            bytes_accessed=bytes_accessed),
    )(xs, slab)


# ---------------------------------------------------------------------------
# Glue: parameter init, input/param packing, full forward
# ---------------------------------------------------------------------------
def init_params(key):
    k1, k2, k3, k4 = jax.random.split(key, 4)
    conv_w = jax.random.normal(k1, (KH, KW, C_IN, C_EMB), jnp.float32) * 0.1
    conv_b = jax.random.normal(k2, (1, C_EMB), jnp.float32) * 0.01
    cls_w = jax.random.normal(k3, (C_EMB, NUM_CLASSES), jnp.float32) * 0.1
    cls_b = jax.random.normal(k4, (1, NUM_CLASSES), jnp.float32) * 0.01
    return dict(conv_w=conv_w, conv_b=conv_b, cls_w=cls_w, cls_b=cls_b)


def _pack_inputs(params, x_nchw, labels, loss_weight, one_hot_labels):
    # Padded, channel-major, flattened activations [C_IN, L] (f32; bf16 cast
    # happens in-kernel).  Only pad + transpose + reshape on ~18 KiB.
    xp = jnp.pad(x_nchw.astype(jnp.float32),
                 ((0, 0), (0, 0), (1, 1), (1, WP - 1 - W)))      # [N, C, HP, WP]
    xs = jnp.transpose(xp, (1, 0, 2, 3)).reshape(C_IN, L)

    # One packed params/labels slab (single DMA into the kernel).
    slab = jnp.zeros((SLAB_ROWS, 128), jnp.float32)
    wT = params["conv_w"].reshape(K_RAW, C_EMB).T                # [C_EMB, 36]
    slab = slab.at[0:C_EMB, 0:K_RAW].set(wT)
    slab = slab.at[0:C_EMB, CB_C].set(params["conv_b"].reshape(C_EMB))
    slab = slab.at[CW_R0:CW_R0 + NUM_CLASSES, 0:C_EMB].set(params["cls_w"].T)
    slab = slab.at[CW_R0:CW_R0 + NUM_CLASSES, CLB_C].set(
        params["cls_b"].reshape(NUM_CLASSES))

    if labels is None:
        lbl_vals = jnp.full((N,), -1.0, jnp.float32)             # matches no class
    elif one_hot_labels:
        slab = slab.at[CW_R0:CW_R0 + NUM_CLASSES, TGT_C0:TGT_C0 + N].set(
            labels.astype(jnp.float32).T)
        lbl_vals = jnp.full((N,), -1.0, jnp.float32)
    else:
        lbl_vals = labels.astype(jnp.float32)
    slab = slab.at[MISC_R, LBL_C0:LBL_C0 + N].set(lbl_vals)

    if USE_WEIGHT and loss_weight is not None:
        lw = loss_weight.reshape(N).astype(jnp.float32)
    else:
        lw = jnp.ones((N,), jnp.float32)
    slab = slab.at[MISC_R, LWT_C0:LWT_C0 + N].set(lw)
    return xs, slab


@functools.partial(jax.jit, static_argnames=("one_hot_labels",))
def benchmark_recognizer_forward(params, inputs_nchw, labels=None,
                                 loss_weight=None, one_hot_labels=False):
    """Mirrors BenchmarkRecognizer.forward -> (features_list, loss_dict)."""
    xs, slab = _pack_inputs(params, inputs_nchw, labels, loss_weight,
                            one_hot_labels)
    out = fused_recognizer(xs, slab, one_hot_labels=one_hot_labels)

    pooled = out[0:C_EMB, 0:N].T                       # [N, C_EMB]
    logits = out[C_EMB:C_EMB + NUM_CLASSES, 0:N].T     # [N, NUM_CLASSES]
    features_list = [pooled, logits]
    loss_dict = {} if labels is None else {"loss_cls": out[LOSS_R, LOSS_C]}
    return features_list, loss_dict


# ---------------------------------------------------------------------------
# Pure-JAX reference (f32) for a tolerance check
# ---------------------------------------------------------------------------
def _reference_forward(params, x_nchw, labels, loss_weight):
    x = jnp.transpose(x_nchw, (0, 2, 3, 1)).astype(jnp.float32)
    xp = jnp.pad(x, ((0, 0), (1, 1), (1, 1), (0, 0)))
    cols = [xp[:, kh:kh + H, kw:kw + W, :]
            for kh in range(KH) for kw in range(KW)]
    patches = jnp.concatenate(cols, axis=-1).reshape(N * H * W, K_RAW)
    conv = jnp.maximum(
        patches @ params["conv_w"].reshape(K_RAW, C_EMB)
        + params["conv_b"].reshape(1, C_EMB), 0.0)
    pooled = conv.reshape(N, H * W, C_EMB).mean(axis=1)
    logits = pooled @ params["cls_w"] + params["cls_b"].reshape(1, NUM_CLASSES)
    onehot = jax.nn.one_hot(labels, NUM_CLASSES, dtype=jnp.float32)
    mx = jnp.max(logits, axis=-1, keepdims=True)
    logp = logits - (mx + jnp.log(jnp.sum(jnp.exp(logits - mx), axis=-1,
                                          keepdims=True)))
    ce = -jnp.sum(onehot * logp, axis=-1)
    lw = loss_weight.reshape(N).astype(jnp.float32)
    loss = jnp.sum(ce * lw) / jnp.maximum(jnp.sum(lw), 1e-8)
    return pooled, logits, loss


if __name__ == "__main__":
    key = jax.random.PRNGKey(0)
    kp, kx, kl = jax.random.split(key, 3)

    params = init_params(kp)
    inputs = jax.random.normal(kx, (N, C_IN, H, W), jnp.float32)   # NCHW
    labels = jax.random.randint(kl, (N,), 0, NUM_CLASSES)
    loss_weight = jnp.ones((N,), jnp.float32)

    features_list, loss_dict = benchmark_recognizer_forward(
        params, inputs, labels=labels, loss_weight=loss_weight,
        one_hot_labels=False)

    jax.block_until_ready(features_list)
    loss = loss_dict["loss_cls"]
    jax.block_until_ready(loss)

    # sanity: shapes + finite loss
    assert features_list[0].shape == (N, C_EMB)
    assert features_list[1].shape == (N, NUM_CLASSES)
    assert bool(jnp.isfinite(loss))

    # correctness vs pure-JAX reference (bf16 MXU operands -> loose tolerance)
    pooled_ref, logits_ref, loss_ref = _reference_forward(
        params, inputs, labels, loss_weight)
    assert bool(jnp.allclose(features_list[0], pooled_ref, rtol=5e-2, atol=2e-2))
    assert bool(jnp.allclose(features_list[1], logits_ref, rtol=5e-2, atol=2e-2))
    assert bool(jnp.allclose(loss, loss_ref, rtol=5e-2, atol=2e-2))

    print("KERNEL_OK")
</pallas_src>

<mosaic_0001>
module attributes {stable_mosaic.version = 11 : i64} {
  func.func @_fused_recognizer_kernel(%arg0: memref<4x1152xf32, #tpu.memory_space<vmem>>, %arg1: memref<48x128xf32, #tpu.memory_space<vmem>>, %arg2: memref<40x128xf32, #tpu.memory_space<vmem>>) attributes {dimension_semantics = [], scalar_prefetch = 0 : i64, scratch_operands = 0 : i64, tpu.core_type = #tpu.core_type<tc>} {
    %c0 = arith.constant 0 : index
    %c0_0 = arith.constant 0 : index
    %0 = vector.load %arg0[%c0, %c0_0] : memref<4x1152xf32, #tpu.memory_space<vmem>>, vector<4x1152xf32>
    %1 = arith.truncf %0 : vector<4x1152xf32> to vector<4x1152xbf16>
    %c0_1 = arith.constant 0 : index
    %c0_2 = arith.constant 0 : index
    %2 = vector.load %arg1[%c0_1, %c0_2] : memref<48x128xf32, #tpu.memory_space<vmem>>, vector<32x36xf32>
    %3 = arith.truncf %2 : vector<32x36xf32> to vector<32x36xbf16>
    %c0_3 = arith.constant 0 : index
    %c36 = arith.constant 36 : index
    %4 = vector.load %arg1[%c0_3, %c36] : memref<48x128xf32, #tpu.memory_space<vmem>>, vector<32x1xf32>
    %cst = arith.constant 0.000000e+00 : f32
    %5 = vector.broadcast %cst : f32 to vector<32x1072xf32>
    %6 = vector.extract_strided_slice %1 {offsets = [0, 0], sizes = [4, 1072], strides = [1, 1]} : vector<4x1152xbf16> to vector<4x1072xbf16>
    %7 = vector.extract_strided_slice %3 {offsets = [0, 0], sizes = [32, 4], strides = [1, 1]} : vector<32x36xbf16> to vector<32x4xbf16>
    %cst_4 = arith.constant dense<0.000000e+00> : vector<32x1072xf32>
    %8 = tpu.matmul %7, %6, %cst_4 {dimension_numbers = #tpu.dot_dimension_numbers<[1], [0], [0], [1], [0, 0, 1, 1], [], []>} : vector<32x4xbf16>, vector<4x1072xbf16>, vector<32x1072xf32> -> vector<32x1072xf32>
    %9 = arith.addf %5, %8 : vector<32x1072xf32>
    %10 = vector.extract_strided_slice %1 {offsets = [0, 1], sizes = [4, 1072], strides = [1, 1]} : vector<4x1152xbf16> to vector<4x1072xbf16>
    %11 = vector.extract_strided_slice %3 {offsets = [0, 4], sizes = [32, 4], strides = [1, 1]} : vector<32x36xbf16> to vector<32x4xbf16>
    %cst_5 = arith.constant dense<0.000000e+00> : vector<32x1072xf32>
    %12 = tpu.matmul %11, %10, %cst_5 {dimension_numbers = #tpu.dot_dimension_numbers<[1], [0], [0], [1], [0, 0, 1, 1], [], []>} : vector<32x4xbf16>, vector<4x1072xbf16>, vector<32x1072xf32> -> vector<32x1072xf32>
    %13 = arith.addf %9, %12 : vector<32x1072xf32>
    %14 = vector.extract_strided_slice %1 {offsets = [0, 2], sizes = [4, 1072], strides = [1, 1]} : vector<4x1152xbf16> to vector<4x1072xbf16>
    %15 = vector.extract_strided_slice %3 {offsets = [0, 8], sizes = [32, 4], strides = [1, 1]} : vector<32x36xbf16> to vector<32x4xbf16>
    %cst_6 = arith.constant dense<0.000000e+00> : vector<32x1072xf32>
    %16 = tpu.matmul %15, %14, %cst_6 {dimension_numbers = #tpu.dot_dimension_numbers<[1], [0], [0], [1], [0, 0, 1, 1], [], []>} : vector<32x4xbf16>, vector<4x1072xbf16>, vector<32x1072xf32> -> vector<32x1072xf32>
    %17 = arith.addf %13, %16 : vector<32x1072xf32>
    %18 = vector.extract_strided_slice %1 {offsets = [0, 32], sizes = [4, 1072], strides = [1, 1]} : vector<4x1152xbf16> to vector<4x1072xbf16>
    %19 = vector.extract_strided_slice %3 {offsets = [0, 12], sizes = [32, 4], strides = [1, 1]} : vector<32x36xbf16> to vector<32x4xbf16>
    %cst_7 = arith.constant dense<0.000000e+00> : vector<32x1072xf32>
    %20 = tpu.matmul %19, %18, %cst_7 {dimension_numbers = #tpu.dot_dimension_numbers<[1], [0], [0], [1], [0, 0, 1, 1], [], []>} : vector<32x4xbf16>, vector<4x1072xbf16>, vector<32x1072xf32> -> vector<32x1072xf32>
    %21 = arith.addf %17, %20 : vector<32x1072xf32>
    %22 = vector.extract_strided_slice %1 {offsets = [0, 33], sizes = [4, 1072], strides = [1, 1]} : vector<4x1152xbf16> to vector<4x1072xbf16>
    %23 = vector.extract_strided_slice %3 {offsets = [0, 16], sizes = [32, 4], strides = [1, 1]} : vector<32x36xbf16> to vector<32x4xbf16>
    %cst_8 = arith.constant dense<0.000000e+00> : vector<32x1072xf32>
    %24 = tpu.matmul %23, %22, %cst_8 {dimension_numbers = #tpu.dot_dimension_numbers<[1], [0], [0], [1], [0, 0, 1, 1], [], []>} : vector<32x4xbf16>, vector<4x1072xbf16>, vector<32x1072xf32> -> vector<32x1072xf32>
    %25 = arith.addf %21, %24 : vector<32x1072xf32>
    %26 = vector.extract_strided_slice %1 {offsets = [0, 34], sizes = [4, 1072], strides = [1, 1]} : vector<4x1152xbf16> to vector<4x1072xbf16>
    %27 = vector.extract_strided_slice %3 {offsets = [0, 20], sizes = [32, 4], strides = [1, 1]} : vector<32x36xbf16> to vector<32x4xbf16>
    %cst_9 = arith.constant dense<0.000000e+00> : vector<32x1072xf32>
    %28 = tpu.matmul %27, %26, %cst_9 {dimension_numbers = #tpu.dot_dimension_numbers<[1], [0], [0], [1], [0, 0, 1, 1], [], []>} : vector<32x4xbf16>, vector<4x1072xbf16>, vector<32x1072xf32> -> vector<32x1072xf32>
    %29 = arith.addf %25, %28 : vector<32x1072xf32>
    %30 = vector.extract_strided_slice %1 {offsets = [0, 64], sizes = [4, 1072], strides = [1, 1]} : vector<4x1152xbf16> to vector<4x1072xbf16>
    %31 = vector.extract_strided_slice %3 {offsets = [0, 24], sizes = [32, 4], strides = [1, 1]} : vector<32x36xbf16> to vector<32x4xbf16>
    %cst_10 = arith.constant dense<0.000000e+00> : vector<32x1072xf32>
    %32 = tpu.matmul %31, %30, %cst_10 {dimension_numbers = #tpu.dot_dimension_numbers<[1], [0], [0], [1], [0, 0, 1, 1], [], []>} : vector<32x4xbf16>, vector<4x1072xbf16>, vector<32x1072xf32> -> vector<32x1072xf32>
    %33 = arith.addf %29, %32 : vector<32x1072xf32>
    %34 = vector.extract_strided_slice %1 {offsets = [0, 65], sizes = [4, 1072], strides = [1, 1]} : vector<4x1152xbf16> to vector<4x1072xbf16>
    %35 = vector.extract_strided_slice %3 {offsets = [0, 28], sizes = [32, 4], strides = [1, 1]} : vector<32x36xbf16> to vector<32x4xbf16>
    %cst_11 = arith.constant dense<0.000000e+00> : vector<32x1072xf32>
    %36 = tpu.matmul %35, %34, %cst_11 {dimension_numbers = #tpu.dot_dimension_numbers<[1], [0], [0], [1], [0, 0, 1, 1], [], []>} : vector<32x4xbf16>, vector<4x1072xbf16>, vector<32x1072xf32> -> vector<32x1072xf32>
    %37 = arith.addf %33, %36 : vector<32x1072xf32>
    %38 = vector.extract_strided_slice %1 {offsets = [0, 66], sizes = [4, 1072], strides = [1, 1]} : vector<4x1152xbf16> to vector<4x1072xbf16>
    %39 = vector.extract_strided_slice %3 {offsets = [0, 32], sizes = [32, 4], strides = [1, 1]} : vector<32x36xbf16> to vector<32x4xbf16>
    %cst_12 = arith.constant dense<0.000000e+00> : vector<32x1072xf32>
    %40 = tpu.matmul %39, %38, %cst_12 {dimension_numbers = #tpu.dot_dimension_numbers<[1], [0], [0], [1], [0, 0, 1, 1], [], []>} : vector<32x4xbf16>, vector<4x1072xbf16>, vector<32x1072xf32> -> vector<32x1072xf32>
    %41 = arith.addf %37, %40 : vector<32x1072xf32>
    %42 = vector.broadcast %4 : vector<32x1xf32> to vector<32x1072xf32>
    %43 = arith.addf %41, %42 : vector<32x1072xf32>
    %cst_13 = arith.constant 0.000000e+00 : f32
    %44 = vector.broadcast %cst_13 : f32 to vector<32x1072xf32>
    %45 = arith.maximumf %43, %44 : vector<32x1072xf32>
    %46 = tpu.iota {dimensions = array<i32: 0>} : vector<1072x2xi32>
    %c33_i32 = arith.constant 33 : i32
    %47 = vector.broadcast %c33_i32 : i32 to vector<1072x2xi32>
    %48 = arith.addi %46, %47 : vector<1072x2xi32>
    %49 = tpu.iota {dimensions = array<i32: 1>} : vector<1072x2xi32>
    %c576_i32 = arith.constant 576 : i32
    %50 = vector.broadcast %c576_i32 : i32 to vector<1072x2xi32>
    %51 = arith.muli %49, %50 : vector<1072x2xi32>
    %52 = arith.subi %48, %51 : vector<1072x2xi32>
    %c0_i32 = arith.constant 0 : i32
    %53 = vector.broadcast %c0_i32 : i32 to vector<1072x2xi32>
    %54 = arith.cmpi sge, %52, %53 : vector<1072x2xi32>
    %c576_i32_14 = arith.constant 576 : i32
    %55 = vector.broadcast %c576_i32_14 : i32 to vector<1072x2xi32>
    %56 = arith.cmpi slt, %52, %55 : vector<1072x2xi32>
    %57 = arith.andi %54, %56 : vector<1072x2xi1>
    %c5_i32 = arith.constant 5 : i32
    %58 = vector.broadcast %c5_i32 : i32 to vector<1072x2xi32>
    %59 = arith.shrsi %52, %58 : vector<1072x2xi32>
    %c31_i32 = arith.constant 31 : i32
    %60 = vector.broadcast %c31_i32 : i32 to vector<1072x2xi32>
    %61 = arith.andi %48, %60 : vector<1072x2xi32>
    %c1_i32 = arith.constant 1 : i32
    %62 = vector.broadcast %c1_i32 : i32 to vector<1072x2xi32>
    %63 = arith.cmpi sge, %59, %62 : vector<1072x2xi32>
    %64 = arith.andi %57, %63 : vector<1072x2xi1>
    %c16_i32 = arith.constant 16 : i32
    %65 = vector.broadcast %c16_i32 : i32 to vector<1072x2xi32>
    %66 = arith.cmpi sle, %59, %65 : vector<1072x2xi32>
    %67 = arith.andi %64, %66 : vector<1072x2xi1>
    %c1_i32_15 = arith.constant 1 : i32
    %68 = vector.broadcast %c1_i32_15 : i32 to vector<1072x2xi32>
    %69 = arith.cmpi sge, %61, %68 : vector<1072x2xi32>
    %70 = arith.andi %67, %69 : vector<1072x2xi1>
    %c16_i32_16 = arith.constant 16 : i32
    %71 = vector.broadcast %c16_i32_16 : i32 to vector<1072x2xi32>
    %72 = arith.cmpi sle, %61, %71 : vector<1072x2xi32>
    %73 = arith.andi %70, %72 : vector<1072x2xi1>
    %cst_17 = arith.constant 3.906250e-03 : f32
    %cst_18 = arith.constant 0.000000e+00 : f32
    %74 = vector.broadcast %cst_17 : f32 to vector<1072x2xf32>
    %75 = vector.broadcast %cst_18 : f32 to vector<1072x2xf32>
    %76 = arith.select %73, %74, %75 : vector<1072x2xi1>, vector<1072x2xf32>
    %77 = arith.truncf %76 : vector<1072x2xf32> to vector<1072x2xbf16>
    %78 = arith.truncf %45 : vector<32x1072xf32> to vector<32x1072xbf16>
    %cst_19 = arith.constant dense<0.000000e+00> : vector<32x2xf32>
    %79 = tpu.matmul %78, %77, %cst_19 {dimension_numbers = #tpu.dot_dimension_numbers<[1], [0], [0], [1], [0, 0, 1, 1], [], []>} : vector<32x1072xbf16>, vector<1072x2xbf16>, vector<32x2xf32> -> vector<32x2xf32>
    %c32 = arith.constant 32 : index
    %c0_20 = arith.constant 0 : index
    %80 = vector.load %arg1[%c32, %c0_20] : memref<48x128xf32, #tpu.memory_space<vmem>>, vector<8x32xf32>
    %c32_21 = arith.constant 32 : index
    %c32_22 = arith.constant 32 : index
    %81 = vector.load %arg1[%c32_21, %c32_22] : memref<48x128xf32, #tpu.memory_space<vmem>>, vector<8x1xf32>
    %cst_23 = arith.constant dense<0.000000e+00> : vector<8x2xf32>
    %82 = tpu.matmul %80, %79, %cst_23 {dimension_numbers = #tpu.dot_dimension_numbers<[1], [0], [0], [1], [0, 0, 1, 1], [], []>} : vector<8x32xf32>, vector<32x2xf32>, vector<8x2xf32> -> vector<8x2xf32>
    %83 = vector.broadcast %81 : vector<8x1xf32> to vector<8x2xf32>
    %84 = arith.addf %82, %83 : vector<8x2xf32>
    %c40 = arith.constant 40 : index
    %c0_24 = arith.constant 0 : index
    %85 = vector.load %arg1[%c40, %c0_24] : memref<48x128xf32, #tpu.memory_space<vmem>>, vector<1x2xf32>
    %86 = tpu.iota {dimensions = array<i32: 0>} : vector<8x2xi32>
    %87 = arith.sitofp %86 : vector<8x2xi32> to vector<8x2xf32>
    %88 = vector.broadcast %85 : vector<1x2xf32> to vector<8x2xf32>
    %89 = arith.cmpf oeq, %87, %88 : vector<8x2xf32>
    %cst_25 = arith.constant 1.000000e+00 : f32
    %cst_26 = arith.constant 0.000000e+00 : f32
    %90 = vector.broadcast %cst_25 : f32 to vector<8x2xf32>
    %91 = vector.broadcast %cst_26 : f32 to vector<8x2xf32>
    %92 = arith.select %89, %90, %91 : vector<8x2xi1>, vector<8x2xf32>
    %cst_27 = arith.constant dense<0xFF800000> : vector<2xf32>
    %93 = vector.multi_reduction <maximumf>, %84, %cst_27 [0] : vector<8x2xf32> to vector<2xf32>
    %94 = vector.shape_cast %93 : vector<2xf32> to vector<1x2xf32>
    %95 = vector.broadcast %94 : vector<1x2xf32> to vector<8x2xf32>
    %96 = arith.subf %84, %95 : vector<8x2xf32>
    %97 = math.exp %96 : vector<8x2xf32>
    %cst_28 = arith.constant dense<0.000000e+00> : vector<2xf32>
    %98 = vector.multi_reduction <add>, %97, %cst_28 [0] : vector<8x2xf32> to vector<2xf32>
    %99 = vector.shape_cast %98 : vector<2xf32> to vector<1x2xf32>
    %100 = math.log %99 : vector<1x2xf32>
    %101 = arith.addf %94, %100 : vector<1x2xf32>
    %102 = vector.broadcast %101 : vector<1x2xf32> to vector<8x2xf32>
    %103 = arith.subf %84, %102 : vector<8x2xf32>
    %104 = arith.mulf %92, %103 : vector<8x2xf32>
    %cst_29 = arith.constant dense<0.000000e+00> : vector<2xf32>
    %105 = vector.multi_reduction <add>, %104, %cst_29 [0] : vector<8x2xf32> to vector<2xf32>
    %106 = vector.shape_cast %105 : vector<2xf32> to vector<1x2xf32>
    %cst_30 = arith.constant 0.000000e+00 : f32
    %107 = vector.broadcast %cst_30 : f32 to vector<1x2xf32>
    %108 = arith.subf %107, %106 : vector<1x2xf32>
    %c40_31 = arith.constant 40 : index
    %c4 = arith.constant 4 : index
    %109 = vector.load %arg1[%c40_31, %c4] : memref<48x128xf32, #tpu.memory_space<vmem>>, vector<1x2xf32>
    %110 = arith.mulf %108, %109 : vector<1x2xf32>
    %cst_32 = arith.constant dense<0.000000e+00> : vector<1xf32>
    %111 = vector.multi_reduction <add>, %110, %cst_32 [1] : vector<1x2xf32> to vector<1xf32>
    %112 = vector.shape_cast %111 : vector<1xf32> to vector<1x1xf32>
    %cst_33 = arith.constant dense<0.000000e+00> : vector<1xf32>
    %113 = vector.multi_reduction <add>, %109, %cst_33 [1] : vector<1x2xf32> to vector<1xf32>
    %114 = vector.shape_cast %113 : vector<1xf32> to vector<1x1xf32>
    %cst_34 = arith.constant 9.99999993E-9 : f32
    %115 = vector.broadcast %cst_34 : f32 to vector<1x1xf32>
    %116 = arith.maximumf %114, %115 : vector<1x1xf32>
    %117 = arith.divf %112, %116 : vector<1x1xf32>
    %cst_35 = arith.constant 0.000000e+00 : f32
    %118 = vector.broadcast %cst_35 : f32 to vector<40x128xf32>
    %c0_36 = arith.constant 0 : index
    %c0_37 = arith.constant 0 : index
    %119 = vector.load %arg2[%c0_36, %c0_37] : memref<40x128xf32, #tpu.memory_space<vmem>>, vector<40x128xf32>
    tpu.vector_store %arg2[%c0_36, %c0_37], %118 {strides = array<i32>} : memref<40x128xf32, #tpu.memory_space<vmem>>, vector<40x128xf32>,
    %c0_38 = arith.constant 0 : index
    %c0_39 = arith.constant 0 : index
    %120 = vector.load %arg2[%c0_38, %c0_39] : memref<40x128xf32, #tpu.memory_space<vmem>>, vector<32x2xf32>
    tpu.vector_store %arg2[%c0_38, %c0_39], %79 {strides = array<i32>} : memref<40x128xf32, #tpu.memory_space<vmem>>, vector<32x2xf32>,
    %c32_40 = arith.constant 32 : index
    %c0_41 = arith.constant 0 : index
    %121 = vector.load %arg2[%c32_40, %c0_41] : memref<40x128xf32, #tpu.memory_space<vmem>>, vector<8x2xf32>
    tpu.vector_store %arg2[%c32_40, %c0_41], %84 {strides = array<i32>} : memref<40x128xf32, #tpu.memory_space<vmem>>, vector<8x2xf32>,
    %c32_42 = arith.constant 32 : index
    %c4_43 = arith.constant 4 : index
    %122 = vector.load %arg2[%c32_42, %c4_43] : memref<40x128xf32, #tpu.memory_space<vmem>>, vector<1x1xf32>
    tpu.vector_store %arg2[%c32_42, %c4_43], %117 {strides = array<i32>} : memref<40x128xf32, #tpu.memory_space<vmem>>, vector<1x1xf32>,
    return
  }
}

</mosaic_0001>

<bundles_post_ra>
// kernel: benchmark_recognizer_forward.1
= control target key start
LH: loop header
LB: loop body
LE: loop exit
PB: predicated region body
PF: predicated region fallthrough
CT: control target
= control target key end

     0   :  { %v6823_v3 = vmov 0   ;;  %s6824_s17 = smov 127   ;;  %s6825_s24 = smov 124   ;;  %vm77_vm0 = vcmask 1039360   ;;  %vm93_vm1 = vcmask 1041408   ;;  %vm9239_vm2 = vcmask 31744   ;;  %s9236_s0 = inlined_call_operand.vmem [shape: f32[4,1152], index: 0, kind: input, shape index: {}]   ;;  %s9237_s1 = inlined_call_operand.vmem [shape: f32[48,128], index: 1, kind: input, shape index: {}]   ;;  %s9238_s2 = inlined_call_operand.vmem [shape: f32[40,128], index: 2, kind: output, shape index: {}]  }
   0x1   :  { %v13_v0 = vld [vmem:[%s9236_s0 + $0x8] sm:$0xff]  ;;  %v12_v1 = vld [vmem:[%s9236_s0] sm:$0xff]  ;;  %153 = vmatprep.mubr.bf16.mxu0 %v6823_v3  ;;  %206 = vmatprep.mubr.bf16.mxu1 %v6823_v3  ;;  %v14_v10 = vld [vmem:[%s9236_s0 + $0x10] sm:$0xff]  ;;  %s6826_s29 = smov 126   ;;  %s6828_s30 = smov 96   ;;  %vm1420_vm3 = vcmask 777216  }
   0x2   :  { %v6869_v2 = vld [vmem:[%s9237_s1] sm:$0xff]  ;;  %v6873_v4 = vpack.c.bf16 %v13_v0, %v13_v0  ;;  %v6875_v5 = vpack.c.bf16 %v12_v1, %v12_v1  ;;  %v6880_v6 = vld [vmem:[%s9237_s1 + $0x8] sm:$0xff]  ;;  %v21_v7 = vcombine.high %v12_v1, %v12_v1  ;;  %v6898_v11 = vld [vmem:[%s9237_s1 + $0x10] sm:$0xff]  ;;  %v6909_v13 = vpack.c.bf16 %v14_v10, %v14_v10  ;;  %s6829_s3 = smov 116   ;;  %s6830_s4 = smov 95  }
   0x3   :  { %v6888_v8 = vpack.c.bf16 %v6880_v6, %v6869_v2  ;;  %v6903_v12 = vld [vmem:[%s9237_s1 + $0x18] sm:$0xff]  ;;  %v23_v15 = vcombine.high %v14_v10, %v14_v10  ;;  %v16_v19 = vld [vmem:[%s9236_s0 + $0x20] sm:$0xf]  ;;  %v22_v21 = vcombine.high %v13_v0, %v13_v0  ;;  %s6831_s5 = smov 112   ;;  %s6832_s6 = smov 94   ;;  %vm698_vm4 = vcmask 1031168  }
   0x4   :  { %63 = vrot.lane.b32.xlu1 %v6873_v4, %s6824_s17  ;;  %59 = vrot.lane.b32.xlu0 %v6875_v5, %s6824_s17  ;;  %v6890_v9 = vpack.c.bf16 %v21_v7, %v21_v7  ;;  %v6913_v14 = vpack.c.bf16 %v6903_v12, %v6898_v11  ;;  %v15_v16 = vld [vmem:[%s9236_s0 + $0x18] sm:$0xff]  ;;  %v6933_v20 = vpack.c.bf16 %v16_v19, %v16_v19  ;;  %s6827_s0 = smov 120   ;;  %s6833_s7 = smov 108   ;;  %v389_v58 = vsel %vm93_vm1, %v6875_v5, 0 }
   0x5   :  { %v6922_v17 = vpack.c.bf16 %v15_v16, %v15_v16  ;;  %v6924_v18 = vpack.c.bf16 %v23_v15, %v23_v15  ;;  %v6944_v22 = vpack.c.bf16 %v22_v21, %v22_v21  ;;  %v24_v23 = vcombine.high %v15_v16, %v15_v16  ;;  %s6834_s8 = smov 64   ;;  %s6835_s9 = smov 104  }
   0x6   :  { %s6836_s10 = smov 63   ;;  %s6837_s11 = smov 100   ;;  %v401_v63 = vsel %vm93_vm1, %v6909_v13, 0  ;;  %v413_v19 = vsel %vm93_vm1, %v6933_v20, 0  ;;  %vm1781_vm5 = vcmask 769024   ;;  %vm1059_vm6 = vcmask 785408  }
   0x7   :  { %v6953_v24 = vpack.c.bf16 %v24_v23, %v24_v23  ;;  %s6838_s12 = smov 62   ;;  %vm2142_vm7 = vcmask 523264   ;;  %vm2503_vm8 = vcmask 515072   ;;  %vm2864_vm9 = vcmask 506880  }
   0x8   :  { %46 = vrot.lane.b32.xlu1 %v6888_v8, %s6825_s24  ;;  %61 = vrot.lane.b32.xlu0 %v6890_v9, %s6824_s17 }
   0xc   :  { %67 = vrot.lane.b32.xlu1 %v6909_v13, %s6824_s17  ;;  %48 = vrot.lane.b32.xlu0 %v6913_v14, %s6825_s24 }
  0x10   :  { %71 = vrot.lane.b32.xlu1 %v6922_v17, %s6824_s17  ;;  %69 = vrot.lane.b32.xlu0 %v6924_v18, %s6824_s17 }
  0x14   :  { %75 = vrot.lane.b32.xlu0 %v6933_v20, %s6824_s17  ;;  %680 = vrot.lane.b32.xlu1 %v6875_v5, %s6826_s29 }
  0x18   :  { %682 = vrot.lane.b32.xlu0 %v6890_v9, %s6826_s29  ;;  %684 = vrot.lane.b32.xlu1 %v6873_v4, %s6826_s29 }
  0x1c   :  { %676 = vrot.lane.b32.xlu0 %v6888_v8, %s6827_s0  ;;  %678 = vrot.lane.b32.xlu1 %v6913_v14, %s6827_s0 }
  0x20   :  { %65 = vrot.lane.b32.xlu0 %v6944_v22, %s6824_s17  ;;  %688 = vrot.lane.b32.xlu1 %v6909_v13, %s6826_s29 }
  0x24   :  { %690 = vrot.lane.b32.xlu0 %v6924_v18, %s6826_s29  ;;  %692 = vrot.lane.b32.xlu1 %v6922_v17, %s6826_s29 }
  0x28   :  { %73 = vrot.lane.b32.xlu0 %v6953_v24, %s6824_s17  ;;  %696 = vrot.lane.b32.xlu1 %v6933_v20, %s6826_s29 }
  0x2c   :  { %1043 = vrot.lane.b32.xlu1 %v6890_v9, %s6828_s30  ;;  %1041 = vrot.lane.b32.xlu0 %v6875_v5, %s6828_s30 }
  0x30   :  { %1037 = vrot.lane.b32.xlu1 %v6888_v8, %s6829_s3  ;;  %1045 = vrot.lane.b32.xlu0 %v6873_v4, %s6828_s30 }
  0x34   :  { %1049 = vrot.lane.b32.xlu1 %v6909_v13, %s6828_s30  ;;  %1039 = vrot.lane.b32.xlu0 %v6913_v14, %s6829_s3 }
  0x38   :  { %1053 = vrot.lane.b32.xlu1 %v6922_v17, %s6828_s30  ;;  %1051 = vrot.lane.b32.xlu0 %v6924_v18, %s6828_s30 }
  0x3c   :  { %686 = vrot.lane.b32.xlu1 %v6944_v22, %s6826_s29  ;;  %1057 = vrot.lane.b32.xlu0 %v6933_v20, %s6828_s30 }
  0x40   :  { %1404 = vrot.lane.b32.xlu1 %v6890_v9, %s6830_s4  ;;  %1402 = vrot.lane.b32.xlu0 %v6875_v5, %s6830_s4 }
  0x44   :  { %1398 = vrot.lane.b32.xlu1 %v6888_v8, %s6831_s5  ;;  %1406 = vrot.lane.b32.xlu0 %v6873_v4, %s6830_s4 }
  0x48   :  { %694 = vrot.lane.b32.xlu1 %v6953_v24, %s6826_s29  ;;  %1400 = vrot.lane.b32.xlu0 %v6913_v14, %s6831_s5 }
  0x4c   :  { %1412 = vrot.lane.b32.xlu1 %v6924_v18, %s6830_s4  ;;  %1410 = vrot.lane.b32.xlu0 %v6909_v13, %s6830_s4 }
  0x50   :  { %1047 = vrot.lane.b32.xlu1 %v6944_v22, %s6828_s30  ;;  %1414 = vrot.lane.b32.xlu0 %v6922_v17, %s6830_s4 }
  0x54   :  { %1763 = vrot.lane.b32.xlu1 %v6875_v5, %s6832_s6  ;;  %1418 = vrot.lane.b32.xlu0 %v6933_v20, %s6830_s4 }
  0x58   :  { %1767 = vrot.lane.b32.xlu1 %v6873_v4, %s6832_s6  ;;  %1765 = vrot.lane.b32.xlu0 %v6890_v9, %s6832_s6 }
  0x5c   :  { %1055 = vrot.lane.b32.xlu1 %v6953_v24, %s6828_s30  ;;  %1759 = vrot.lane.b32.xlu0 %v6888_v8, %s6833_s7 }
  0x60   :  { %1761 = vrot.lane.b32.xlu0 %v6913_v14, %s6833_s7  ;;  %1771 = vrot.lane.b32.xlu1 %v6909_v13, %s6832_s6 }
  0x64   :  { %1773 = vrot.lane.b32.xlu0 %v6924_v18, %s6832_s6  ;;  %1775 = vrot.lane.b32.xlu1 %v6922_v17, %s6832_s6 }
  0x68   :  { %1408 = vrot.lane.b32.xlu0 %v6944_v22, %s6830_s4  ;;  %1779 = vrot.lane.b32.xlu1 %v6933_v20, %s6832_s6 }
  0x6c   :  { %1416 = vrot.lane.b32.xlu0 %v6953_v24, %s6830_s4  ;;  %2124 = vrot.lane.b32.xlu1 %v6875_v5, %s6834_s8 }
  0x70   :  { %2126 = vrot.lane.b32.xlu0 %v6890_v9, %s6834_s8  ;;  %2128 = vrot.lane.b32.xlu1 %v6873_v4, %s6834_s8 }
  0x74   :  { %2120 = vrot.lane.b32.xlu0 %v6888_v8, %s6835_s9  ;;  %2122 = vrot.lane.b32.xlu1 %v6913_v14, %s6835_s9 }
  0x76   :  { %v64_v25 = vpop.permute.xlu1 %63  ;;  %v60_v26 = vpop.permute.xlu0 %59 }
  0x78   :  { %1769 = vrot.lane.b32.xlu0 %v6944_v22, %s6832_s6  ;;  %2132 = vrot.lane.b32.xlu1 %v6909_v13, %s6834_s8 }
  0x7a   :  { %v7024_v27 = vpop.permute.xlu1 %46  ;;  %v62_v28 = vpop.permute.xlu0 %61 }
  0x7b   :  { %v79_v29 = vsel %vm77_vm0, %v62_v28, %v64_v25  ;;  %v78_v30 = vsel %vm77_vm0, %v60_v26, %v62_v28 }
  0x7c   :  { %6063 = vmatprep.subr.msk.bf16.mxu0 %vm93_vm1, %v79_v29  ;;  %v95_v31 = vsel %vm93_vm1, %v78_v30, 0  ;;  %2134 = vrot.lane.b32.xlu0 %v6924_v18, %s6834_s8 }
  0x7d   :  { %122 = vmatpush1.bf16.msra.mxu0 %v95_v31  ;;  %2136 = vrot.lane.b32.xlu1 %v6922_v17, %s6834_s8 }
  0x7e   :  { %v68_v32 = vpop.permute.xlu1 %67  ;;  %v7034_v33 = vpop.permute.xlu0 %48 }
  0x80   :  { %6064 = vmatmul.mubr.msk.bf16.vlgmr.msra.gmra.mrb[0].mxu0 %vm9239_vm2, %v7024_v27  ;;  %1777 = vrot.lane.b32.xlu0 %v6953_v24, %s6832_s6 }
  0x81   :  { %163 = vmatprep.mubr.bf16.mxu0 %v6823_v3  ;;  %2140 = vrot.lane.b32.xlu1 %v6933_v20, %s6834_s8 }
  0x82   :  { %v72_v34 = vpop.permute.xlu1 %71  ;;  %v70_v35 = vpop.permute.xlu0 %69 }
  0x83   :  { %v82_v36 = vsel %vm77_vm0, %v68_v32, %v70_v35  ;;  %v83_v37 = vsel %vm77_vm0, %v70_v35, %v72_v34 }
  0x84   :  { %v107_v38 = vsel %vm93_vm1, %v82_v36, 0  ;;  %6069 = vmatprep.subr.msk.bf16.mxu0 %vm93_vm1, %v83_v37  ;;  %2485 = vrot.lane.b32.xlu0 %v6875_v5, %s6836_s10 }
  0x85   :  { %228 = vmatpush1.bf16.msra.mxu0 %v107_v38  ;;  %2487 = vrot.lane.b32.xlu1 %v6890_v9, %s6836_s10 }
  0x86   :  { %v76_v39 = vpop.permute.xlu0 %75  ;;  %v7051_v40 = vpop.permute.xlu1 %680 }
  0x87   :  { %6778 = vmatprep.subr.msk.bf16.mxu0 %vm93_vm1, %v76_v39  ;;  %v119_v44 = vsel %vm93_vm1, %v76_v39, 0 }
  0x88   :  { %6065 = vmatmul.mubr.msk.bf16.gmra.mrb[4].mxu0 %vm9239_vm2, %v7034_v33  ;;  %2489 = vrot.lane.b32.xlu0 %v6873_v4, %s6836_s10 }
  0x89   :  { %259 = vmatprep.mubr.bf16.mxu0 %v6823_v3  ;;  %2481 = vrot.lane.b32.xlu1 %v6888_v8, %s6837_s11 }
  0x8a   :  { %v7060_v41 = vpop.permute.xlu0 %682  ;;  %v7062_v42 = vpop.permute.xlu1 %684 }
  0x8b   :  { %v700_v23 = vsel %vm698_vm4, %v7060_v41, %v7062_v42  ;;  %v699_v30 = vsel %vm698_vm4, %v7051_v40, %v7060_v41 }
  0x8c   :  { %2130 = vrot.lane.b32.xlu0 %v6944_v22, %s6834_s8 }
  0x8d   :  { %2483 = vrot.lane.b32.xlu1 %v6913_v14, %s6837_s11 }
  0x8e   :  { %v7067_v43 = vpop.permute.xlu0 %676  ;;  %v7070_v45 = vpop.permute.xlu1 %678 }
  0x90   :  { %6070 = vmatmul.mubr.msk.bf16.vlgmr.msra.gmra.mrb[8].mxu0 %vm9239_vm2, %v7024_v27  ;;  %2493 = vrot.lane.b32.xlu0 %v6909_v13, %s6836_s10 }
  0x91   :  { %6410 = vmatpush3.bf16.msra.mxu0 %v119_v44  ;;  %269 = vmatprep.mubr.bf16.mxu0 %v6823_v3 }
  0x92   :  { %v66_v46 = vpop.permute.xlu0 %65  ;;  %6077 = vmatprep.subr.msk.bf16.mxu0 %vm93_vm1, %v6890_v9  ;;  %v7079_v47 = vpop.permute.xlu1 %688  ;;  %2495 = vrot.lane.b32.xlu1 %v6924_v18, %s6836_s10 }
  0x93   :  { %v81_v48 = vsel %vm77_vm0, %v66_v46, %v68_v32  ;;  %v80_v49 = vsel %vm77_vm0, %v64_v25, %v66_v46  ;;  %v714_v32 = vsel %vm93_vm1, %v699_v30, 0 }
  0x94   :  { %6066 = vmatprep.subr.msk.bf16.mxu1 %vm93_vm1, %v81_v48  ;;  %v101_v50 = vsel %vm93_vm1, %v80_v49, 0  ;;  %2497 = vrot.lane.b32.xlu0 %v6922_v17, %s6836_s10 }
  0x95   :  { %175 = vmatpush1.bf16.msra.mxu1 %v101_v50 }
  0x96   :  { %v7089_v51 = vpop.permute.xlu0 %690  ;;  %v7091_v52 = vpop.permute.xlu1 %692  ;;  %2138 = vrot.lane.b32.xlu1 %v6953_v24, %s6834_s8 }
  0x97   :  { %v704_v36 = vsel %vm698_vm4, %v7089_v51, %v7091_v52 }
  0x98   :  { %6067 = vmatmul.mubr.msk.bf16.vlgmr.msra.gmra.mrb[0].mxu1 %vm9239_vm2, %v7024_v27  ;;  %6071 = vmatmul.mubr.msk.bf16.gmra.mrb[12].mxu0 %vm9239_vm2, %v7034_v33 }
  0x99   :  { %6411 = vmatprep.mubr.msk.bf16.mxu0 %vm9239_vm2, %v7024_v27  ;;  %216 = vmatprep.mubr.bf16.mxu1 %v6823_v3 }
  0x9a   :  { %v74_v53 = vpop.permute.xlu0 %73  ;;  %v7102_v54 = vpop.permute.xlu1 %696  ;;  %2491 = vrot.lane.b32.xlu1 %v6944_v22, %s6836_s10  ;;  %2501 = vrot.lane.b32.xlu0 %v6933_v20, %s6836_s10 }
  0x9b   :  { %v84_v55 = vsel %vm77_vm0, %v72_v34, %v74_v53  ;;  %v85_v56 = vsel %vm77_vm0, %v74_v53, %v76_v39 }
  0x9c   :  { %v113_v57 = vsel %vm93_vm1, %v84_v55, 0  ;;  %6072 = vmatprep.subr.msk.bf16.mxu1 %vm93_vm1, %v85_v56  ;;  %v738_v56 = vsel %vm93_vm1, %v7102_v54, 0 }
  0x9d   :  { %281 = vmatpush1.bf16.msra.mxu1 %v113_v57 }
  0x9e   :  { %6080 = vmatprep.subr.msk.bf16.mxu1 %vm93_vm1, %v6944_v22  ;;  %v7116_v59 = vpop.permute.xlu1 %1043  ;;  %v7118_v60 = vpop.permute.xlu0 %1041  ;;  %2846 = vrot.lane.b32.xlu0 %v6875_v5, %s6838_s12  ;;  %v395_v5 = vsel %vm93_vm1, %v6873_v4, 0 }
  0x9f   :  { %2848 = vrot.lane.b32.xlu1 %v6890_v9, %s6838_s12 }
  0xa0   :  { %6068 = vmatmul.mubr.msk.bf16.gmra.mrb[4].mxu1 %vm9239_vm2, %v7034_v33  ;;  %6412 = vmatmul.mubr.msk.bf16.vlgmr.msra.gmra.mrb[16].mxu0 %vm9239_vm2, %v7034_v33 }
  0xa1   :  { %416 = vmatpush1.bf16.msra.mxu0 %v389_v58  ;;  %312 = vmatprep.mubr.bf16.mxu1 %v6823_v3 }
  0xa2   :  { %447 = vmatprep.mubr.bf16.mxu0 %v6823_v3  ;;  %6083 = vmatprep.subr.msk.bf16.mxu0 %vm93_vm1, %v6924_v18  ;;  %v7132_v61 = vpop.permute.xlu1 %1037  ;;  %v7134_v62 = vpop.permute.xlu0 %1045 }
  0xa3   :  { %2850 = vrot.lane.b32.xlu0 %v6873_v4, %s6838_s12  ;;  %2842 = vrot.lane.b32.xlu1 %v6888_v8, %s6828_s30 }
  0xa6   :  { %v7142_v0 = vpop.permute.xlu1 %1049  ;;  %v7144_v1 = vpop.permute.xlu0 %1039 }
  0xa7   :  { %2499 = vrot.lane.b32.xlu0 %v6953_v24, %s6836_s10  ;;  %2844 = vrot.lane.b32.xlu1 %v6913_v14, %s6828_s30 }
  0xa8   :  { %6073 = vmatmul.mubr.msk.bf16.vlgmr.msra.gmra.mrb[8].mxu1 %vm9239_vm2, %v7024_v27  ;;  %6078 = vmatmul.mubr.msk.bf16.vlgmr.msra.gmra.mrb[0].mxu0 %vm9239_vm2, %v6888_v8 }
  0xa9   :  { %522 = vmatpush1.bf16.msra.mxu0 %v401_v63  ;;  %322 = vmatprep.mubr.bf16.mxu1 %v6823_v3  ;;  %v1061_v63 = vsel %vm1059_vm6, %v7116_v59, %v7134_v62 }
  0xaa   :  { %457 = vmatprep.mubr.bf16.mxu0 %v6823_v3  ;;  %469 = vmatpush1.bf16.msra.mxu1 %v395_v5  ;;  %v7158_v7 = vpop.permute.xlu1 %1053  ;;  %v7160_v4 = vpop.permute.xlu0 %1051 }
  0xab   :  { %6779 = vmatprep.subr.msk.bf16.mxu0 %vm93_vm1, %v6933_v20  ;;  %6086 = vmatprep.subr.msk.bf16.mxu1 %vm93_vm1, %v6953_v24 }
  0xac   :  { %2854 = vrot.lane.b32.xlu1 %v6909_v13, %s6838_s12  ;;  %2852 = vrot.lane.b32.xlu0 %v6944_v22, %s6838_s12 }
  0xae   :  { %v687_v9 = vpop.permute.xlu1 %686  ;;  %v7170_v10 = vpop.permute.xlu0 %1057 }
  0xaf   :  { %v702_v25 = vsel %vm698_vm4, %v687_v9, %v7079_v47  ;;  %v701_v31 = vsel %vm698_vm4, %v7062_v42, %v687_v9 }
  0xb0   :  { %6074 = vmatmul.mubr.msk.bf16.gmra.mrb[12].mxu1 %vm9239_vm2, %v7034_v33  ;;  %6079 = vmatmul.mubr.msk.bf16.gmra.mrb[4].mxu0 %vm9239_vm2, %v6913_v14  ;;  %v720_v33 = vsel %vm93_vm1, %v701_v31, 0 }
  0xb1   :  { %500 = vmatprep.mubr.bf16.mxu1 %v6823_v3  ;;  %553 = vmatprep.mubr.bf16.mxu0 %v6823_v3 }
  0xb2   :  { %v7178_v15 = vpop.permute.xlu1 %1404  ;;  %v1403_v13 = vpop.permute.xlu0 %1402  ;;  %2858 = vrot.lane.b32.xlu1 %v6922_v17, %s6838_s12  ;;  %2856 = vrot.lane.b32.xlu0 %v6924_v18, %s6838_s12  ;;  %v407_v18 = vsel %vm93_vm1, %v6922_v17, 0 }
  0xb3   :  { %v7186_v16 = vsel %vm1420_vm3, %v1403_v13, %v7178_v15 }
  0xb6   :  { %v7190_v21 = vpop.permute.xlu1 %1398  ;;  %v7192_v22 = vpop.permute.xlu0 %1406  ;;  %2862 = vrot.lane.b32.xlu1 %v6933_v20, %s6838_s12  ;;  %2860 = vrot.lane.b32.xlu0 %v6953_v24, %s6838_s12 }
  0xb8   :  { %6081 = vmatmul.mubr.msk.bf16.vlgmr.msra.gmra.mrb[0].mxu1 %vm9239_vm2, %v6888_v8  ;;  %6084 = vmatmul.mubr.msk.bf16.vlgmr.msra.gmra.mrb[8].mxu0 %vm9239_vm2, %v6888_v8 }
  0xb9   :  { %6416 = vmatpush3.bf16.msra.mxu0 %v413_v19  ;;  %510 = vmatprep.mubr.bf16.mxu1 %v6823_v3 }
  0xba   :  { %563 = vmatprep.mubr.bf16.mxu0 %v6823_v3  ;;  %575 = vmatpush1.bf16.msra.mxu1 %v407_v18  ;;  %v695_v17 = vpop.permute.xlu1 %694  ;;  %v7211_v20 = vpop.permute.xlu0 %1400 }
  0xbb   :  { %6091 = vmatprep.subr.msk.bf16.mxu0 %vm93_vm1, %v700_v23  ;;  %6094 = vmatprep.subr.msk.bf16.mxu1 %vm93_vm1, %v702_v25  ;;  %v706_v37 = vsel %vm698_vm4, %v695_v17, %v7102_v54  ;;  %v705_v49 = vsel %vm698_vm4, %v7091_v52, %v695_v17 }
  0xbe   :  { %v7215_v24 = vpop.permute.xlu1 %1412  ;;  %v7217_v26 = vpop.permute.xlu0 %1410 }
  0xbf   :  { %v7222_v27 = vsel %vm1420_vm3, %v7217_v26, %v7215_v24 }
  0xc0   :  { %6082 = vmatmul.mubr.msk.bf16.gmra.mrb[4].mxu1 %vm9239_vm2, %v6913_v14  ;;  %6085 = vmatmul.mubr.msk.bf16.gmra.mrb[12].mxu0 %vm9239_vm2, %v6913_v14 }
  0xc1   :  { %606 = vmatprep.mubr.bf16.mxu1 %v6823_v3  ;;  %6417 = vmatprep.mubr.msk.bf16.mxu0 %vm9239_vm2, %v6888_v8 }
  0xc2   :  { %v7231_v28 = vpop.permute.xlu1 %1047  ;;  %v7233_v29 = vpop.permute.xlu0 %1414 }
  0xc3   :  { %v1063_v53 = vsel %vm1059_vm6, %v7231_v28, %v7142_v0  ;;  %v1062_v13 = vsel %vm1059_vm6, %v7134_v62, %v7231_v28  ;;  %v1060_v28 = vsel %vm1059_vm6, %v7118_v60, %v7116_v59  ;;  %v1064_v60 = vsel %vm1059_vm6, %v7142_v0, %v7160_v4 }
  0xc4   :  { %v1081_v23 = vsel %vm93_vm1, %v1062_v13, 0  ;;  %v1075_v30 = vsel %vm93_vm1, %v1060_v28, 0 }
  0xc6   :  { %v1764_v34 = vpop.permute.xlu1 %1763  ;;  %v7242_v35 = vpop.permute.xlu0 %1418 }
  0xc8   :  { %6087 = vmatmul.mubr.msk.bf16.vlgmr.msra.gmra.mrb[8].mxu1 %vm9239_vm2, %v6888_v8  ;;  %6418 = vmatmul.mubr.msk.bf16.vlgmr.msra.gmra.mrb[16].mxu0 %vm9239_vm2, %v6913_v14  ;;  %v703_v8 = vsel %vm698_vm4, %v7079_v47, %v7089_v51 }
  0xc9   :  { %741 = vmatpush1.bf16.msra.mxu0 %v714_v32  ;;  %794 = vmatpush1.bf16.msra.mxu1 %v720_v33  ;;  %v726_v42 = vsel %vm93_vm1, %v703_v8, 0 }
  0xca   :  { %616 = vmatprep.mubr.bf16.mxu1 %v6823_v3  ;;  %772 = vmatprep.mubr.bf16.mxu0 %v6823_v3  ;;  %v7255_v38 = vpop.permute.xlu1 %1767  ;;  %v1766_v39 = vpop.permute.xlu0 %1765 }
  0xcb   :  { %6097 = vmatprep.subr.msk.bf16.mxu0 %vm93_vm1, %v704_v36  ;;  %6100 = vmatprep.subr.msk.bf16.mxu1 %vm93_vm1, %v706_v37  ;;  %v7263_v40 = vsel %vm1781_vm5, %v1764_v34, %v1766_v39  ;;  %v7267_v41 = vsel %vm1781_vm5, %v1766_v39, %v7255_v38 }
  0xce   :  { %v7270_v44 = vpop.permute.xlu1 %1055  ;;  %v7272_v46 = vpop.permute.xlu0 %1759 }
  0xcf   :  { %v1067_v25 = vsel %vm1059_vm6, %v7270_v44, %v7170_v10  ;;  %v1066_v34 = vsel %vm1059_vm6, %v7158_v7, %v7270_v44 }
  0xd0   :  { %6088 = vmatmul.mubr.msk.bf16.gmra.mrb[12].mxu1 %vm9239_vm2, %v6913_v14  ;;  %6092 = vmatmul.mubr.msk.bf16.vlgmr.msra.gmra.mrb[0].mxu0 %vm9239_vm2, %v7067_v43  ;;  %v732_v14 = vsel %vm93_vm1, %v705_v49, 0  ;;  %v1093_v37 = vsel %vm93_vm1, %v1066_v34, 0  ;;  %v1436_v34 = vsel %vm93_vm1, %v7186_v16, 0 }
  0xd1   :  { %847 = vmatpush1.bf16.msra.mxu0 %v726_v42  ;;  %782 = vmatprep.mubr.bf16.mxu0 %v6823_v3 }
  0xd2   :  { %825 = vmatprep.mubr.bf16.mxu1 %v6823_v3  ;;  %6780 = vmatprep.subr.msk.bf16.mxu0 %vm93_vm1, %v7102_v54  ;;  %v7282_v47 = vpop.permute.xlu0 %1761  ;;  %v7284_v48 = vpop.permute.xlu1 %1771 }
  0xd6   :  { %v7289_v50 = vpop.permute.xlu0 %1773  ;;  %v7291_v51 = vpop.permute.xlu1 %1775 }
  0xd8   :  { %6093 = vmatmul.mubr.msk.bf16.gmra.mrb[4].mxu0 %vm9239_vm2, %v7070_v45  ;;  %6095 = vmatmul.mubr.msk.bf16.vlgmr.msra.gmra.mrb[0].mxu1 %vm9239_vm2, %v7067_v43 }
  0xd9   :  { %900 = vmatpush1.bf16.msra.mxu1 %v732_v14  ;;  %835 = vmatprep.mubr.bf16.mxu1 %v6823_v3 }
  0xda   :  { %878 = vmatprep.mubr.bf16.mxu0 %v6823_v3  ;;  %6108 = vmatprep.subr.msk.bf16.mxu1 %vm93_vm1, %v1063_v53  ;;  %v7303_v52 = vpop.permute.xlu0 %1408  ;;  %v7305_v55 = vpop.permute.xlu1 %1779 }
  0xdb   :  { %v1424_v0 = vsel %vm1420_vm3, %v7303_v52, %v7217_v26  ;;  %v1423_v53 = vsel %vm1420_vm3, %v7192_v22, %v7303_v52 }
  0xde   :  { %v7309_v57 = vpop.permute.xlu0 %1416  ;;  %v2125_v58 = vpop.permute.xlu1 %2124 }
  0xdf   :  { %v1428_v52 = vsel %vm1420_vm3, %v7309_v57, %v7242_v35 }
  0xe0   :  { %6096 = vmatmul.mubr.msk.bf16.gmra.mrb[4].mxu1 %vm9239_vm2, %v7070_v45  ;;  %6098 = vmatmul.mubr.msk.bf16.vlgmr.msra.gmra.mrb[8].mxu0 %vm9239_vm2, %v7067_v43 }
  0xe1   :  { %6422 = vmatpush3.bf16.msra.mxu0 %v738_v56  ;;  %888 = vmatprep.mubr.bf16.mxu0 %v6823_v3 }
  0xe2   :  { %931 = vmatprep.mubr.bf16.mxu1 %v6823_v3  ;;  %6105 = vmatprep.subr.msk.bf16.mxu0 %vm93_vm1, %v1061_v63  ;;  %v7321_v54 = vpop.permute.xlu0 %2126  ;;  %v7323_v5 = vpop.permute.xlu1 %2128  ;;  %v1099_v63 = vsel %vm93_vm1, %v7170_v10, 0 }
  0xe3   :  { %v7327_v9 = vsel %vm2142_vm7, %v2125_v58, %v7321_v54 }
  0xe6   :  { %v7332_v19 = vpop.permute.xlu0 %2120  ;;  %v7334_v18 = vpop.permute.xlu1 %2122 }
  0xe8   :  { %6099 = vmatmul.mubr.msk.bf16.gmra.mrb[12].mxu0 %vm9239_vm2, %v7070_v45  ;;  %6101 = vmatmul.mubr.msk.bf16.vlgmr.msra.gmra.mrb[8].mxu1 %vm9239_vm2, %v7067_v43 }
  0xe9   :  { %6423 = vmatprep.mubr.msk.bf16.mxu0 %vm9239_vm2, %v7067_v43  ;;  %941 = vmatprep.mubr.bf16.mxu1 %v6823_v3  ;;  %v1065_v43 = vsel %vm1059_vm6, %v7160_v4, %v7158_v7 }
  0xea   :  { %1155 = vmatpush1.bf16.msra.mxu1 %v1081_v23  ;;  %v7347_v62 = vpop.permute.xlu0 %1769  ;;  %v7349_v17 = vpop.permute.xlu1 %2132  ;;  %v1442_v23 = vsel %vm93_vm1, %v1423_v53, 0 }
  0xeb   :  { %6114 = vmatprep.subr.msk.bf16.mxu1 %vm93_vm1, %v1067_v25  ;;  %v1422_v25 = vsel %vm1420_vm3, %v7178_v15, %v7192_v22  ;;  %v1785_v16 = vsel %vm1781_vm5, %v7347_v62, %v7284_v48 }
  0xee   :  { %v7356_v31 = vpop.permute.xlu0 %2134 }
  0xef   :  { %v7364_v32 = vsel %vm2142_vm7, %v7349_v17, %v7356_v31  ;;  %v7366_v33 = vpop.permute.xlu1 %2136 }
  0xf0   :  { %6102 = vmatmul.mubr.msk.bf16.gmra.mrb[12].mxu1 %vm9239_vm2, %v7070_v45  ;;  %6424 = vmatmul.mubr.msk.bf16.vlgmr.msra.gmra.mrb[16].mxu0 %vm9239_vm2, %v7070_v45  ;;  %v1087_v45 = vsel %vm93_vm1, %v1064_v60, 0  ;;  %v1427_v60 = vsel %vm1420_vm3, %v7233_v29, %v7309_v57 }
  0xf1   :  { %1102 = vmatpush1.bf16.msra.mxu0 %v1075_v30  ;;  %1133 = vmatprep.mubr.bf16.mxu0 %v6823_v3 }
  0xf2   :  { %1186 = vmatprep.mubr.bf16.mxu1 %v6823_v3  ;;  %6111 = vmatprep.subr.msk.bf16.mxu0 %vm93_vm1, %v1065_v43  ;;  %v7375_v59 = vpop.permute.xlu0 %1777 }
  0xf3   :  { %v7383_v36 = vpop.permute.xlu1 %2140 }
  0xf6   :  { %v2486_v39 = vpop.permute.xlu0 %2485 }
  0xf7   :  { %v2488_v8 = vpop.permute.xlu1 %2487 }
  0xf8   :  { %6106 = vmatmul.mubr.msk.bf16.vlgmr.msra.gmra.mrb[0].mxu0 %vm9239_vm2, %v7132_v61  ;;  %6109 = vmatmul.mubr.msk.bf16.vlgmr.msra.gmra.mrb[0].mxu1 %vm9239_vm2, %v7132_v61  ;;  %v7395_v7 = vsel %vm2503_vm8, %v2486_v39, %v2488_v8 }
  0xf9   :  { %1208 = vmatpush1.bf16.msra.mxu0 %v1087_v45  ;;  %1261 = vmatpush1.bf16.msra.mxu1 %v1093_v37  ;;  %v1454_v37 = vsel %vm93_vm1, %v1427_v60, 0 }
  0xfa   :  { %1143 = vmatprep.mubr.bf16.mxu0 %v6823_v3  ;;  %1196 = vmatprep.mubr.bf16.mxu1 %v6823_v3  ;;  %v7399_v4 = vpop.permute.xlu0 %2489 }
  0xfb   :  { %6781 = vmatprep.subr.msk.bf16.mxu0 %vm93_vm1, %v7170_v10  ;;  %6122 = vmatprep.subr.msk.bf16.mxu1 %vm93_vm1, %v1424_v0  ;;  %v7406_v42 = vsel %vm2503_vm8, %v2488_v8, %v7399_v4  ;;  %v7408_v26 = vpop.permute.xlu1 %2481 }
  0xfe   :  { %v7410_v44 = vpop.permute.xlu0 %2130 }
  0xff   :  { %v7412_v49 = vpop.permute.xlu1 %2483 }
 0x100   :  { %6107 = vmatmul.mubr.msk.bf16.gmra.mrb[4].mxu0 %vm9239_vm2, %v7144_v1  ;;  %6110 = vmatmul.mubr.msk.bf16.gmra.mrb[4].mxu1 %vm9239_vm2, %v7144_v1 }
 0x101   :  { %1239 = vmatprep.mubr.bf16.mxu0 %v6823_v3  ;;  %1292 = vmatprep.mubr.bf16.mxu1 %v6823_v3 }
 0x102   :  { %v7420_v14 = vpop.permute.xlu0 %2493 }
 0x104   :  { %v7425_v56 = vpop.permute.xlu1 %2495 }
 0x105   :  { %v7430_v58 = vsel %vm2503_vm8, %v7420_v14, %v7425_v56 }
 0x106   :  { %v7434_v13 = vpop.permute.xlu0 %2497 }
 0x108   :  { %6112 = vmatmul.mubr.msk.bf16.vlgmr.msra.gmra.mrb[8].mxu0 %vm9239_vm2, %v7132_v61  ;;  %6115 = vmatmul.mubr.msk.bf16.vlgmr.msra.gmra.mrb[8].mxu1 %vm9239_vm2, %v7132_v61  ;;  %v7448_v10 = vpop.permute.xlu1 %2138 }
 0x109   :  { %6428 = vmatpush3.bf16.msra.mxu0 %v1099_v63  ;;  %1249 = vmatprep.mubr.bf16.mxu0 %v6823_v3 }
 0x10a   :  { %1302 = vmatprep.mubr.bf16.mxu1 %v6823_v3  ;;  %1516 = vmatpush1.bf16.msra.mxu1 %v1442_v23  ;;  %v1788_v23 = vsel %vm1781_vm5, %v7291_v51, %v7375_v59 }
 0x10b   :  { %6119 = vmatprep.subr.msk.bf16.mxu0 %vm93_vm1, %v1422_v25  ;;  %6128 = vmatprep.subr.msk.bf16.mxu1 %vm93_vm1, %v1428_v52  ;;  %v2146_v25 = vsel %vm2142_vm7, %v7410_v44, %v7349_v17  ;;  %v2150_v17 = vsel %vm2142_vm7, %v7448_v10, %v7383_v36  ;;  %v2144_v52 = vsel %vm2142_vm7, %v7321_v54, %v7323_v5 }
 0x10c   :  { %v7453_v15 = vpop.permute.xlu0 %2501  ;;  %v7455_v22 = vpop.permute.xlu1 %2491 }
 0x10d   :  { %v2506_v54 = vsel %vm2503_vm8, %v7399_v4, %v7455_v22 }
 0x110   :  { %6113 = vmatmul.mubr.msk.bf16.gmra.mrb[12].mxu0 %vm9239_vm2, %v7144_v1  ;;  %6116 = vmatmul.mubr.msk.bf16.gmra.mrb[12].mxu1 %vm9239_vm2, %v7144_v1  ;;  %v2847_v28 = vpop.permute.xlu0 %2846 }
 0x111   :  { %6429 = vmatprep.mubr.msk.bf16.mxu0 %vm9239_vm2, %v7132_v61  ;;  %1547 = vmatprep.mubr.bf16.mxu1 %v6823_v3  ;;  %v7464_v30 = vpop.permute.xlu1 %2848  ;;  %v1426_v61 = vsel %vm1420_vm3, %v7215_v24, %v7233_v29  ;;  %v1448_v24 = vsel %vm93_vm1, %v7222_v27, 0  ;;  %v1784_v27 = vsel %vm1781_vm5, %v7255_v38, %v7347_v62  ;;  %v1789_v38 = vsel %vm1781_vm5, %v7375_v59, %v7305_v55 }
 0x112   :  { %v7468_v43 = vsel %vm2864_vm9, %v2847_v28, %v7464_v30  ;;  %v1803_v63 = vsel %vm93_vm1, %v1784_v27, 0  ;;  %v1460_v62 = vsel %vm93_vm1, %v7242_v35, 0  ;;  %v1787_v59 = vsel %vm1781_vm5, %v7289_v50, %v7291_v51 }
 0x113   :  { %v2507_v28 = vsel %vm2503_vm8, %v7455_v22, %v7420_v14  ;;  %v2509_v22 = vsel %vm2503_vm8, %v7425_v56, %v7434_v13 }
 0x115   :  { %v7475_v45 = vpop.permute.xlu0 %2850  ;;  %v7485_v39 = vpop.permute.xlu1 %2842 }
 0x118   :  { %6430 = vmatmul.mubr.msk.bf16.vlgmr.msra.gmra.mrb[16].mxu0 %vm9239_vm2, %v7144_v1  ;;  %6123 = vmatmul.mubr.msk.bf16.vlgmr.msra.gmra.mrb[0].mxu1 %vm9239_vm2, %v7190_v21 }
 0x119   :  { %1463 = vmatpush1.bf16.msra.mxu0 %v1436_v34  ;;  %1494 = vmatprep.mubr.bf16.mxu0 %v6823_v3  ;;  %v7494_v1 = vpop.permute.xlu0 %2499  ;;  %v7498_v29 = vpop.permute.xlu1 %2844 }
 0x11a   :  { %1557 = vmatprep.mubr.bf16.mxu1 %v6823_v3  ;;  %6125 = vmatprep.subr.msk.bf16.mxu0 %vm93_vm1, %v1426_v61 }
 0x11b   :  { %1622 = vmatpush1.bf16.msra.mxu1 %v1454_v37 }
 0x11c   :  { %6136 = vmatprep.subr.msk.bf16.mxu1 %vm93_vm1, %v1785_v16 }
 0x11e   :  { %v7504_v57 = vpop.permute.xlu0 %2852  ;;  %v7513_v8 = vpop.permute.xlu1 %2854 }
 0x120   :  { %6120 = vmatmul.mubr.msk.bf16.vlgmr.msra.gmra.mrb[0].mxu0 %vm9239_vm2, %v7190_v21  ;;  %6124 = vmatmul.mubr.msk.bf16.gmra.mrb[4].mxu1 %vm9239_vm2, %v7211_v20 }
 0x121   :  { %1569 = vmatpush1.bf16.msra.mxu0 %v1448_v24  ;;  %1504 = vmatprep.mubr.bf16.mxu0 %v6823_v3 }
 0x122   :  { %1653 = vmatprep.mubr.bf16.mxu1 %v6823_v3  ;;  %6782 = vmatprep.subr.msk.bf16.mxu0 %vm93_vm1, %v7242_v35  ;;  %v1815_v35 = vsel %vm93_vm1, %v1788_v23, 0 }
 0x124   :  { %v7515_v0 = vpop.permute.xlu0 %2856 }
 0x125   :  { %v7520_v53 = vsel %vm2864_vm9, %v7513_v8, %v7515_v0 }
 0x128   :  { %6121 = vmatmul.mubr.msk.bf16.gmra.mrb[4].mxu0 %vm9239_vm2, %v7211_v20  ;;  %6129 = vmatmul.mubr.msk.bf16.vlgmr.msra.gmra.mrb[8].mxu1 %vm9239_vm2, %v7190_v21  ;;  %v2861_v4 = vpop.permute.xlu0 %2860 }
 0x129   :  { %1600 = vmatprep.mubr.bf16.mxu0 %v6823_v3  ;;  %1663 = vmatprep.mubr.bf16.mxu1 %v6823_v3 }
 0x12a   :  { %1877 = vmatpush1.bf16.msra.mxu1 %v1803_v63 }
 0x12b   :  { %6142 = vmatprep.subr.msk.bf16.mxu1 %vm93_vm1, %v1789_v38 }
 0x130   :  { %6126 = vmatmul.mubr.msk.bf16.vlgmr.msra.gmra.mrb[8].mxu0 %vm9239_vm2, %v7190_v21  ;;  %6130 = vmatmul.mubr.msk.bf16.gmra.mrb[12].mxu1 %vm9239_vm2, %v7211_v20 }
 0x131   :  { %6434 = vmatpush3.bf16.msra.mxu0 %v1460_v62  ;;  %1610 = vmatprep.mubr.bf16.mxu0 %v6823_v3 }
 0x132   :  { %1908 = vmatprep.mubr.bf16.mxu1 %v6823_v3  ;;  %6133 = vmatprep.subr.msk.bf16.mxu0 %vm93_vm1, %v7267_v41  ;;  %v1797_v41 = vsel %vm93_vm1, %v7263_v40, 0  ;;  %v2145_v40 = vsel %vm2142_vm7, %v7323_v5, %v7410_v44  ;;  %v2158_v5 = vsel %vm93_vm1, %v7327_v9, 0  ;;  %v2868_v9 = vsel %vm2864_vm9, %v7504_v57, %v7513_v8 }
 0x133   :  { %v2164_v51 = vsel %vm93_vm1, %v2145_v40, 0 }
 0x138   :  { %6127 = vmatmul.mubr.msk.bf16.gmra.mrb[12].mxu0 %vm9239_vm2, %v7211_v20  ;;  %6137 = vmatmul.mubr.msk.bf16.vlgmr.msra.gmra.mrb[0].mxu1 %vm9239_vm2, %v7272_v46 }
 0x139   :  { %6435 = vmatprep.mubr.msk.bf16.mxu0 %vm9239_vm2, %v7190_v21  ;;  %1918 = vmatprep.mubr.bf16.mxu1 %v6823_v3  ;;  %v1786_v21 = vsel %vm1781_vm5, %v7284_v48, %v7289_v50  ;;  %v2149_v48 = vsel %vm2142_vm7, %v7366_v33, %v7448_v10  ;;  %v1821_v50 = vsel %vm93_vm1, %v7305_v55, 0 }
 0x13a   :  { %1983 = vmatpush1.bf16.msra.mxu1 %v1815_v35  ;;  %v2176_v44 = vsel %vm93_vm1, %v2149_v48, 0 }
 0x13b   :  { %6150 = vmatprep.subr.msk.bf16.mxu1 %vm93_vm1, %v2146_v25 }
 0x140   :  { %6436 = vmatmul.mubr.msk.bf16.vlgmr.msra.gmra.mrb[16].mxu0 %vm9239_vm2, %v7211_v20  ;;  %6138 = vmatmul.mubr.msk.bf16.gmra.mrb[4].mxu1 %vm9239_vm2, %v7282_v47  ;;  %v1809_v20 = vsel %vm93_vm1, %v1786_v21, 0 }
 0x141   :  { %1824 = vmatpush1.bf16.msra.mxu0 %v1797_v41  ;;  %1855 = vmatprep.mubr.bf16.mxu0 %v6823_v3 }
 0x142   :  { %2014 = vmatprep.mubr.bf16.mxu1 %v6823_v3  ;;  %6139 = vmatprep.subr.msk.bf16.mxu0 %vm93_vm1, %v1787_v59 }
 0x148   :  { %6134 = vmatmul.mubr.msk.bf16.vlgmr.msra.gmra.mrb[0].mxu0 %vm9239_vm2, %v7272_v46  ;;  %6143 = vmatmul.mubr.msk.bf16.vlgmr.msra.gmra.mrb[8].mxu1 %vm9239_vm2, %v7272_v46 }
 0x149   :  { %1930 = vmatpush1.bf16.msra.mxu0 %v1809_v20  ;;  %1865 = vmatprep.mubr.bf16.mxu0 %v6823_v3 }
 0x14a   :  { %2024 = vmatprep.mubr.bf16.mxu1 %v6823_v3  ;;  %2238 = vmatpush1.bf16.msra.mxu1 %v2164_v51 }
 0x14b   :  { %6783 = vmatprep.subr.msk.bf16.mxu0 %vm93_vm1, %v7305_v55  ;;  %6156 = vmatprep.subr.msk.bf16.mxu1 %vm93_vm1, %v2150_v17  ;;  %v6839_v55 = vmov 36  }
 0x14c   :  { %6809 = vset.pattern.permute.xlu0 %v6839_v55  ;;  %6810 = vset.pattern.permute.xlu1 %v6839_v55 }
 0x14d   :  { %3205 = vperm.xlu0 %6809, %v6869_v2   ;;  %3210 = vperm.xlu1 %6810, %v6880_v6   ;;  %v2525_v2 = vsel %vm93_vm1, %v2506_v54, 0  ;;  %v2511_v6 = vsel %vm2503_vm8, %v7494_v1, %v7453_v15 }
 0x150   :  { %6135 = vmatmul.mubr.msk.bf16.gmra.mrb[4].mxu0 %vm9239_vm2, %v7282_v47  ;;  %6144 = vmatmul.mubr.msk.bf16.gmra.mrb[12].mxu1 %vm9239_vm2, %v7282_v47 }
 0x151   :  { %1961 = vmatprep.mubr.bf16.mxu0 %v6823_v3  ;;  %2269 = vmatprep.mubr.bf16.mxu1 %v6823_v3 }
 0x152   :  { %3215 = vperm.xlu1 %6810, %v6898_v11   ;;  %3220 = vperm.xlu0 %6809, %v6903_v12   ;;  %v2170_v11 = vsel %vm93_vm1, %v7364_v32, 0  ;;  %v2510_v12 = vsel %vm2503_vm8, %v7434_v13, %v7494_v1  ;;  %v2859_v32 = vpop.permute.xlu1 %2858  ;;  %v3295_v13 = vlaneseq }
 0x153   :  { %v2870_v61 = vsel %vm2864_vm9, %v7515_v0, %v2859_v32 }
 0x154   :  { %v3565_v60 = vand.u32 127, %v3295_v13 }
 0x156   :  { %v7755_v16 = vmul.u32 576, %v3565_v60 }
 0x158   :  { %6140 = vmatmul.mubr.msk.bf16.vlgmr.msra.gmra.mrb[8].mxu0 %vm9239_vm2, %v7272_v46  ;;  %6151 = vmatmul.mubr.msk.bf16.vlgmr.msra.gmra.mrb[0].mxu1 %vm9239_vm2, %v7332_v19 }
 0x159   :  { %6440 = vmatpush3.bf16.msra.mxu0 %v1821_v50  ;;  %1971 = vmatprep.mubr.bf16.mxu0 %v6823_v3 }
 0x15a   :  { %2279 = vmatprep.mubr.bf16.mxu1 %v6823_v3  ;;  %2344 = vmatpush1.bf16.msra.mxu1 %v2176_v44 }
 0x15b   :  { %6147 = vmatprep.subr.msk.bf16.mxu0 %vm93_vm1, %v2144_v52  ;;  %6164 = vmatprep.subr.msk.bf16.mxu1 %vm93_vm1, %v2507_v28  ;;  %v6840_v28 = vmov 0.00390625|0.00390625  }
 0x160   :  { %6141 = vmatmul.mubr.msk.bf16.gmra.mrb[12].mxu0 %vm9239_vm2, %v7282_v47  ;;  %6152 = vmatmul.mubr.msk.bf16.gmra.mrb[4].mxu1 %vm9239_vm2, %v7334_v18 }
 0x161   :  { %6441 = vmatprep.mubr.msk.bf16.mxu0 %vm9239_vm2, %v7272_v46  ;;  %2375 = vmatprep.mubr.bf16.mxu1 %v6823_v3  ;;  %v2148_v46 = vsel %vm2142_vm7, %v7356_v31, %v7366_v33  ;;  %v2182_v31 = vsel %vm93_vm1, %v7383_v36, 0  ;;  %v2867_v33 = vsel %vm2864_vm9, %v7475_v45, %v7504_v57  ;;  %v2892_v57 = vsel %vm93_vm1, %v7520_v53, 0 }
 0x162   :  { %v2886_v14 = vsel %vm93_vm1, %v2867_v33, 0 }
 0x168   :  { %6442 = vmatmul.mubr.msk.bf16.vlgmr.msra.gmra.mrb[16].mxu0 %vm9239_vm2, %v7282_v47  ;;  %6157 = vmatmul.mubr.msk.bf16.vlgmr.msra.gmra.mrb[8].mxu1 %vm9239_vm2, %v7332_v19  ;;  %v2537_v47 = vsel %vm93_vm1, %v2510_v12, 0 }
 0x169   :  { %2185 = vmatpush1.bf16.msra.mxu0 %v2158_v5  ;;  %2216 = vmatprep.mubr.bf16.mxu0 %v6823_v3 }
 0x16a   :  { %2385 = vmatprep.mubr.bf16.mxu1 %v6823_v3  ;;  %6153 = vmatprep.subr.msk.bf16.mxu0 %vm93_vm1, %v2148_v46 }
 0x16b   :  { %2599 = vmatpush1.bf16.msra.mxu1 %v2525_v2 }
 0x16c   :  { %6170 = vmatprep.subr.msk.bf16.mxu1 %vm93_vm1, %v2511_v6 }
 0x170   :  { %6148 = vmatmul.mubr.msk.bf16.vlgmr.msra.gmra.mrb[0].mxu0 %vm9239_vm2, %v7332_v19  ;;  %6158 = vmatmul.mubr.msk.bf16.gmra.mrb[12].mxu1 %vm9239_vm2, %v7334_v18 }
 0x171   :  { %2291 = vmatpush1.bf16.msra.mxu0 %v2170_v11  ;;  %2226 = vmatprep.mubr.bf16.mxu0 %v6823_v3 }
 0x172   :  { %2630 = vmatprep.mubr.bf16.mxu1 %v6823_v3  ;;  %6784 = vmatprep.subr.msk.bf16.mxu0 %vm93_vm1, %v7383_v36  ;;  %v7684_v36 = vpop.permute.xlu1 %2862 }
 0x173   :  { %v2872_v10 = vsel %vm2864_vm9, %v2861_v4, %v7684_v36  ;;  %v2904_v48 = vsel %vm93_vm1, %v7684_v36, 0 }
 0x178   :  { %6149 = vmatmul.mubr.msk.bf16.gmra.mrb[4].mxu0 %vm9239_vm2, %v7334_v18  ;;  %6165 = vmatmul.mubr.msk.bf16.vlgmr.msra.gmra.mrb[0].mxu1 %vm9239_vm2, %v7408_v26 }
 0x179   :  { %2322 = vmatprep.mubr.bf16.mxu0 %v6823_v3  ;;  %2640 = vmatprep.mubr.bf16.mxu1 %v6823_v3 }
 0x17a   :  { %2705 = vmatpush1.bf16.msra.mxu1 %v2537_v47 }
 0x17b   :  { %6178 = vmatprep.subr.msk.bf16.mxu1 %vm93_vm1, %v2868_v9 }
 0x180   :  { %6154 = vmatmul.mubr.msk.bf16.vlgmr.msra.gmra.mrb[8].mxu0 %vm9239_vm2, %v7332_v19  ;;  %6166 = vmatmul.mubr.msk.bf16.gmra.mrb[4].mxu1 %vm9239_vm2, %v7412_v49 }
 0x181   :  { %6446 = vmatpush3.bf16.msra.mxu0 %v2182_v31  ;;  %2332 = vmatprep.mubr.bf16.mxu0 %v6823_v3 }
 0x182   :  { %2736 = vmatprep.mubr.bf16.mxu1 %v6823_v3  ;;  %6161 = vmatprep.subr.msk.bf16.mxu0 %vm93_vm1, %v7406_v42  ;;  %v2519_v42 = vsel %vm93_vm1, %v7395_v7, 0  ;;  %v2531_v7 = vsel %vm93_vm1, %v7430_v58, 0  ;;  %v2866_v58 = vsel %vm2864_vm9, %v7464_v30, %v7475_v45  ;;  %v2880_v45 = vsel %vm93_vm1, %v7468_v43, 0 }
 0x188   :  { %6155 = vmatmul.mubr.msk.bf16.gmra.mrb[12].mxu0 %vm9239_vm2, %v7334_v18  ;;  %6171 = vmatmul.mubr.msk.bf16.vlgmr.msra.gmra.mrb[8].mxu1 %vm9239_vm2, %v7408_v26 }
 0x189   :  { %6447 = vmatprep.mubr.msk.bf16.mxu0 %vm9239_vm2, %v7332_v19  ;;  %2746 = vmatprep.mubr.bf16.mxu1 %v6823_v3  ;;  %v2871_v19 = vsel %vm2864_vm9, %v2859_v32, %v2861_v4 }
 0x18a   :  { %2960 = vmatpush1.bf16.msra.mxu1 %v2886_v14  ;;  %v2898_v56 = vsel %vm93_vm1, %v2871_v19, 0 }
 0x18b   :  { %6184 = vmatprep.subr.msk.bf16.mxu1 %vm93_vm1, %v2872_v10 }
 0x190   :  { %6448 = vmatmul.mubr.msk.bf16.vlgmr.msra.gmra.mrb[16].mxu0 %vm9239_vm2, %v7334_v18  ;;  %6172 = vmatmul.mubr.msk.bf16.gmra.mrb[12].mxu1 %vm9239_vm2, %v7412_v49  ;;  %v2543_v18 = vsel %vm93_vm1, %v7453_v15, 0 }
 0x191   :  { %2546 = vmatpush1.bf16.msra.mxu0 %v2519_v42  ;;  %2577 = vmatprep.mubr.bf16.mxu0 %v6823_v3 }
 0x192   :  { %2991 = vmatprep.mubr.bf16.mxu1 %v6823_v3  ;;  %6167 = vmatprep.subr.msk.bf16.mxu0 %vm93_vm1, %v2509_v22 }
 0x198   :  { %6162 = vmatmul.mubr.msk.bf16.vlgmr.msra.gmra.mrb[0].mxu0 %vm9239_vm2, %v7408_v26  ;;  %6179 = vmatmul.mubr.msk.bf16.vlgmr.msra.gmra.mrb[0].mxu1 %vm9239_vm2, %v7485_v39 }
 0x199   :  { %2652 = vmatpush1.bf16.msra.mxu0 %v2531_v7  ;;  %2587 = vmatprep.mubr.bf16.mxu0 %v6823_v3 }
 0x19a   :  { %3001 = vmatprep.mubr.bf16.mxu1 %v6823_v3  ;;  %3066 = vmatpush1.bf16.msra.mxu1 %v2898_v56 }
 0x19b   :  { %6785 = vmatprep.subr.msk.bf16.mxu0 %vm93_vm1, %v7453_v15  ;;  %v7743_v15 = vshrl.u32 %v3295_v13, 7 }
 0x19d   :  { %v3408_v30 = vadd.s32 896, %v7743_v15  ;;  %v3409_v34 = vadd.s32 904, %v7743_v15  ;;  %v3411_v24 = vadd.s32 920, %v7743_v15  ;;  %v3392_v0 = vadd.s32 768, %v7743_v15 }
 0x19e   :  { %v3393_v38 = vadd.s32 776, %v7743_v15  ;;  %v3395_v54 = vadd.s32 792, %v7743_v15  ;;  %v3413_v11 = vadd.s32 936, %v7743_v15  ;;  %v3396_v47 = vadd.s32 800, %v7743_v15 }
 0x19f   :  { %v3542_v37 = vadd.s32 33, %v3408_v30  ;;  %v3545_v27 = vadd.s32 33, %v3411_v24  ;;  %v3526_v35 = vadd.s32 33, %v3392_v0  ;;  %v3397_v9 = vadd.s32 808, %v7743_v15 }
 0x1a0   :  { %6163 = vmatmul.mubr.msk.bf16.gmra.mrb[4].mxu0 %vm9239_vm2, %v7412_v49  ;;  %6180 = vmatmul.mubr.msk.bf16.gmra.mrb[4].mxu1 %vm9239_vm2, %v7498_v29  ;;  %v3527_v25 = vadd.s32 33, %v3393_v38  ;;  %v3529_v5 = vadd.s32 33, %v3395_v54  ;;  %v3547_v31 = vadd.s32 33, %v3413_v11  ;;  %v3530_v32 = vadd.s32 33, %v3396_v47 }
 0x1a1   :  { %2683 = vmatprep.mubr.bf16.mxu0 %v6823_v3  ;;  %3097 = vmatprep.mubr.bf16.mxu1 %v6823_v3  ;;  %v3679_v1 = vsub.s32 %v3542_v37, %v7755_v16  ;;  %v3682_v62 = vsub.s32 %v3545_v27, %v7755_v16  ;;  %v3663_v40 = vsub.s32 %v3526_v35, %v7755_v16  ;;  %v4352_v50 = vand.u32 31, %v3545_v27 }
 0x1a2   :  { %v3664_v20 = vsub.s32 %v3527_v25, %v7755_v16  ;;  %v3666_v2 = vsub.s32 %v3529_v5, %v7755_v16  ;;  %v4336_v12 = vand.u32 31, %v3529_v5  ;;  %v3531_v33 = vadd.s32 33, %v3397_v9 }
 0x1a3   :  { %vm3813_vm10 = vcmp.ge.s32.totalorder %v3679_v1, 0  ;;  %vm3947_vm11 = vcmp.lt.s32.totalorder %v3679_v1, 576  ;;  %v4218_v41 = vshra.s32 %v3682_v62, 5  ;;  %vm3816_vm8 = vcmp.ge.s32.totalorder %v3682_v62, 0 }
 0x1a4   :  { %vm7770_vm14 = vmand %vm3813_vm10, %vm3947_vm11  ;;  %vm3950_vm9 = vcmp.lt.s32.totalorder %v3682_v62, 576  ;;  %v4199_v44 = vshra.s32 %v3663_v40, 5  ;;  %v4200_v52 = vshra.s32 %v3664_v20, 5  ;;  %v4202_v6 = vshra.s32 %v3666_v2, 5 }
 0x1a5   :  { %v3684_v4 = vsub.s32 %v3547_v31, %v7755_v16  ;;  %v3415_v14 = vadd.s32 952, %v7743_v15  ;;  %v3667_v10 = vsub.s32 %v3530_v32, %v7755_v16  ;;  %v3668_v7 = vsub.s32 %v3531_v33, %v7755_v16 }
 0x1a6   :  { %v3399_v13 = vadd.s32 824, %v7743_v15  ;;  %v3417_v24 = vadd.s32 968, %v7743_v15  ;;  %v3400_v53 = vadd.s32 832, %v7743_v15  ;;  %v3401_v62 = vadd.s32 840, %v7743_v15 }
 0x1a7   :  { %v4220_v19 = vshra.s32 %v3684_v4, 5  ;;  %v4203_v30 = vshra.s32 %v3667_v10, 5  ;;  %v4204_v60 = vshra.s32 %v3668_v7, 5  ;;  %v3419_v17 = vadd.s32 984, %v7743_v15 }
 0x1a8   :  { %6168 = vmatmul.mubr.msk.bf16.vlgmr.msra.gmra.mrb[8].mxu0 %vm9239_vm2, %v7408_v26  ;;  %6185 = vmatmul.mubr.msk.bf16.vlgmr.msra.gmra.mrb[8].mxu1 %vm9239_vm2, %v7485_v39  ;;  %v3534_v25 = vadd.s32 33, %v3400_v53  ;;  %v3312_v9 = vadd.s32 128, %v7743_v15  ;;  %v3313_v31 = vadd.s32 136, %v7743_v15  ;;  %v3404_v53 = vadd.s32 864, %v7743_v15 }
 0x1a9   :  { %6452 = vmatpush3.bf16.msra.mxu0 %v2543_v18  ;;  %2693 = vmatprep.mubr.bf16.mxu0 %v6823_v3  ;;  %v3553_v54 = vadd.s32 33, %v3419_v17 }
 0x1aa   :  { %3107 = vmatprep.mubr.bf16.mxu1 %v6823_v3  ;;  %6175 = vmatprep.subr.msk.bf16.mxu0 %vm93_vm1, %v2866_v58  ;;  %v3549_v58 = vadd.s32 33, %v3415_v14 }
 0x1ab   :  { %v4360_v33 = vand.u32 31, %v3553_v54 }
 0x1b0   :  { %6169 = vmatmul.mubr.msk.bf16.gmra.mrb[12].mxu0 %vm9239_vm2, %v7412_v49  ;;  %6186 = vmatmul.mubr.msk.bf16.gmra.mrb[12].mxu1 %vm9239_vm2, %v7498_v29 }
 0x1b1   :  { %6453 = vmatprep.mubr.msk.bf16.mxu0 %vm9239_vm2, %v7408_v26  ;;  %v3543_v26 = vadd.s32 33, %v3409_v34  ;;  %v3686_v34 = vsub.s32 %v3549_v58, %v7755_v16 }
 0x1b3   :  { %v3680_v43 = vsub.s32 %v3543_v26, %v7755_v16  ;;  %v3416_v26 = vadd.s32 960, %v7743_v15 }
 0x1b5   :  { %v4216_v8 = vshra.s32 %v3680_v43, 5  ;;  %vm3814_vm12 = vcmp.ge.s32.totalorder %v3680_v43, 0  ;;  %vm3948_vm13 = vcmp.lt.s32.totalorder %v3680_v43, 576 }
 0x1b6   :  { %vm7780_vm0 = vmand %vm3814_vm12, %vm3948_vm13  ;;  %vm7807_vm13 = vcmp.ge.s32.totalorder %v4218_v41, 1 }
 0x1b7   :  { %vm4484_vm3 = vcmp.ge.s32.totalorder %v4216_v8, 1  ;;  %vm4752_vm7 = vcmp.le.s32.totalorder %v4216_v8, 16  ;;  %vm7803_vm12 = vmand %vm3816_vm8, %vm3950_vm9  ;;  %vm4467_vm9 = vcmp.ge.s32.totalorder %v4199_v44, 1  ;;  %v3551_v8 = vadd.s32 33, %v3417_v24 }
 0x1b8   :  { %6454 = vmatmul.mubr.msk.bf16.vlgmr.msra.gmra.mrb[16].mxu0 %vm9239_vm2, %v7412_v49  ;;  %v4215_v49 = vshra.s32 %v3679_v1, 5  ;;  %vm4618_vm6 = vmand %vm7780_vm0, %vm4484_vm3  ;;  %vm4754_vm0 = vcmp.le.s32.totalorder %v4218_v41, 16  ;;  %vm3797_vm3 = vcmp.ge.s32.totalorder %v3663_v40, 0  ;;  %v4222_v1 = vshra.s32 %v3686_v34, 5 }
 0x1b9   :  { %2907 = vmatpush1.bf16.msra.mxu0 %v2880_v45  ;;  %2938 = vmatprep.mubr.bf16.mxu0 %v6823_v3  ;;  %vm7797_vm11 = vmand %vm4618_vm6, %vm4752_vm7  ;;  %vm5022_vm7 = vcmp.ge.s32.totalorder %v4352_v50, 1  ;;  %v3533_v45 = vadd.s32 33, %v3399_v13  ;;  %v3688_v23 = vsub.s32 %v3551_v8, %v7755_v16 }
 0x1ba   :  { %6181 = vmatprep.subr.msk.bf16.mxu0 %vm93_vm1, %v2870_v61  ;;  %vm7774_vm15 = vcmp.ge.s32.totalorder %v4215_v49, 1  ;;  %vm4751_vm5 = vcmp.le.s32.totalorder %v4215_v49, 16  ;;  %v3550_v49 = vadd.s32 33, %v3416_v26  ;;  %v3421_v61 = vadd.s32 1000, %v7743_v15 }
 0x1bb   :  { %vm4617_vm4 = vmand %vm7770_vm14, %vm7774_vm15  ;;  %v3670_v43 = vsub.s32 %v3533_v45, %v7755_v16  ;;  %v4340_v63 = vand.u32 31, %v3533_v45  ;;  %v4224_v51 = vshra.s32 %v3688_v23, 5 }
 0x1bc   :  { %vm7793_vm10 = vmand %vm4617_vm4, %vm4751_vm5  ;;  %vm3931_vm4 = vcmp.lt.s32.totalorder %v3663_v40, 576  ;;  %vm3932_vm5 = vcmp.lt.s32.totalorder %v3664_v20, 576  ;;  %v3687_v38 = vsub.s32 %v3550_v49, %v7755_v16  ;;  %v3535_v40 = vadd.s32 33, %v3401_v62 }
 0x1bd   :  { %vm6245_vm14 = vmpackc.low %vm7797_vm11, %vm7793_vm10  ;;  %vm4468_vm11 = vcmp.ge.s32.totalorder %v4200_v52, 1  ;;  %v4206_v0 = vshra.s32 %v3670_v43, 5  ;;  %v3555_v8 = vadd.s32 33, %v3421_v61  ;;  %v3300_v61 = vadd.s32 32, %v7743_v15 }
 0x1be   :  { %vm4620_vm15 = vmand %vm7803_vm12, %vm7807_vm13  ;;  %vm5290_vm13 = vcmp.le.s32.totalorder %v4352_v50, 16  ;;  %v4223_v21 = vshra.s32 %v3687_v38, 5 }
 0x1bf   :  { %vm4888_vm6 = vmand %vm4620_vm15, %vm4754_vm0  ;;  %vm4735_vm0 = vcmp.le.s32.totalorder %v4199_v44, 16  ;;  %vm9254_vm15 = vcmask 31744   ;;  %v3672_v44 = vsub.s32 %v3535_v40, %v7755_v16  ;;  %v3315_v40 = vadd.s32 152, %v7743_v15 }
 0x1c0   :  { %6176 = vmatmul.mubr.msk.bf16.vlgmr.msra.gmra.mrb[0].mxu0 %vm9239_vm2, %v7485_v39  ;;  %vm4065_vm8 = vmand %vm3797_vm3, %vm3931_vm4  ;;  %vm4736_vm3 = vcmp.le.s32.totalorder %v4200_v52, 16 }
 0x1c1   :  { %2948 = vmatprep.mubr.bf16.mxu0 %v6823_v3  ;;  %3013 = vmatpush1.bf16.msra.mxu0 %v2892_v57  ;;  %vm5156_vm12 = vmand %vm4888_vm6, %vm5022_vm7  ;;  %v4356_v57 = vand.u32 31, %v3549_v58  ;;  %v3449_v50 = vadd.s32 33, %v3315_v40  ;;  %v3303_v40 = vadd.s32 56, %v7743_v15 }
 0x1c2   :  { %6786 = vmatprep.subr.msk.bf16.mxu0 %vm93_vm1, %v7684_v36  ;;  %vm3798_vm1 = vcmp.ge.s32.totalorder %v3664_v20, 0  ;;  %vm5424_vm4 = vmand %vm5156_vm12, %vm5290_vm13  ;;  %vm4738_vm13 = vcmp.le.s32.totalorder %v4202_v6, 16 }
 0x1c3   :  { %vm4066_vm10 = vmand %vm3798_vm1, %vm3932_vm5 }
 0x1c4   :  { %vm9255_vm1 = vmmov %vm9254_vm15 }
 0x1c8   :  { %6177 = vmatmul.mubr.msk.bf16.gmra.mrb[4].mxu0 %vm9239_vm2, %v7498_v29 }
 0x1c9   :  { %3044 = vmatprep.mubr.bf16.mxu0 %v6823_v3 }
 0x1d0   :  { %6182 = vmatmul.mubr.msk.bf16.vlgmr.msra.gmra.mrb[8].mxu0 %vm9239_vm2, %v7485_v39  ;;  %vm4601_vm2 = vmand %vm4065_vm8, %vm4467_vm9  ;;  %vm3934_vm9 = vcmp.lt.s32.totalorder %v3666_v2, 576 }
 0x1d1   :  { %3054 = vmatprep.mubr.bf16.mxu0 %v6823_v3  ;;  %6458 = vmatpush3.bf16.msra.mxu0 %v2904_v48  ;;  %vm4869_vm5 = vmand %vm4601_vm2, %vm4735_vm0  ;;  %v6841_v3 = vmov 0.0   ;;  %vm3800_vm2 = vcmp.ge.s32.totalorder %v3666_v2, 0  ;;  %vm5006_vm0 = vcmp.ge.s32.totalorder %v4336_v12, 1  ;;  %v3671_v48 = vsub.s32 %v3534_v25, %v7755_v16 }
 0x1d2   :  { %6371 = vmatprep.subr.msk.bf16.mxu0 %vm6245_vm14, %v6840_v28  ;;  %vm4602_vm14 = vmand %vm4066_vm10, %vm4468_vm11  ;;  %v5558_v55 = vsel %vm5424_vm4, 0.00390625, %v6841_v3  ;;  %vm4470_vm11 = vcmp.ge.s32.totalorder %v4202_v6, 1  ;;  %v4208_v6 = vshra.s32 %v3672_v44, 5  ;;  %v3538_v25 = vadd.s32 33, %v3404_v53  ;;  %6049 = vst [vmem:[%s9238_s2 + $0x10] sm:$0xff] %v6841_v3 }
 0x1d3   :  { %vm4870_vm6 = vmand %vm4602_vm14, %vm4736_vm3  ;;  %v5634_v46 = vpack.c.bf16 %v5558_v55, %v6841_v3  ;;  %vm5274_vm3 = vcmp.le.s32.totalorder %v4336_v12, 16  ;;  %v4207_v2 = vshra.s32 %v3671_v48, 5  ;;  %v4256_v12 = vand.u32 31, %v3449_v50  ;;  %6047 = vst [vmem:[%s9238_s2] sm:$0xff] %v6841_v3 }
 0x1d4   :  { %vm6237_vm7 = vmpackc.low %vm4870_vm6, %vm4869_vm5  ;;  %vm3818_vm5 = vcmp.ge.s32.totalorder %v3684_v4, 0  ;;  %6048 = vst [vmem:[%s9238_s2 + $0x8] sm:$0xff] %v6841_v3 }
 0x1d5   :  { %vm9256_vm8 = vmmov %vm9255_vm1  ;;  %6050 = vst [vmem:[%s9238_s2 + $0x18] sm:$0xff] %v6841_v3 }
 0x1d6   :  { %vm4068_vm10 = vmand %vm3800_vm2, %vm3934_vm9  ;;  %vm7847_vm9 = vcmp.ge.s32.totalorder %v4220_v19, 1  ;;  %6051 = vst [vmem:[%s9238_s2 + $0x20] sm:$0xff] %v6841_v3 }
 0x1d7   :  { %vm4604_vm12 = vmand %vm4068_vm10, %vm4470_vm11 }
 0x1d8   :  { %6183 = vmatmul.mubr.msk.bf16.gmra.mrb[12].mxu0 %vm9254_vm15, %v7498_v29  ;;  %vm4872_vm14 = vmand %vm4604_vm12, %vm4738_vm13  ;;  %vm4756_vm13 = vcmp.le.s32.totalorder %v4220_v19, 16 }
 0x1d9   :  { %6459 = vmatprep.mubr.msk.bf16.mxu0 %vm9255_vm1, %v7485_v39  ;;  %v3412_v39 = vadd.s32 928, %v7743_v15  ;;  %vm5140_vm15 = vmand %vm4872_vm14, %vm5006_vm0 }
 0x1da   :  { %vm5408_vm4 = vmand %vm5140_vm15, %vm5274_vm3  ;;  %vm3801_vm15 = vcmp.ge.s32.totalorder %v3667_v10, 0  ;;  %vm3935_vm3 = vcmp.lt.s32.totalorder %v3667_v10, 576 }
 0x1db   :  { %v5542_v42 = vsel %vm5408_vm4, 0.00390625, %v6841_v3 }
 0x1dc   :  { %v5626_v56 = vpack.c.bf16 %v5542_v42, %v6841_v3 }
 0x1e0   :  { %6460 = vmatmul.mubr.msk.bf16.vlgmr.msra.gmra.mrb[16].mxu0 %vm9256_vm8, %v7498_v29  ;;  %v3546_v29 = vadd.s32 33, %v3412_v39  ;;  %v3690_v39 = vsub.s32 %v3553_v54, %v7755_v16  ;;  %v3586_v54 = vsub.s32 %v3449_v50, %v7755_v16 }
 0x1e1   :  { %6372 = vmatpush3.bf16.msk.msra.mxu0 %vm6237_vm7, %v6840_v28  ;;  %vm3952_vm7 = vcmp.lt.s32.totalorder %v3684_v4, 576  ;;  %v3447_v4 = vadd.s32 33, %v3313_v31 }
 0x1e2   :  { %6373 = vmatprep.subr.bf16.mxu0 %v5634_v46  ;;  %v3683_v36 = vsub.s32 %v3546_v29, %v7755_v16  ;;  %vm4086_vm10 = vmand %vm3818_vm5, %vm3952_vm7  ;;  %vm7855_vm7 = vcmp.ge.s32.totalorder %v4203_v30, 1  ;;  %v3403_v46 = vadd.s32 856, %v7743_v15  ;;  %v4226_v29 = vshra.s32 %v3690_v39, 5 }
 0x1e3   :  { %vm4622_vm14 = vmand %vm4086_vm10, %vm7847_vm9  ;;  %vm4739_vm10 = vcmp.le.s32.totalorder %v4203_v30, 16  ;;  %v3584_v19 = vsub.s32 %v3447_v4, %v7755_v16  ;;  %v3316_v4 = vadd.s32 160, %v7743_v15 }
 0x1e4   :  { %v4219_v22 = vshra.s32 %v3683_v36, 5  ;;  %vm3817_vm1 = vcmp.ge.s32.totalorder %v3683_v36, 0  ;;  %vm3951_vm6 = vcmp.lt.s32.totalorder %v3683_v36, 576  ;;  %vm4890_vm4 = vmand %vm4622_vm14, %vm4756_vm13  ;;  %v3537_v11 = vadd.s32 33, %v3403_v46 }
 0x1e5   :  { %vm4085_vm8 = vmand %vm3817_vm1, %vm3951_vm6  ;;  %6374 = vmatpush3.bf16.msra.mxu0 %v5626_v56  ;;  %vm3802_vm1 = vcmp.ge.s32.totalorder %v3668_v7, 0  ;;  %vm3936_vm6 = vcmp.lt.s32.totalorder %v3668_v7, 576  ;;  %v3446_v36 = vadd.s32 33, %v3312_v9  ;;  %v3430_v7 = vadd.s32 33, %v7743_v15 }
 0x1e6   :  { %vm4487_vm2 = vcmp.ge.s32.totalorder %v4219_v22, 1  ;;  %vm4755_vm11 = vcmp.le.s32.totalorder %v4219_v22, 16  ;;  %vm4070_vm9 = vmand %vm3802_vm1, %vm3936_vm6  ;;  %vm4758_vm6 = vcmp.le.s32.totalorder %v4222_v1, 16  ;;  %v3674_v32 = vsub.s32 %v3537_v11, %v7755_v16 }
 0x1e7   :  { %vm4621_vm12 = vmand %vm4085_vm8, %vm4487_vm2  ;;  %vm7860_vm2 = vcmp.ge.s32.totalorder %v4204_v60, 1  ;;  %v4344_v10 = vand.u32 31, %v3537_v11  ;;  %v3583_v42 = vsub.s32 %v3446_v36, %v7755_v16  ;;  %v3297_v22 = vadd.s32 8, %v7743_v15 }
 0x1e8   :  { %vm4889_vm0 = vmand %vm4621_vm12, %vm4755_vm11  ;;  %vm4740_vm12 = vcmp.le.s32.totalorder %v4204_v60, 16  ;;  %v4210_v14 = vshra.s32 %v3674_v32, 5  ;;  %v4120_v60 = vshra.s32 %v3584_v19, 5  ;;  %v3567_v45 = vsub.s32 %v3430_v7, %v7755_v16 }
 0x1e9   :  { %vm6247_vm5 = vmpackc.low %vm4890_vm4, %vm4889_vm0  ;;  %vm3820_vm0 = vcmp.ge.s32.totalorder %v3686_v34, 0  ;;  %vm7871_vm4 = vcmp.ge.s32.totalorder %v4222_v1, 1  ;;  %v4119_v58 = vshra.s32 %v3583_v42, 5  ;;  %v3431_v13 = vadd.s32 33, %v3297_v22 }
 0x1ea   :  { %6375 = vmatprep.subr.msk.bf16.mxu0 %vm6247_vm5, %v6840_v28  ;;  %vm4069_vm8 = vmand %vm3801_vm15, %vm3935_vm3  ;;  %vm3954_vm15 = vcmp.lt.s32.totalorder %v3686_v34, 576  ;;  %v3420_v34 = vadd.s32 992, %v7743_v15  ;;  %v4103_v27 = vshra.s32 %v3567_v45, 5  ;;  %v3407_v9 = vadd.s32 888, %v7743_v15 }
 0x1eb   :  { %vm4605_vm11 = vmand %vm4069_vm8, %vm7855_vm7  ;;  %vm5026_vm7 = vcmp.ge.s32.totalorder %v4356_v57, 1  ;;  %v3568_v26 = vsub.s32 %v3431_v13, %v7755_v16  ;;  %v3450_v18 = vadd.s32 33, %v3316_v4 }
 0x1ec   :  { %vm4606_vm13 = vmand %vm4070_vm9, %vm7860_vm2  ;;  %vm5294_vm2 = vcmp.le.s32.totalorder %v4356_v57, 16  ;;  %v3554_v49 = vadd.s32 33, %v3420_v34  ;;  %v3434_v57 = vadd.s32 33, %v3300_v61  ;;  %v3307_v34 = vadd.s32 88, %v7743_v15 }
 0x1ed   :  { %vm4873_vm14 = vmand %vm4605_vm11, %vm4739_vm10  ;;  %vm3804_vm10 = vcmp.ge.s32.totalorder %v3670_v43, 0  ;;  %vm3938_vm11 = vcmp.lt.s32.totalorder %v3670_v43, 576 }
 0x1ee   :  { %vm4874_vm3 = vmand %vm4606_vm13, %vm4740_vm12  ;;  %vm7882_vm13 = vcmp.ge.s32.totalorder %v4206_v0, 1  ;;  %v3571_v62 = vsub.s32 %v3434_v57, %v7755_v16 }
 0x1ef   :  { %vm6239_vm1 = vmpackc.low %vm4874_vm3, %vm4873_vm14  ;;  %vm7887_vm3 = vcmp.ge.s32.totalorder %v4340_v63, 1 }
 0x1f0   :  { %6376 = vmatpush3.bf16.msk.msra.mxu0 %vm6239_vm1, %v6840_v28  ;;  %vm4088_vm5 = vmand %vm3820_vm0, %vm3954_vm15  ;;  %vm4742_vm0 = vcmp.le.s32.totalorder %v4206_v0, 16  ;;  %vm5278_vm1 = vcmp.le.s32.totalorder %v4340_v63, 16  ;;  %v4104_v0 = vshra.s32 %v3568_v26, 5  ;;  %v3691_v63 = vsub.s32 %v3554_v49, %v7755_v16 }
 0x1f1   :  { %vm4624_vm8 = vmand %vm4088_vm5, %vm7871_vm4  ;;  %vm3821_vm5 = vcmp.ge.s32.totalorder %v3687_v38, 0 }
 0x1f2   :  { %vm4892_vm9 = vmand %vm4624_vm8, %vm4758_vm6 }
 0x1f3   :  { %vm5160_vm12 = vmand %vm4892_vm9, %vm5026_vm7  ;;  %vm3955_vm7 = vcmp.lt.s32.totalorder %v3687_v38, 576  ;;  %vm3956_vm9 = vcmp.lt.s32.totalorder %v3688_v23, 576  ;;  %v3405_v38 = vadd.s32 872, %v7743_v15 }
 0x1f4   :  { %vm5428_vm14 = vmand %vm5160_vm12, %vm5294_vm2  ;;  %vm3822_vm2 = vcmp.ge.s32.totalorder %v3688_v23, 0  ;;  %v3692_v23 = vsub.s32 %v3555_v8, %v7755_v16 }
 0x1f5   :  { %v5562_v41 = vsel %vm5428_vm14, 0.00390625, %v6841_v3  ;;  %vm4072_vm15 = vmand %vm3804_vm10, %vm3938_vm11  ;;  %vm7898_vm11 = vcmp.ge.s32.totalorder %v4223_v21, 1  ;;  %v3539_v59 = vadd.s32 33, %v3405_v38  ;;  %v3319_v38 = vadd.s32 184, %v7743_v15 }
 0x1f6   :  { %v5636_v20 = vpack.c.bf16 %v5562_v41, %v6841_v3  ;;  %vm4608_vm4 = vmand %vm4072_vm15, %vm7882_vm13  ;;  %vm7904_vm13 = vcmp.ge.s32.totalorder %v4224_v51, 1  ;;  %v4227_v41 = vshra.s32 %v3691_v63, 5 }
 0x1f7   :  { %vm4876_vm6 = vmand %vm4608_vm4, %vm4742_vm0  ;;  %vm4759_vm0 = vcmp.le.s32.totalorder %v4223_v21, 16  ;;  %v4228_v21 = vshra.s32 %v3692_v23, 5  ;;  %v3676_v17 = vsub.s32 %v3539_v59, %v7755_v16  ;;  %v3453_v59 = vadd.s32 33, %v3319_v38 }
 0x1f8   :  { %6377 = vmatprep.subr.bf16.mxu0 %v5636_v20  ;;  %vm5144_vm8 = vmand %vm4876_vm6, %vm7887_vm3  ;;  %vm4760_vm3 = vcmp.le.s32.totalorder %v4224_v51, 16  ;;  %vm3805_vm6 = vcmp.ge.s32.totalorder %v3671_v48, 0  ;;  %v3675_v20 = vsub.s32 %v3538_v25, %v7755_v16 }
 0x1f9   :  { %vm5412_vm10 = vmand %vm5144_vm8, %vm5278_vm1  ;;  %vm3806_vm8 = vcmp.ge.s32.totalorder %v3672_v44, 0  ;;  %v4212_v55 = vshra.s32 %v3676_v17, 5  ;;  %v4260_v46 = vand.u32 31, %v3453_v59 }
 0x1fa   :  { %v5546_v52 = vsel %vm5412_vm10, 0.00390625, %v6841_v3  ;;  %vm4089_vm12 = vmand %vm3821_vm5, %vm3955_vm7  ;;  %vm3939_vm5 = vcmp.lt.s32.totalorder %v3671_v48, 576  ;;  %vm7915_vm10 = vcmp.ge.s32.totalorder %v4207_v2, 1  ;;  %v3437_v48 = vadd.s32 33, %v3303_v40 }
 0x1fb   :  { %v5628_v5 = vpack.c.bf16 %v5546_v52, %v6841_v3  ;;  %vm4090_vm14 = vmand %vm3822_vm2, %vm3956_vm9  ;;  %vm3940_vm2 = vcmp.lt.s32.totalorder %v3672_v44, 576  ;;  %v3299_v44 = vadd.s32 24, %v7743_v15  ;;  %v4211_v52 = vshra.s32 %v3675_v20, 5 }
 0x1fc   :  { %vm4625_vm15 = vmand %vm4089_vm12, %vm7898_vm11  ;;  %vm7920_vm12 = vcmp.ge.s32.totalorder %v4208_v6, 1 }
 0x1fd   :  { %6378 = vmatpush3.bf16.msra.mxu0 %v5628_v5  ;;  %vm4626_vm4 = vmand %vm4090_vm14, %vm7904_vm13  ;;  %vm4743_vm14 = vcmp.le.s32.totalorder %v4207_v2, 16  ;;  %v3433_v5 = vadd.s32 33, %v3299_v44  ;;  %v3423_v2 = vadd.s32 1016, %v7743_v15 }
 0x1fe   :  { %vm4893_vm1 = vmand %vm4625_vm15, %vm4759_vm0  ;;  %vm4744_vm15 = vcmp.le.s32.totalorder %v4208_v6, 16 }
 0x1ff   :  { %vm4894_vm7 = vmand %vm4626_vm4, %vm4760_vm3  ;;  %v3570_v11 = vsub.s32 %v3433_v5, %v7755_v16  ;;  %v3557_v47 = vadd.s32 33, %v3423_v2 }
 0x200   :  { %vm6249_vm9 = vmpackc.low %vm4894_vm7, %vm4893_vm1  ;;  %vm3824_vm1 = vcmp.ge.s32.totalorder %v3690_v39, 0  ;;  %vm4494_vm7 = vcmp.ge.s32.totalorder %v4226_v29, 1 }
 0x201   :  { %6379 = vmatprep.subr.msk.bf16.mxu0 %vm6249_vm9, %v6840_v28  ;;  %vm4073_vm11 = vmand %vm3805_vm6, %vm3939_vm5  ;;  %vm3958_vm6 = vcmp.lt.s32.totalorder %v3690_v39, 576  ;;  %v4122_v39 = vshra.s32 %v3586_v54, 5  ;;  %v3694_v31 = vsub.s32 %v3557_v47, %v7755_v16 }
 0x202   :  { %vm4074_vm13 = vmand %vm3806_vm8, %vm3940_vm2  ;;  %vm4762_vm2 = vcmp.le.s32.totalorder %v4226_v29, 16  ;;  %v4106_v29 = vshra.s32 %v3570_v11, 5 }
 0x203   :  { %vm4609_vm0 = vmand %vm4073_vm11, %vm7915_vm10  ;;  %vm5030_vm10 = vcmp.ge.s32.totalorder %v4360_v33, 1 }
 0x204   :  { %vm4610_vm3 = vmand %vm4074_vm13, %vm7920_vm12  ;;  %vm5298_vm12 = vcmp.le.s32.totalorder %v4360_v33, 16  ;;  %v3541_v33 = vadd.s32 33, %v3407_v9 }
 0x205   :  { %vm4877_vm4 = vmand %vm4609_vm0, %vm4743_vm14  ;;  %vm3808_vm14 = vcmp.ge.s32.totalorder %v3674_v32, 0  ;;  %vm3942_vm0 = vcmp.lt.s32.totalorder %v3674_v32, 576  ;;  %v4240_v32 = vand.u32 31, %v3433_v5  ;;  %v3574_v5 = vsub.s32 %v3437_v48, %v7755_v16 }
 0x206   :  { %vm4878_vm5 = vmand %vm4610_vm3, %vm4744_vm15  ;;  %vm4478_vm3 = vcmp.ge.s32.totalorder %v4210_v14, 1 }
 0x207   :  { %vm6241_vm8 = vmpackc.low %vm4878_vm5, %vm4877_vm4  ;;  %vm4746_vm5 = vcmp.le.s32.totalorder %v4210_v14, 16  ;;  %v4230_v14 = vshra.s32 %v3694_v31, 5 }
 0x208   :  { %6380 = vmatpush3.bf16.msk.msra.mxu0 %vm6241_vm8, %v6840_v28  ;;  %vm4092_vm9 = vmand %vm3824_vm1, %vm3958_vm6  ;;  %vm7937_vm6 = vcmp.ge.s32.totalorder %v4344_v10, 1  ;;  %vm5282_vm8 = vcmp.le.s32.totalorder %v4344_v10, 16  ;;  %v3317_v10 = vadd.s32 168, %v7743_v15 }
 0x209   :  { %vm4628_vm11 = vmand %vm4092_vm9, %vm4494_vm7  ;;  %vm3717_vm9 = vcmp.ge.s32.totalorder %v3583_v42, 0 }
 0x20a   :  { %vm4896_vm13 = vmand %vm4628_vm11, %vm4762_vm2  ;;  %v3451_v13 = vadd.s32 33, %v3317_v10 }
 0x20b   :  { %vm5164_vm15 = vmand %vm4896_vm13, %vm5030_vm10  ;;  %vm3851_vm10 = vcmp.lt.s32.totalorder %v3583_v42, 576  ;;  %vm3852_vm13 = vcmp.lt.s32.totalorder %v3584_v19, 576 }
 0x20c   :  { %vm5432_vm4 = vmand %vm5164_vm15, %vm5298_vm12  ;;  %vm3718_vm12 = vcmp.ge.s32.totalorder %v3584_v19, 0  ;;  %v3678_v19 = vsub.s32 %v3541_v33, %v7755_v16  ;;  %v3588_v24 = vsub.s32 %v3451_v13, %v7755_v16 }
 0x20d   :  { %v5566_v56 = vsel %vm5432_vm4, 0.00390625, %v6841_v3  ;;  %vm4076_vm1 = vmand %vm3808_vm14, %vm3942_vm0  ;;  %vm7947_vm0 = vcmp.ge.s32.totalorder %v4119_v58, 1 }
 0x20e   :  { %v5638_v30 = vpack.c.bf16 %v5566_v56, %v6841_v3  ;;  %vm4612_vm7 = vmand %vm4076_vm1, %vm4478_vm3  ;;  %vm7953_vm3 = vcmp.ge.s32.totalorder %v4120_v60, 1  ;;  %v4364_v56 = vand.u32 31, %v3557_v47  ;;  %v4244_v47 = vand.u32 31, %v3437_v48 }
 0x20f   :  { %vm4880_vm2 = vmand %vm4612_vm7, %vm4746_vm5  ;;  %vm4655_vm5 = vcmp.le.s32.totalorder %v4119_v58, 16 }
 0x210   :  { %6381 = vmatprep.subr.bf16.mxu0 %v5638_v30  ;;  %vm5148_vm11 = vmand %vm4880_vm2, %vm7937_vm6  ;;  %vm4656_vm6 = vcmp.le.s32.totalorder %v4120_v60, 16  ;;  %vm3701_vm2 = vcmp.ge.s32.totalorder %v3567_v45, 0  ;;  %v4214_v30 = vshra.s32 %v3678_v19, 5 }
 0x211   :  { %vm5416_vm14 = vmand %vm5148_vm11, %vm5282_vm8  ;;  %vm3702_vm11 = vcmp.ge.s32.totalorder %v3568_v26, 0 }
 0x212   :  { %v5550_v1 = vsel %vm5416_vm14, 0.00390625, %v6841_v3  ;;  %vm3985_vm15 = vmand %vm3717_vm9, %vm3851_vm10  ;;  %vm3835_vm9 = vcmp.lt.s32.totalorder %v3567_v45, 576  ;;  %vm7971_vm14 = vcmp.ge.s32.totalorder %v4103_v27, 1  ;;  %v4348_v45 = vand.u32 31, %v3541_v33 }
 0x213   :  { %v5630_v43 = vpack.c.bf16 %v5550_v1, %v6841_v3  ;;  %vm7958_vm4 = vmand %vm3718_vm12, %vm3852_vm13  ;;  %vm3836_vm12 = vcmp.lt.s32.totalorder %v3568_v26, 576  ;;  %v3587_v26 = vsub.s32 %v3450_v18, %v7755_v16  ;;  %v3301_v1 = vadd.s32 40, %v7743_v15 }
 0x214   :  { %vm4521_vm1 = vmand %vm3985_vm15, %vm7947_vm0  ;;  %vm7977_vm15 = vcmp.ge.s32.totalorder %v4104_v0, 1 }
 0x215   :  { %6382 = vmatpush3.bf16.msra.mxu0 %v5630_v43  ;;  %vm4522_vm7 = vmand %vm7958_vm4, %vm7953_vm3  ;;  %vm4639_vm4 = vcmp.le.s32.totalorder %v4103_v27, 16  ;;  %v4123_v8 = vshra.s32 %v3587_v26, 5 }
 0x216   :  { %vm4789_vm8 = vmand %vm4521_vm1, %vm4655_vm5  ;;  %vm4640_vm1 = vcmp.le.s32.totalorder %v4104_v0, 16  ;;  %v3435_v0 = vadd.s32 33, %v3301_v1 }
 0x217   :  { %vm4790_vm10 = vmand %vm4522_vm7, %vm4656_vm6 }
 0x218   :  { %vm6197_vm13 = vmpackc.low %vm4790_vm10, %vm4789_vm8  ;;  %vm3825_vm8 = vcmp.ge.s32.totalorder %v3691_v63, 0  ;;  %vm3826_vm10 = vcmp.ge.s32.totalorder %v3692_v23, 0  ;;  %v3572_v35 = vsub.s32 %v3435_v0, %v7755_v16  ;;  %v3325_v0 = vadd.s32 232, %v7743_v15 }
 0x219   :  { %6287 = vmatprep.subr.msk.bf16.mxu1 %vm6197_vm13, %v6840_v28  ;;  %vm3969_vm0 = vmand %vm3701_vm2, %vm3835_vm9  ;;  %vm3959_vm2 = vcmp.lt.s32.totalorder %v3691_v63, 576  ;;  %vm7987_vm13 = vcmp.ge.s32.totalorder %v4227_v41, 1  ;;  %v4124_v63 = vshra.s32 %v3588_v24, 5 }
 0x21a   :  { %vm3970_vm3 = vmand %vm3702_vm11, %vm3836_vm12  ;;  %vm3960_vm11 = vcmp.lt.s32.totalorder %v3692_v23, 576  ;;  %v4108_v51 = vshra.s32 %v3572_v35, 5  ;;  %v3459_v48 = vadd.s32 33, %v3325_v0 }
 0x21b   :  { %vm4505_vm5 = vmand %vm3969_vm0, %vm7971_vm14  ;;  %vm7993_vm0 = vcmp.ge.s32.totalorder %v4228_v21, 1 }
 0x21c   :  { %vm4506_vm6 = vmand %vm3970_vm3, %vm7977_vm15  ;;  %vm4763_vm3 = vcmp.le.s32.totalorder %v4227_v41, 16 }
 0x21d   :  { %vm4773_vm7 = vmand %vm4505_vm5, %vm4639_vm4  ;;  %vm4764_vm5 = vcmp.le.s32.totalorder %v4228_v21, 16 }
 0x21e   :  { %vm4774_vm9 = vmand %vm4506_vm6, %vm4640_vm1 }
 0x21f   :  { %vm6189_vm12 = vmpackc.low %vm4774_vm9, %vm4773_vm7  ;;  %vm3809_vm7 = vcmp.ge.s32.totalorder %v3675_v20, 0  ;;  %vm3810_vm9 = vcmp.ge.s32.totalorder %v3676_v17, 0 }
 0x220   :  { %6288 = vmatpush3.bf16.msk.msra.mxu1 %vm6189_vm12, %v6840_v28  ;;  %vm4093_vm14 = vmand %vm3825_vm8, %vm3959_vm2  ;;  %vm3943_vm8 = vcmp.lt.s32.totalorder %v3675_v20, 576  ;;  %vm8003_vm12 = vcmp.ge.s32.totalorder %v4211_v52, 1  ;;  %v4107_v20 = vshra.s32 %v3571_v62, 5 }
 0x221   :  { %vm4094_vm15 = vmand %vm3826_vm10, %vm3960_vm11  ;;  %vm3944_vm10 = vcmp.lt.s32.totalorder %v3676_v17, 576  ;;  %v3590_v17 = vsub.s32 %v3453_v59, %v7755_v16 }
 0x222   :  { %vm4629_vm4 = vmand %vm4093_vm14, %vm7987_vm13  ;;  %vm8009_vm14 = vcmp.ge.s32.totalorder %v4212_v55, 1 }
 0x223   :  { %vm4630_vm1 = vmand %vm4094_vm15, %vm7993_vm0  ;;  %vm4747_vm15 = vcmp.le.s32.totalorder %v4211_v52, 16  ;;  %v3320_v52 = vadd.s32 192, %v7743_v15 }
 0x224   :  { %vm4897_vm6 = vmand %vm4629_vm4, %vm4763_vm3  ;;  %vm4748_vm4 = vcmp.le.s32.totalorder %v4212_v55, 16  ;;  %v4126_v55 = vshra.s32 %v3590_v17, 5 }
 0x225   :  { %vm4898_vm2 = vmand %vm4630_vm1, %vm4764_vm5  ;;  %v3454_v2 = vadd.s32 33, %v3320_v52 }
 0x226   :  { %vm6251_vm11 = vmpackc.low %vm4898_vm2, %vm4897_vm6  ;;  %vm3720_vm6 = vcmp.ge.s32.totalorder %v3586_v54, 0  ;;  %vm4390_vm2 = vcmp.ge.s32.totalorder %v4122_v39, 1 }
 0x227   :  { %6383 = vmatprep.subr.msk.bf16.mxu0 %vm6251_vm11, %v6840_v28  ;;  %vm4077_vm13 = vmand %vm3809_vm7, %vm3943_vm8  ;;  %vm3854_vm7 = vcmp.lt.s32.totalorder %v3586_v54, 576  ;;  %v3321_v54 = vadd.s32 200, %v7743_v15  ;;  %v3591_v9 = vsub.s32 %v3454_v2, %v7755_v16  ;;  %v3308_v2 = vadd.s32 96, %v7743_v15 }
 0x228   :  { %vm4078_vm0 = vmand %vm3810_vm9, %vm3944_vm10  ;;  %vm4658_vm10 = vcmp.le.s32.totalorder %v4122_v39, 16 }
 0x229   :  { %vm4613_vm3 = vmand %vm4077_vm13, %vm8003_vm12  ;;  %vm4926_vm12 = vcmp.ge.s32.totalorder %v4256_v12, 1  ;;  %v3455_v39 = vadd.s32 33, %v3321_v54 }
 0x22a   :  { %vm4614_vm5 = vmand %vm4078_vm0, %vm8009_vm14  ;;  %vm5194_vm14 = vcmp.le.s32.totalorder %v4256_v12, 16  ;;  %v3304_v12 = vadd.s32 64, %v7743_v15 }
 0x22b   :  { %vm4881_vm1 = vmand %vm4613_vm3, %vm4747_vm15  ;;  %vm3704_vm15 = vcmp.ge.s32.totalorder %v3570_v11, 0  ;;  %vm3838_vm3 = vcmp.lt.s32.totalorder %v3570_v11, 576  ;;  %v4110_v11 = vshra.s32 %v3574_v5, 5 }
 0x22c   :  { %vm4882_vm8 = vmand %vm4614_vm5, %vm4748_vm4  ;;  %vm8021_vm5 = vcmp.ge.s32.totalorder %v4106_v29, 1  ;;  %v3438_v33 = vadd.s32 33, %v3304_v12  ;;  %v3309_v12 = vadd.s32 104, %v7743_v15 }
 0x22d   :  { %vm6243_vm9 = vmpackc.low %vm4882_vm8, %vm4881_vm1  ;;  %vm4642_vm8 = vcmp.le.s32.totalorder %v4106_v29, 16  ;;  %v3305_v29 = vadd.s32 72, %v7743_v15 }
 0x22e   :  { %6384 = vmatpush3.bf16.msk.msra.mxu0 %vm6243_vm9, %v6840_v28  ;;  %vm3988_vm11 = vmand %vm3720_vm6, %vm3854_vm7  ;;  %vm8028_vm7 = vcmp.ge.s32.totalorder %v4240_v32, 1  ;;  %vm5178_vm9 = vcmp.le.s32.totalorder %v4240_v32, 16 }
 0x22f   :  { %vm4524_vm13 = vmand %vm3988_vm11, %vm4390_vm2  ;;  %vm3828_vm11 = vcmp.ge.s32.totalorder %v3694_v31, 0  ;;  %v3439_v10 = vadd.s32 33, %v3305_v29  ;;  %v3596_v29 = vsub.s32 %v3459_v48, %v7755_v16 }
 0x230   :  { %vm4792_vm0 = vmand %vm4524_vm13, %vm4658_vm10 }
 0x231   :  { %vm5060_vm4 = vmand %vm4792_vm0, %vm4926_vm12  ;;  %vm3962_vm12 = vcmp.lt.s32.totalorder %v3694_v31, 576  ;;  %v3592_v31 = vsub.s32 %v3455_v39, %v7755_v16  ;;  %v3576_v18 = vsub.s32 %v3439_v10, %v7755_v16 }
 0x232   :  { %vm5328_vm1 = vmand %vm5060_vm4, %vm5194_vm14  ;;  %vm8038_vm14 = vcmp.ge.s32.totalorder %v4230_v14, 1  ;;  %vm8043_vm4 = vcmp.ge.s32.totalorder %v4364_v56, 1 }
 0x233   :  { %v5462_v42 = vsel %vm5328_vm1, 0.00390625, %v6841_v3  ;;  %vm3972_vm6 = vmand %vm3704_vm15, %vm3838_vm3  ;;  %vm4766_vm15 = vcmp.le.s32.totalorder %v4230_v14, 16  ;;  %vm5302_vm1 = vcmp.le.s32.totalorder %v4364_v56, 16  ;;  %v4127_v14 = vshra.s32 %v3591_v9, 5 }
 0x234   :  { %v5586_v7 = vpack.c.bf16 %v5462_v42, %v6841_v3  ;;  %vm4508_vm2 = vmand %vm3972_vm6, %vm8021_vm5  ;;  %vm3812_vm6 = vcmp.ge.s32.totalorder %v3678_v19, 0  ;;  %v4128_v22 = vshra.s32 %v3592_v31, 5  ;;  %v4112_v61 = vshra.s32 %v3576_v18, 5 }
 0x235   :  { %vm4776_vm10 = vmand %vm4508_vm2, %vm4642_vm8 }
 0x236   :  { %6289 = vmatprep.subr.bf16.mxu1 %v5586_v7  ;;  %vm5044_vm13 = vmand %vm4776_vm10, %vm8028_vm7  ;;  %vm3946_vm7 = vcmp.lt.s32.totalorder %v3678_v19, 576  ;;  %v3323_v19 = vadd.s32 216, %v7743_v15  ;;  %v3575_v7 = vsub.s32 %v3438_v33, %v7755_v16  ;;  %v3345_v33 = vadd.s32 392, %v7743_v15 }
 0x237   :  { %vm5312_vm0 = vmand %vm5044_vm13, %vm5178_vm9  ;;  %vm8056_vm9 = vcmp.ge.s32.totalorder %v4214_v30, 1  ;;  %vm8061_vm13 = vcmp.ge.s32.totalorder %v4348_v45, 1 }
 0x238   :  { %v5446_v60 = vsel %vm5312_vm0, 0.00390625, %v6841_v3  ;;  %vm4096_vm3 = vmand %vm3828_vm11, %vm3962_vm12  ;;  %vm4750_vm11 = vcmp.le.s32.totalorder %v4214_v30, 16  ;;  %vm5286_vm0 = vcmp.le.s32.totalorder %v4348_v45, 16  ;;  %v3457_v30 = vadd.s32 33, %v3323_v19 }
 0x239   :  { %v5578_v37 = vpack.c.bf16 %v5446_v60, %v6841_v3  ;;  %vm4632_vm5 = vmand %vm4096_vm3, %vm8038_vm14  ;;  %vm3721_vm3 = vcmp.ge.s32.totalorder %v3587_v26, 0  ;;  %v4111_v45 = vshra.s32 %v3575_v7, 5 }
 0x23a   :  { %vm4900_vm8 = vmand %vm4632_vm5, %vm4766_vm15  ;;  %v4264_v38 = vand.u32 31, %v3457_v30 }
 0x23b   :  { %6290 = vmatpush3.bf16.msra.mxu1 %v5578_v37  ;;  %vm5168_vm2 = vmand %vm4900_vm8, %vm8043_vm4  ;;  %vm3855_vm4 = vcmp.lt.s32.totalorder %v3587_v26, 576  ;;  %vm3856_vm8 = vcmp.lt.s32.totalorder %v3588_v24, 576  ;;  %v3594_v37 = vsub.s32 %v3457_v30, %v7755_v16  ;;  %v8149_v26 = vadd.s32 33, %v3307_v34 }
 0x23c   :  { %vm5436_vm10 = vmand %vm5168_vm2, %vm5302_vm1  ;;  %vm3722_vm1 = vcmp.ge.s32.totalorder %v3588_v24, 0  ;;  %v8155_v24 = vpop.permute.xlu0 %3205  ;;  %v4132_v30 = vshra.s32 %v3596_v29, 5 }
 0x23d   :  { %v5570_v49 = vsel %vm5436_vm10, 0.00390625, %v6841_v3  ;;  %vm4080_vm12 = vmand %vm3812_vm6, %vm3946_vm7  ;;  %vm8072_vm7 = vcmp.ge.s32.totalorder %v4123_v8, 1 }
 0x23e   :  { %v5640_v53 = vpack.c.bf16 %v5570_v49, %v6841_v3  ;;  %vm4616_vm14 = vmand %vm4080_vm12, %vm8056_vm9  ;;  %vm8078_vm9 = vcmp.ge.s32.totalorder %v4124_v63, 1  ;;  %v3324_v49 = vadd.s32 224, %v7743_v15 }
 0x23f   :  { %vm4884_vm15 = vmand %vm4616_vm14, %vm4750_vm11  ;;  %vm4659_vm11 = vcmp.le.s32.totalorder %v4123_v8, 16  ;;  %v4130_v8 = vshra.s32 %v3594_v37, 5 }
 0x240   :  { %6385 = vmatprep.subr.bf16.mxu0 %v5640_v53  ;;  %vm5152_vm5 = vmand %vm4884_vm15, %vm8061_vm13  ;;  %vm4660_vm13 = vcmp.le.s32.totalorder %v4124_v63, 16  ;;  %vm3705_vm15 = vcmp.ge.s32.totalorder %v3571_v62, 0  ;;  %v8172_v63 = vpop.permute.xlu1 %3210  ;;  %v8236_v4 = vpop.permute.xlu0 %3220 }
 0x241   :  { %vm5420_vm6 = vmand %vm5152_vm5, %vm5286_vm0  ;;  %vm3706_vm5 = vcmp.ge.s32.totalorder %v3572_v35, 0 }
 0x242   :  { %v5554_v25 = vsel %vm5420_vm6, 0.00390625, %v6841_v3  ;;  %vm3989_vm2 = vmand %vm3721_vm3, %vm3855_vm4  ;;  %vm3839_vm3 = vcmp.lt.s32.totalorder %v3571_v62, 576  ;;  %vm8089_vm6 = vcmp.ge.s32.totalorder %v4107_v20, 1  ;;  %v3578_v62 = vsub.s32 %v8149_v26, %v7755_v16 }
 0x243   :  { %v5632_v21 = vpack.c.bf16 %v5554_v25, %v6841_v3  ;;  %vm3990_vm10 = vmand %vm3722_vm1, %vm3856_vm8  ;;  %vm3840_vm1 = vcmp.lt.s32.totalorder %v3572_v35, 576 }
 0x244   :  { %vm4525_vm12 = vmand %vm3989_vm2, %vm8072_vm7  ;;  %vm8094_vm2 = vcmp.ge.s32.totalorder %v4108_v51, 1 }
 0x245   :  { %6386 = vmatpush3.bf16.msra.mxu0 %v5632_v21  ;;  %vm4526_vm14 = vmand %vm3990_vm10, %vm8078_vm9  ;;  %vm4643_vm10 = vcmp.le.s32.totalorder %v4107_v20, 16  ;;  %v3458_v21 = vadd.s32 33, %v3324_v49 }
 0x246   :  { %vm4793_vm0 = vmand %vm4525_vm12, %vm4659_vm11  ;;  %vm4644_vm12 = vcmp.le.s32.totalorder %v4108_v51, 16 }
 0x247   :  { %vm4794_vm4 = vmand %vm4526_vm14, %vm4660_vm13 }
 0x248   :  { %vm6199_vm8 = vmpackc.low %vm4794_vm4, %vm4793_vm0  ;;  %vm3724_vm0 = vcmp.ge.s32.totalorder %v3590_v17, 0  ;;  %vm8105_vm4 = vcmp.ge.s32.totalorder %v4126_v55, 1 }
 0x249   :  { %6291 = vmatprep.subr.msk.bf16.mxu1 %vm6199_vm8, %v6840_v28  ;;  %vm3973_vm7 = vmand %vm3705_vm15, %vm3839_vm3  ;;  %vm3858_vm15 = vcmp.lt.s32.totalorder %v3590_v17, 576  ;;  %v4248_v17 = vand.u32 31, %v8149_v26 }
 0x24a   :  { %vm3974_vm9 = vmand %vm3706_vm5, %vm3840_vm1  ;;  %vm4662_vm1 = vcmp.le.s32.totalorder %v4126_v55, 16  ;;  %v4114_v55 = vshra.s32 %v3578_v62, 5 }
 0x24b   :  { %vm4509_vm11 = vmand %vm3973_vm7, %vm8089_vm6  ;;  %vm4930_vm6 = vcmp.ge.s32.totalorder %v4260_v46, 1 }
 0x24c   :  { %vm4510_vm13 = vmand %vm3974_vm9, %vm8094_vm2  ;;  %vm5198_vm2 = vcmp.le.s32.totalorder %v4260_v46, 16 }
 0x24d   :  { %vm4777_vm14 = vmand %vm4509_vm11, %vm4643_vm10  ;;  %vm3708_vm10 = vcmp.ge.s32.totalorder %v3574_v5, 0  ;;  %vm3842_vm11 = vcmp.lt.s32.totalorder %v3574_v5, 576 }
 0x24e   :  { %vm4778_vm3 = vmand %vm4510_vm13, %vm4644_vm12  ;;  %vm8116_vm13 = vcmp.ge.s32.totalorder %v4110_v11, 1 }
 0x24f   :  { %vm6191_vm5 = vmpackc.low %vm4778_vm3, %vm4777_vm14  ;;  %vm8121_vm3 = vcmp.ge.s32.totalorder %v4244_v47, 1 }
 0x250   :  { %6292 = vmatpush3.bf16.msk.msra.mxu1 %vm6191_vm5, %v6840_v28  ;;  %vm3992_vm8 = vmand %vm3724_vm0, %vm3858_vm15  ;;  %vm4646_vm0 = vcmp.le.s32.totalorder %v4110_v11, 16  ;;  %vm5182_vm5 = vcmp.le.s32.totalorder %v4244_v47, 16  ;;  %v3595_v11 = vsub.s32 %v3458_v21, %v7755_v16 }
 0x251   :  { %vm4528_vm7 = vmand %vm3992_vm8, %vm8105_vm4  ;;  %vm3725_vm8 = vcmp.ge.s32.totalorder %v3591_v9, 0 }
 0x252   :  { %vm4796_vm9 = vmand %vm4528_vm7, %vm4662_vm1  ;;  %v4131_v56 = vshra.s32 %v3595_v11, 5 }
 0x253   :  { %vm5064_vm12 = vmand %vm4796_vm9, %vm4930_vm6  ;;  %vm3859_vm6 = vcmp.lt.s32.totalorder %v3591_v9, 576  ;;  %vm3860_vm9 = vcmp.lt.s32.totalorder %v3592_v31, 576  ;;  %v8221_v9 = vpop.permute.xlu1 %3215 }
 0x254   :  { %vm5332_vm14 = vmand %vm5064_vm12, %vm5198_vm2  ;;  %vm3726_vm2 = vcmp.ge.s32.totalorder %v3592_v31, 0 }
 0x255   :  { %v5466_v36 = vsel %vm5332_vm14, 0.00390625, %v6841_v3  ;;  %vm3976_vm15 = vmand %vm3708_vm10, %vm3842_vm11  ;;  %vm8132_vm11 = vcmp.ge.s32.totalorder %v4127_v14, 1 }
 0x256   :  { %v5588_v42 = vpack.c.bf16 %v5466_v36, %v6841_v3  ;;  %vm4512_vm4 = vmand %vm3976_vm15, %vm8116_vm13  ;;  %vm8138_vm13 = vcmp.ge.s32.totalorder %v4128_v22, 1 }
 0x257   :  { %vm4780_vm1 = vmand %vm4512_vm4, %vm4646_vm0  ;;  %vm4663_vm0 = vcmp.le.s32.totalorder %v4127_v14, 16 }
 0x258   :  { %6293 = vmatprep.subr.bf16.mxu1 %v5588_v42  ;;  %vm5048_vm7 = vmand %vm4780_vm1, %vm8121_vm3  ;;  %vm4664_vm3 = vcmp.le.s32.totalorder %v4128_v22, 16  ;;  %vm3709_vm1 = vcmp.ge.s32.totalorder %v3575_v7, 0  ;;  %v3442_v42 = vadd.s32 33, %v3308_v2 }
 0x259   :  { %vm5316_vm10 = vmand %vm5048_vm7, %vm5182_vm5  ;;  %vm3710_vm7 = vcmp.ge.s32.totalorder %v3576_v18, 0 }
 0x25a   :  { %v5450_v58 = vsel %vm5316_vm10, 0.00390625, %v6841_v3  ;;  %vm3993_vm12 = vmand %vm3725_vm8, %vm3859_vm6  ;;  %vm3843_vm8 = vcmp.lt.s32.totalorder %v3575_v7, 576  ;;  %vm8151_vm10 = vcmp.ge.s32.totalorder %v4111_v45, 1 }
 0x25b   :  { %v5580_v60 = vpack.c.bf16 %v5450_v58, %v6841_v3  ;;  %vm3994_vm14 = vmand %vm3726_vm2, %vm3860_vm9  ;;  %vm3844_vm2 = vcmp.lt.s32.totalorder %v3576_v18, 576  ;;  %v3443_v18 = vadd.s32 33, %v3309_v12 }
 0x25c   :  { %vm4529_vm15 = vmand %vm3993_vm12, %vm8132_vm11  ;;  %vm8162_vm12 = vcmp.ge.s32.totalorder %v4112_v61, 1 }
 0x25d   :  { %6294 = vmatpush3.bf16.msra.mxu1 %v5580_v60  ;;  %vm4530_vm4 = vmand %vm3994_vm14, %vm8138_vm13  ;;  %vm4647_vm14 = vcmp.le.s32.totalorder %v4111_v45, 16  ;;  %v3327_v60 = vadd.s32 248, %v7743_v15  ;;  %v3579_v45 = vsub.s32 %v3442_v42, %v7755_v16  ;;  %v3580_v1 = vsub.s32 %v3443_v18, %v7755_v16 }
 0x25e   :  { %vm4797_vm5 = vmand %vm4529_vm15, %vm4663_vm0  ;;  %vm4648_vm15 = vcmp.le.s32.totalorder %v4112_v61, 16 }
 0x25f   :  { %vm4798_vm6 = vmand %vm4530_vm4, %vm4664_vm3  ;;  %v8278_v27 = vadd.s32 33, %v3327_v60  ;;  %v4116_v21 = vshra.s32 %v3580_v1, 5 }
 0x260   :  { %vm6201_vm9 = vmpackc.low %vm4798_vm6, %vm4797_vm5  ;;  %vm3728_vm5 = vcmp.ge.s32.totalorder %v3594_v37, 0  ;;  %vm8191_vm6 = vcmp.ge.s32.totalorder %v4130_v8, 1 }
 0x261   :  { %6295 = vmatprep.subr.msk.bf16.mxu1 %vm6201_vm9, %v6840_v28  ;;  %vm8158_vm11 = vmand %vm3709_vm1, %vm3843_vm8  ;;  %vm3862_vm1 = vcmp.lt.s32.totalorder %v3594_v37, 576  ;;  %vm8203_vm9 = vcmp.ge.s32.totalorder %v4264_v38, 1 }
 0x262   :  { %vm8167_vm13 = vmand %vm3710_vm7, %vm3844_vm2  ;;  %vm8199_vm2 = vcmp.le.s32.totalorder %v4130_v8, 16 }
 0x263   :  { %vm4513_vm0 = vmand %vm8158_vm11, %vm8151_vm10  ;;  %vm8210_vm11 = vcmp.le.s32.totalorder %v4264_v38, 16 }
 0x264   :  { %vm4514_vm3 = vmand %vm8167_vm13, %vm8162_vm12 }
 0x265   :  { %vm8186_vm4 = vmand %vm4513_vm0, %vm4647_vm14  ;;  %vm3712_vm14 = vcmp.ge.s32.totalorder %v3578_v62, 0  ;;  %vm3846_vm0 = vcmp.lt.s32.totalorder %v3578_v62, 576  ;;  %v3311_v62 = vadd.s32 120, %v7743_v15 }
 0x266   :  { %vm4782_vm8 = vmand %vm4514_vm3, %vm4648_vm15  ;;  %vm8232_vm3 = vcmp.ge.s32.totalorder %v4114_v55, 1 }
 0x267   :  { %vm6193_vm7 = vmpackc.low %vm4782_vm8, %vm8186_vm4 }
 0x268   :  { %6296 = vmatpush3.bf16.msk.msra.mxu1 %vm6193_vm7, %v6840_v28  ;;  %vm3996_vm10 = vmand %vm3728_vm5, %vm3862_vm1  ;;  %vm8240_vm5 = vcmp.le.s32.totalorder %v4114_v55, 16  ;;  %vm8244_vm1 = vcmp.ge.s32.totalorder %v4248_v17, 1  ;;  %vm5186_vm7 = vcmp.le.s32.totalorder %v4248_v17, 16  ;;  %v3598_v17 = vsub.s32 %v8278_v27, %v7755_v16 }
 0x269   :  { %vm4532_vm12 = vmand %vm3996_vm10, %vm8191_vm6  ;;  %vm3863_vm10 = vcmp.lt.s32.totalorder %v3595_v11, 576 }
 0x26a   :  { %vm4800_vm13 = vmand %vm4532_vm12, %vm8199_vm2  ;;  %vm3730_vm12 = vcmp.ge.s32.totalorder %v3596_v29, 0 }
 0x26b   :  { %v2993_v53 = vpop.f32.mrb[0].mxu1  ;;  %vm5068_vm15 = vmand %vm4800_vm13, %vm8203_vm9  ;;  %vm3729_vm9 = vcmp.ge.s32.totalorder %v3595_v11, 0  ;;  %vm3864_vm13 = vcmp.lt.s32.totalorder %v3596_v29, 576  ;;  %v4134_v29 = vshra.s32 %v3598_v17, 5 }
 0x26c   :  { %v2995_v23 = vpop.f32.mrb[1].mxu1  ;;  %v3225_v35 = vadd.f32 %v8155_v24, %v2993_v53  ;;  %vm5336_vm4 = vmand %vm5068_vm15, %vm8210_vm11 }
 0x26d   :  { %v3226_v25 = vadd.f32 %v8155_v24, %v2995_v23  ;;  %v2997_v41 = vpop.f32.mrb[2].mxu1  ;;  %v5470_v7 = vsel %vm5336_vm4, 0.00390625, %v6841_v3  ;;  %vm3980_vm8 = vmand %vm3712_vm14, %vm3846_vm0  ;;  %vm8264_vm0 = vcmp.ge.s32.totalorder %v4131_v56, 1 }
 0x26e   :  { %v3234_v40 = vadd.f32 %v8172_v63, %v2997_v41  ;;  %v2999_v20 = vpop.f32.mrb[3].mxu1  ;;  %v3261_v54 = vmax.f32 %v3225_v35, 0.0  ;;  %v5590_v13 = vpack.c.bf16 %v5470_v7, %v6841_v3  ;;  %vm4516_vm6 = vmand %vm3980_vm8, %vm8232_vm3  ;;  %vm8274_vm3 = vcmp.ge.s32.totalorder %v4132_v30, 1 }
 0x26f   :  { %v3235_v50 = vadd.f32 %v8172_v63, %v2999_v20  ;;  %v3262_v6 = vmax.f32 %v3226_v25, 0.0  ;;  %vm4784_vm2 = vmand %vm4516_vm6, %vm8240_vm5  ;;  %vm4667_vm5 = vcmp.le.s32.totalorder %v4131_v56, 16  ;;  %vm4668_vm8 = vcmp.le.s32.totalorder %v4132_v30, 16 }
 0x270   :  { %v3270_v5 = vmax.f32 %v3234_v40, 0.0  ;;  %6297 = vmatprep.subr.bf16.mxu1 %v5590_v13  ;;  %vm5052_vm11 = vmand %vm4784_vm2, %vm8244_vm1  ;;  %v4115_v25 = vshra.s32 %v3579_v45, 5  ;;  %vm3713_vm2 = vcmp.ge.s32.totalorder %v3579_v45, 0 }
 0x271   :  { %v3271_v39 = vmax.f32 %v3235_v50, 0.0  ;;  %vm5320_vm14 = vmand %vm5052_vm11, %vm5186_vm7  ;;  %vm3714_vm11 = vcmp.ge.s32.totalorder %v3580_v1, 0  ;;  %v8307_v50 = vadd.s32 33, %v3311_v62 }
 0x272   :  { %v8219_v47 = vpack.c.bf16 %v3270_v5, %v3261_v54  ;;  %v5454_v43 = vsel %vm5320_vm14, 0.00390625, %v6841_v3  ;;  %vm8270_vm15 = vmand %vm3729_vm9, %vm3863_vm10  ;;  %vm3847_vm9 = vcmp.lt.s32.totalorder %v3579_v45, 576  ;;  %vm8311_vm14 = vcmp.ge.s32.totalorder %v4115_v25, 1 }
 0x273   :  { %v8226_v31 = vpack.c.bf16 %v3271_v39, %v3262_v6  ;;  %v8228_v32 = vpop.f32.mrb[4].mxu1  ;;  %v5582_v53 = vpack.c.bf16 %v5454_v43, %v6841_v3  ;;  %vm8284_vm4 = vmand %vm3730_vm12, %vm3864_vm13  ;;  %vm3848_vm12 = vcmp.lt.s32.totalorder %v3580_v1, 576  ;;  %v4268_v54 = vand.u32 31, %v8278_v27 }
 0x274   :  { %v3005_v36 = vpop.f32.mrb[5].mxu1  ;;  %vm4533_vm1 = vmand %vm8270_vm15, %vm8264_vm0  ;;  %vm8323_vm15 = vcmp.ge.s32.totalorder %v4116_v21, 1  ;;  %v3344_v39 = vadd.s32 384, %v7743_v15  ;;  %v3582_v42 = vsub.s32 %v8307_v50, %v7755_v16  ;;  %v3328_v27 = vadd.s32 256, %v7743_v15 }
 0x275   :  { %v3244_v22 = vadd.f32 %v8221_v9, %v3005_v36  ;;  %v8249_v19 = vpop.f32.mrb[6].mxu1  ;;  %6298 = vmatpush3.bf16.msra.mxu1 %v5582_v53  ;;  %vm4534_vm6 = vmand %vm8284_vm4, %vm8274_vm3  ;;  %vm4651_vm4 = vcmp.le.s32.totalorder %v4115_v25, 16  ;;  %v4252_v62 = vand.u32 31, %v8307_v50 }
 0x276   :  { %v3009_v58 = vpop.f32.mrb[7].mxu1  ;;  %vm8300_vm7 = vmand %vm4533_vm1, %vm4667_vm5  ;;  %vm8338_vm1 = vcmp.le.s32.totalorder %v4116_v21, 16  ;;  %v3478_v13 = vadd.s32 33, %v3344_v39  ;;  %v4118_v43 = vshra.s32 %v3582_v42, 5  ;;  %v3462_v21 = vadd.s32 33, %v3328_v27 }
 0x277   :  { %v3253_v34 = vadd.f32 %v8236_v4, %v3009_v58  ;;  %v3280_v61 = vmax.f32 %v3244_v22, 0.0  ;;  %vm4802_vm10 = vmand %vm4534_vm6, %vm4668_vm8 }
 0x278   :  { %vm6203_vm13 = vmpackc.low %vm4802_vm10, %vm8300_vm7  ;;  %vm3732_vm7 = vcmp.ge.s32.totalorder %v3598_v17, 0  ;;  %vm8357_vm10 = vcmp.ge.s32.totalorder %v4134_v29, 1 }
 0x279   :  { %v3289_v37 = vmax.f32 %v3253_v34, 0.0  ;;  %6299 = vmatprep.subr.msk.bf16.mxu1 %vm6203_vm13, %v6840_v28  ;;  %vm8319_vm0 = vmand %vm3713_vm2, %vm3847_vm9  ;;  %vm3866_vm2 = vcmp.lt.s32.totalorder %v3598_v17, 576  ;;  %vm8368_vm13 = vcmp.le.s32.totalorder %v4134_v29, 16 }
 0x27a   :  { %vm8329_vm3 = vmand %vm3714_vm11, %vm3848_vm12  ;;  %vm8361_vm11 = vcmp.ge.s32.totalorder %v4268_v54, 1 }
 0x27b   :  { %v8280_v8 = vpack.c.bf16 %v3289_v37, %v3280_v61  ;;  %v3099_v0 = vpop.f32.mrb[8].mxu1  ;;  %vm4517_vm5 = vmand %vm8319_vm0, %vm8311_vm14  ;;  %v3479_v61 = vadd.s32 33, %v3345_v33  ;;  %vm8372_vm14 = vcmp.le.s32.totalorder %v4268_v54, 16  ;;  %v3331_v33 = vadd.s32 280, %v7743_v15 }
 0x27c   :  { %v3229_v23 = vadd.f32 %v8155_v24, %v3099_v0  ;;  %v3101_v35 = vpop.f32.mrb[9].mxu1  ;;  %vm4518_vm8 = vmand %vm8329_vm3, %vm8323_vm15  ;;  %v3329_v0 = vadd.s32 264, %v7743_v15 }
 0x27d   :  { %v3230_v41 = vadd.f32 %v8155_v24, %v3101_v35  ;;  %v3103_v59 = vpop.f32.mrb[10].mxu1  ;;  %vm8350_vm6 = vmand %vm4517_vm5, %vm4651_vm4  ;;  %vm3716_vm4 = vcmp.ge.s32.totalorder %v3582_v42, 0  ;;  %vm3850_vm5 = vcmp.lt.s32.totalorder %v3582_v42, 576  ;;  %v3616_v25 = vsub.s32 %v3479_v61, %v7755_v16 }
 0x27e   :  { %v3238_v40 = vadd.f32 %v8172_v63, %v3103_v59  ;;  %v3105_v20 = vpop.f32.mrb[11].mxu1  ;;  %v3265_v44 = vmax.f32 %v3229_v23, 0.0  ;;  %vm4786_vm9 = vmand %vm4518_vm8, %vm8338_vm1  ;;  %v3615_v23 = vsub.s32 %v3478_v13, %v7755_v16  ;;  %vm8390_vm8 = vcmp.ge.s32.totalorder %v4118_v43, 1 }
 0x27f   :  { %v3239_v48 = vadd.f32 %v8172_v63, %v3105_v20  ;;  %v3266_v5 = vmax.f32 %v3230_v41, 0.0  ;;  %vm6195_vm12 = vmpackc.low %vm4786_vm9, %vm8350_vm6  ;;  %vm8397_vm9 = vcmp.ge.s32.totalorder %v4252_v62, 1  ;;  %v3463_v17 = vadd.s32 33, %v3329_v0 }
 0x280   :  { %v3274_v52 = vmax.f32 %v3238_v40, 0.0  ;;  %6300 = vmatpush3.bf16.msk.msra.mxu1 %vm6195_vm12, %v6840_v28  ;;  %vm4000_vm0 = vmand %vm3732_vm7, %vm3866_vm2  ;;  %vm4654_vm7 = vcmp.le.s32.totalorder %v4118_v43, 16  ;;  %v4151_v51 = vshra.s32 %v3615_v23, 5  ;;  %v4152_v50 = vshra.s32 %v3616_v25, 5 }
 0x281   :  { %v3275_v46 = vmax.f32 %v3239_v48, 0.0  ;;  %vm4536_vm15 = vmand %vm4000_vm0, %vm8357_vm10  ;;  %v3600_v54 = vsub.s32 %v3463_v17, %v7755_v16 }
 0x282   :  { %v5650_v11 = vpack.c.bf16 %v3274_v52, %v3265_v44  ;;  %vm4804_vm3 = vmand %vm4536_vm15, %vm8368_vm13  ;;  %v3347_v44 = vadd.s32 408, %v7743_v15  ;;  %vm3749_vm13 = vcmp.ge.s32.totalorder %v3615_v23, 0  ;;  %vm3750_vm15 = vcmp.ge.s32.totalorder %v3616_v25, 0 }
 0x283   :  { %v5651_v36 = vpack.c.bf16 %v3275_v46, %v3266_v5  ;;  %v3109_v14 = vpop.f32.mrb[12].mxu1  ;;  %vm5072_vm1 = vmand %vm4804_vm3, %vm8361_vm11  ;;  %vm5190_vm11 = vcmp.le.s32.totalorder %v4252_v62, 16  ;;  %vm3884_vm3 = vcmp.lt.s32.totalorder %v3616_v25, 576  ;;  %v3599_v52 = vsub.s32 %v3462_v21, %v7755_v16 }
 0x284   :  { %v3247_v22 = vadd.f32 %v8221_v9, %v3109_v14  ;;  %v3111_v7 = vpop.f32.mrb[13].mxu1  ;;  %vm5340_vm6 = vmand %vm5072_vm1, %vm8372_vm14  ;;  %vm3883_vm14 = vcmp.lt.s32.totalorder %v3615_v23, 576  ;;  %v3252_v5 = vadd.f32 %v8236_v4, %v8249_v19  ;;  %v3243_v46 = vadd.f32 %v8221_v9, %v8228_v32 }
 0x285   :  { %v3248_v56 = vadd.f32 %v8221_v9, %v3111_v7  ;;  %v3113_v18 = vpop.f32.mrb[14].mxu1  ;;  %5848 = vmatprep.mubr.bf16.mxu0 %v5651_v36  ;;  %v5474_v40 = vsel %vm5340_vm6, 0.00390625, %v6841_v3  ;;  %vm3984_vm2 = vmand %vm3716_vm4, %vm3850_vm5  ;;  %vm8408_vm5 = vcmp.ge.s32.totalorder %v4151_v51, 1  ;;  %v4135_v42 = vshra.s32 %v3599_v52, 5 }
 0x286   :  { %v3256_v30 = vadd.f32 %v8236_v4, %v3113_v18  ;;  %v3115_v60 = vpop.f32.mrb[15].mxu1  ;;  %5849 = vmatmul.mubr.bf16.vlgmr.msra.gmra.mrb[20].mxu0 %v5650_v11  ;;  %v3283_v57 = vmax.f32 %v3247_v22, 0.0  ;;  %v5592_v48 = vpack.c.bf16 %v5474_v40, %v6841_v3  ;;  %vm4520_vm10 = vmand %vm3984_vm2, %vm8390_vm8  ;;  %vm8422_vm8 = vcmp.ge.s32.totalorder %v4152_v50, 1 }
 0x287   :  { %v3257_v37 = vadd.f32 %v8236_v4, %v3115_v60  ;;  %v3284_v53 = vmax.f32 %v3248_v56, 0.0  ;;  %vm4788_vm12 = vmand %vm4520_vm10, %vm4654_vm7  ;;  %v8426_v11 = vadd.s32 33, %v3347_v44  ;;  %vm8433_vm7 = vcmp.le.s32.totalorder %v4151_v51, 16 }
 0x288   :  { %v3292_v49 = vmax.f32 %v3256_v30, 0.0  ;;  %6301 = vmatprep.subr.bf16.mxu1 %v5592_v48  ;;  %vm5056_vm0 = vmand %vm4788_vm12, %vm8397_vm9  ;;  %vm8443_vm9 = vcmp.le.s32.totalorder %v4152_v50, 16  ;;  %vm3733_vm10 = vcmp.ge.s32.totalorder %v3599_v52, 0  ;;  %vm3867_vm12 = vcmp.lt.s32.totalorder %v3599_v52, 576 }
 0x289   :  { %v3293_v38 = vmax.f32 %v3257_v37, 0.0  ;;  %vm5324_vm4 = vmand %vm5056_vm0, %vm5190_vm11  ;;  %v4136_v56 = vshra.s32 %v3600_v54, 5  ;;  %v3288_v18 = vmax.f32 %v3252_v5, 0.0  ;;  %v3279_v58 = vmax.f32 %v3243_v46, 0.0 }
 0x28a   :  { %v5659_v35 = vpack.c.bf16 %v3292_v49, %v3283_v57  ;;  %v5458_v2 = vsel %vm5324_vm4, 0.00390625, %v6841_v3  ;;  %vm8418_vm1 = vmand %vm3749_vm13, %vm3883_vm14  ;;  %v3618_v34 = vsub.s32 %v8426_v11, %v7755_v16  ;;  %v4288_v45 = vand.u32 31, %v8426_v11 }
 0x28b   :  { %v5660_v41 = vpack.c.bf16 %v3293_v38, %v3284_v53  ;;  %v5584_v29 = vpack.c.bf16 %v5458_v2, %v6841_v3  ;;  %vm8429_vm6 = vmand %vm3750_vm15, %vm3884_vm3  ;;  %vm3734_vm0 = vcmp.ge.s32.totalorder %v3600_v54, 0  ;;  %vm3868_vm15 = vcmp.lt.s32.totalorder %v3600_v54, 576 }
 0x28c   :  { %vm4553_vm2 = vmand %vm8418_vm1, %vm8408_vm5  ;;  %v8465_v37 = vadd.s32 33, %v3331_v33  ;;  %vm8469_vm4 = vcmp.ge.s32.totalorder %v4135_v42, 1  ;;  %v8473_v57 = vpack.c.bf16 %v3288_v18, %v3279_v58  ;;  %vm8482_vm1 = vcmp.ge.s32.totalorder %v4136_v56, 1 }
 0x28d   :  { %5856 = vmatprep.mubr.bf16.mxu0 %v5660_v41  ;;  %6302 = vmatpush3.bf16.msra.mxu1 %v5584_v29  ;;  %vm4554_vm11 = vmand %vm8429_vm6, %vm8422_vm8  ;;  %v3348_v38 = vadd.s32 416, %v7743_v15  ;;  %vm4671_vm6 = vcmp.le.s32.totalorder %v4135_v42, 16  ;;  %v3349_v25 = vadd.s32 424, %v7743_v15  ;;  %v3332_v11 = vadd.s32 288, %v7743_v15 }
 0x28e   :  { %5857 = vmatmul.mubr.bf16.gmra.mrb[24].mxu0 %v5659_v35  ;;  %vm8455_vm13 = vmand %vm4553_vm2, %vm8433_vm7  ;;  %v4154_v35 = vshra.s32 %v3618_v34, 5  ;;  %vm8497_vm2 = vcmp.le.s32.totalorder %v4136_v56, 16  ;;  %v3602_v40 = vsub.s32 %v8465_v37, %v7755_v16  ;;  %v3333_v32 = vadd.s32 296, %v7743_v15 }
 0x28f   :  { %vm4822_vm14 = vmand %vm4554_vm11, %vm8443_vm9  ;;  %vm3752_vm11 = vcmp.ge.s32.totalorder %v3618_v34, 0  ;;  %v3482_v44 = vadd.s32 33, %v3348_v38  ;;  %v3483_v46 = vadd.s32 33, %v3349_v25  ;;  %v3466_v58 = vadd.s32 33, %v3332_v11 }
 0x290   :  { %vm6213_vm3 = vmpackc.low %vm4822_vm14, %vm8455_vm13  ;;  %vm8516_vm14 = vcmp.ge.s32.totalorder %v4154_v35, 1  ;;  %v4138_v39 = vshra.s32 %v3602_v40, 5 }
 0x291   :  { %6315 = vmatprep.subr.msk.bf16.mxu1 %vm6213_vm3, %v6840_v28  ;;  %vm8478_vm5 = vmand %vm3733_vm10, %vm3867_vm12  ;;  %vm3886_vm12 = vcmp.lt.s32.totalorder %v3618_v34, 576  ;;  %vm8527_vm3 = vcmp.le.s32.totalorder %v4154_v35, 16  ;;  %v3619_v10 = vsub.s32 %v3482_v44, %v7755_v16  ;;  %v3467_v34 = vadd.s32 33, %v3333_v32 }
 0x292   :  { %vm8488_vm8 = vmand %vm3734_vm0, %vm3868_vm15  ;;  %vm8520_vm0 = vcmp.ge.s32.totalorder %v4288_v45, 1  ;;  %v3603_v23 = vsub.s32 %v3466_v58, %v7755_v16  ;;  %v3352_v58 = vadd.s32 448, %v7743_v15 }
 0x293   :  { %v2940_v12 = vpop.f32.mrb[0].mxu0  ;;  %vm4537_vm7 = vmand %vm8478_vm5, %vm8469_vm4  ;;  %vm8535_vm5 = vcmp.le.s32.totalorder %v4288_v45, 16  ;;  %v3351_v45 = vadd.s32 440, %v7743_v15  ;;  %v4155_v43 = vshra.s32 %v3619_v10, 5 }
 0x294   :  { %v3223_v36 = vadd.f32 %v8155_v24, %v2940_v12  ;;  %v2942_v14 = vpop.f32.mrb[1].mxu0  ;;  %vm4538_vm9 = vmand %vm8488_vm8, %vm8482_vm1 }
 0x295   :  { %v3224_v22 = vadd.f32 %v8155_v24, %v2942_v14  ;;  %v2944_v7 = vpop.f32.mrb[2].mxu0  ;;  %vm8509_vm10 = vmand %vm4537_vm7, %vm4671_vm6  ;;  %v4272_v14 = vand.u32 31, %v8465_v37  ;;  %vm3736_vm6 = vcmp.ge.s32.totalorder %v3602_v40, 0  ;;  %vm3870_vm7 = vcmp.lt.s32.totalorder %v3602_v40, 576 }
 0x296   :  { %v3232_v13 = vadd.f32 %v8172_v63, %v2944_v7  ;;  %v2946_v30 = vpop.f32.mrb[3].mxu0  ;;  %v3259_v26 = vmax.f32 %v3223_v36, 0.0  ;;  %vm4806_vm13 = vmand %vm4538_vm9, %vm8497_vm2  ;;  %vm8549_vm9 = vcmp.ge.s32.totalorder %v4138_v39, 1  ;;  %v3604_v40 = vsub.s32 %v3467_v34, %v7755_v16 }
 0x297   :  { %v3233_v61 = vadd.f32 %v8172_v63, %v2946_v30  ;;  %v3260_v49 = vmax.f32 %v3224_v22, 0.0  ;;  %vm6205_vm15 = vmpackc.low %vm4806_vm13, %vm8509_vm10  ;;  %v3620_v22 = vsub.s32 %v3483_v46, %v7755_v16  ;;  %vm8563_vm13 = vcmp.ge.s32.totalorder %v4272_v14, 1 }
 0x298   :  { %v3268_v1 = vmax.f32 %v3232_v13, 0.0  ;;  %vm4020_vm4 = vmand %vm3752_vm11, %vm3886_vm12  ;;  %vm8555_vm11 = vcmp.le.s32.totalorder %v4138_v39, 16  ;;  %v4139_v46 = vshra.s32 %v3603_v23, 5  ;;  %v4140_v39 = vshra.s32 %v3604_v40, 5 }
 0x299   :  { %v3269_v27 = vmax.f32 %v3233_v61, 0.0  ;;  %vm4556_vm1 = vmand %vm4020_vm4, %vm8516_vm14  ;;  %v4156_v53 = vshra.s32 %v3620_v22, 5  ;;  %vm3887_vm4 = vcmp.lt.s32.totalorder %v3619_v10, 576 }
 0x29a   :  { %v5644_v62 = vpack.c.bf16 %v3268_v1, %v3259_v26  ;;  %vm4824_vm8 = vmand %vm4556_vm1, %vm8527_vm3  ;;  %vm3753_vm3 = vcmp.ge.s32.totalorder %v3619_v10, 0  ;;  %vm3754_vm1 = vcmp.ge.s32.totalorder %v3620_v22, 0 }
 0x29b   :  { %v5645_v41 = vpack.c.bf16 %v3269_v27, %v3260_v49  ;;  %v2950_v59 = vpop.f32.mrb[4].mxu0  ;;  %vm5092_vm2 = vmand %vm4824_vm8, %vm8520_vm0  ;;  %vm8571_vm0 = vcmp.le.s32.totalorder %v4272_v14, 16  ;;  %vm3888_vm8 = vcmp.lt.s32.totalorder %v3620_v22, 576 }
 0x29c   :  { %v3241_v20 = vadd.f32 %v8221_v9, %v2950_v59  ;;  %v2952_v51 = vpop.f32.mrb[5].mxu0  ;;  %vm5360_vm10 = vmand %vm5092_vm2, %vm8535_vm5 }
 0x29d   :  { %v3242_v17 = vadd.f32 %v8221_v9, %v2952_v51  ;;  %v2954_v48 = vpop.f32.mrb[6].mxu0  ;;  %5701 = vmatprep.mubr.bf16.mxu1 %v5645_v41  ;;  %v5494_v61 = vsel %vm5360_vm10, 0.00390625, %v6841_v3  ;;  %vm4004_vm12 = vmand %vm3736_vm6, %vm3870_vm7  ;;  %vm8585_vm7 = vcmp.ge.s32.totalorder %v4155_v43, 1 }
 0x29e   :  { %v3250_v52 = vadd.f32 %v8236_v4, %v2954_v48  ;;  %v2956_v55 = vpop.f32.mrb[7].mxu0  ;;  %5702 = vmatmul.mubr.bf16.vlgmr.msra.gmra.mrb[16].mxu1 %v5644_v62  ;;  %v3277_v12 = vmax.f32 %v3241_v20, 0.0  ;;  %v5602_v49 = vpack.c.bf16 %v5494_v61, %v6841_v3  ;;  %vm4540_vm14 = vmand %vm4004_vm12, %vm8549_vm9  ;;  %vm8599_vm9 = vcmp.ge.s32.totalorder %v4156_v53, 1 }
 0x29f   :  { %v3251_v2 = vadd.f32 %v8236_v4, %v2956_v55  ;;  %6316 = vmatpush3.bf16.msk.msra.mxu1 %vm6205_vm15, %v6840_v28  ;;  %v3278_v33 = vmax.f32 %v3242_v17, 0.0  ;;  %vm4808_vm15 = vmand %vm4540_vm14, %vm8555_vm11  ;;  %v8603_v48 = vadd.s32 33, %v3351_v45  ;;  %vm4691_vm11 = vcmp.le.s32.totalorder %v4155_v43, 16 }
 0x2a0   :  { %v3286_v29 = vmax.f32 %v3250_v52, 0.0  ;;  %6317 = vmatprep.subr.bf16.mxu1 %v5602_v49  ;;  %vm5076_vm5 = vmand %vm4808_vm15, %vm8563_vm13  ;;  %v3335_v55 = vadd.s32 312, %v7743_v15  ;;  %vm8617_vm13 = vcmp.le.s32.totalorder %v4156_v53, 16  ;;  %vm3737_vm15 = vcmp.ge.s32.totalorder %v3603_v23, 0 }
 0x2a1   :  { %v3287_v36 = vmax.f32 %v3251_v2, 0.0  ;;  %vm5344_vm6 = vmand %vm5076_vm5, %vm8571_vm0  ;;  %v3622_v19 = vsub.s32 %v8603_v48, %v7755_v16  ;;  %vm3738_vm5 = vcmp.ge.s32.totalorder %v3604_v40, 0  ;;  %v3353_v45 = vadd.s32 456, %v7743_v15 }
 0x2a2   :  { %v5653_v42 = vpack.c.bf16 %v3286_v29, %v3277_v12  ;;  %vm8595_vm2 = vmand %vm3753_vm3, %vm3887_vm4  ;;  %vm3871_vm3 = vcmp.lt.s32.totalorder %v3603_v23, 576  ;;  %v4292_v61 = vand.u32 31, %v8603_v48 }
 0x2a3   :  { %v5654_v7 = vpack.c.bf16 %v3287_v36, %v3278_v33  ;;  %v3046_v18 = vpop.f32.mrb[8].mxu0  ;;  %vm8606_vm10 = vmand %vm3754_vm1, %vm3888_vm8  ;;  %vm3872_vm1 = vcmp.lt.s32.totalorder %v3604_v40, 576  ;;  %v8636_v36 = vadd.s32 33, %v3335_v55  ;;  %v3487_v23 = vadd.s32 33, %v3353_v45 }
 0x2a4   :  { %v3227_v30 = vadd.f32 %v8155_v24, %v3046_v18  ;;  %v3048_v60 = vpop.f32.mrb[9].mxu0  ;;  %vm4557_vm12 = vmand %vm8595_vm2, %vm8585_vm7  ;;  %vm8651_vm2 = vcmp.ge.s32.totalorder %v4140_v39, 1  ;;  %v3356_v45 = vadd.s32 480, %v7743_v15 }
 0x2a5   :  { %v3228_v26 = vadd.f32 %v8155_v24, %v3048_v60  ;;  %v3050_v1 = vpop.f32.mrb[10].mxu0  ;;  %5709 = vmatprep.mubr.bf16.mxu1 %v5654_v7  ;;  %vm4558_vm14 = vmand %vm8606_vm10, %vm8599_vm9  ;;  %vm4675_vm10 = vcmp.le.s32.totalorder %v4139_v46, 16  ;;  %v4158_v60 = vshra.s32 %v3622_v19, 5  ;;  %v3606_v37 = vsub.s32 %v8636_v36, %v7755_v16 }
 0x2a6   :  { %v3236_v0 = vadd.f32 %v8172_v63, %v3050_v1  ;;  %v3052_v38 = vpop.f32.mrb[11].mxu0  ;;  %5710 = vmatmul.mubr.bf16.gmra.mrb[20].mxu1 %v5653_v42  ;;  %v3263_v35 = vmax.f32 %v3227_v30, 0.0  ;;  %vm8627_vm0 = vmand %vm4557_vm12, %vm4691_vm11  ;;  %vm4676_vm12 = vcmp.le.s32.totalorder %v4140_v39, 16  ;;  %v4276_v40 = vand.u32 31, %v8636_v36 }
 0x2a7   :  { %v3237_v62 = vadd.f32 %v8172_v63, %v3052_v38  ;;  %5750 = vmatprep.mubr.bf16.mxu1 %v8226_v31  ;;  %v3264_v41 = vmax.f32 %v3228_v26, 0.0  ;;  %v5478_v31 = vsel %vm5344_vm6, 0.00390625, %v6841_v3  ;;  %vm4826_vm4 = vmand %vm4558_vm14, %vm8617_vm13  ;;  %vm8641_vm6 = vcmp.ge.s32.totalorder %v4139_v46, 1 }
 0x2a8   :  { %v3272_v25 = vmax.f32 %v3236_v0, 0.0  ;;  %v5594_v50 = vpack.c.bf16 %v5478_v31, %v6841_v3  ;;  %vm6215_vm8 = vmpackc.low %vm4826_vm4, %vm8627_vm0  ;;  %vm3756_vm0 = vcmp.ge.s32.totalorder %v3622_v19, 0  ;;  %v3486_v0 = vadd.s32 33, %v3352_v58 }
 0x2a9   :  { %v3273_v21 = vmax.f32 %v3237_v62, 0.0  ;;  %vm8647_vm7 = vmand %vm3737_vm15, %vm3871_vm3  ;;  %vm3890_vm15 = vcmp.lt.s32.totalorder %v3622_v19, 576  ;;  %vm8682_vm4 = vcmp.ge.s32.totalorder %v4158_v60, 1  ;;  %v4142_v59 = vshra.s32 %v3606_v37, 5 }
 0x2aa   :  { %v8591_v20 = vpack.c.bf16 %v3272_v25, %v3263_v35  ;;  %6318 = vmatpush3.bf16.msra.mxu1 %v5594_v50  ;;  %vm8656_vm9 = vmand %vm3738_vm5, %vm3872_vm1  ;;  %v3336_v35 = vadd.s32 320, %v7743_v15  ;;  %vm8690_vm1 = vcmp.le.s32.totalorder %v4158_v60, 16  ;;  %v3623_v17 = vsub.s32 %v3486_v0, %v7755_v16 }
 0x2ab   :  { %v8610_v52 = vpack.c.bf16 %v3273_v21, %v3264_v41  ;;  %v3056_v54 = vpop.f32.mrb[12].mxu0  ;;  %6319 = vmatprep.subr.msk.bf16.mxu1 %vm6215_vm8, %v6840_v28  ;;  %vm4541_vm11 = vmand %vm8647_vm7, %vm8641_vm6  ;;  %vm8694_vm8 = vcmp.ge.s32.totalorder %v4292_v61, 1  ;;  %vm8702_vm7 = vcmp.le.s32.totalorder %v4292_v61, 16  ;;  %v3624_v44 = vsub.s32 %v3487_v23, %v7755_v16 }
 0x2ac   :  { %v3245_v2 = vadd.f32 %v8221_v9, %v3056_v54  ;;  %v3058_v6 = vpop.f32.mrb[13].mxu0  ;;  %vm4542_vm13 = vmand %vm8656_vm9, %vm8651_vm2  ;;  %v3470_v46 = vadd.s32 33, %v3336_v35  ;;  %v4159_v39 = vshra.s32 %v3623_v17, 5  ;;  %v3355_v19 = vadd.s32 472, %v7743_v15 }
 0x2ad   :  { %v3246_v11 = vadd.f32 %v8221_v9, %v3058_v6  ;;  %v3060_v12 = vpop.f32.mrb[14].mxu0  ;;  %vm8677_vm14 = vmand %vm4541_vm11, %vm4675_vm10  ;;  %vm3740_vm10 = vcmp.ge.s32.totalorder %v3606_v37, 0  ;;  %vm3874_vm11 = vcmp.lt.s32.totalorder %v3606_v37, 576  ;;  %v4160_v29 = vshra.s32 %v3624_v44, 5 }
 0x2ae   :  { %v3254_v32 = vadd.f32 %v8236_v4, %v3060_v12  ;;  %v3062_v33 = vpop.f32.mrb[15].mxu0  ;;  %v3281_v42 = vmax.f32 %v3245_v2, 0.0  ;;  %vm4810_vm3 = vmand %vm4542_vm13, %vm4676_vm12  ;;  %vm8718_vm13 = vcmp.ge.s32.totalorder %v4142_v59, 1  ;;  %v3339_v7 = vadd.s32 344, %v7743_v15 }
 0x2af   :  { %v3255_v14 = vadd.f32 %v8236_v4, %v3062_v33  ;;  %v3282_v18 = vmax.f32 %v3246_v11, 0.0  ;;  %vm6207_vm5 = vmpackc.low %vm4810_vm3, %vm8677_vm14  ;;  %vm8727_vm3 = vcmp.ge.s32.totalorder %v4276_v40, 1  ;;  %v3357_v37 = vadd.s32 488, %v7743_v15 }
 0x2b0   :  { %v3290_v22 = vmax.f32 %v3254_v32, 0.0  ;;  %6320 = vmatpush3.bf16.msk.msra.mxu1 %vm6207_vm5, %v6840_v28  ;;  %vm4024_vm6 = vmand %vm3756_vm0, %vm3890_vm15  ;;  %vm4678_vm0 = vcmp.le.s32.totalorder %v4142_v59, 16  ;;  %vm5214_vm5 = vcmp.le.s32.totalorder %v4276_v40, 16  ;;  %v3607_v32 = vsub.s32 %v3470_v46, %v7755_v16 }
 0x2b1   :  { %v3291_v13 = vmax.f32 %v3255_v14, 0.0  ;;  %vm4560_vm2 = vmand %vm4024_vm6, %vm8682_vm4  ;;  %vm3891_vm6 = vcmp.lt.s32.totalorder %v3623_v17, 576  ;;  %v3491_v0 = vadd.s32 33, %v3357_v37  ;;  %v3341_v35 = vadd.s32 360, %v7743_v15 }
 0x2b2   :  { %v8660_v34 = vpack.c.bf16 %v3290_v22, %v3281_v42  ;;  %vm4828_vm9 = vmand %vm4560_vm2, %vm8690_vm1  ;;  %vm3758_vm2 = vcmp.ge.s32.totalorder %v3624_v44, 0  ;;  %v3489_v42 = vadd.s32 33, %v3355_v19  ;;  %v4143_v56 = vshra.s32 %v3607_v32, 5 }
 0x2b3   :  { %v8670_v26 = vpack.c.bf16 %v3291_v13, %v3282_v18  ;;  %v6461_v1 = vpop.f32.mrb[16].mxu0  ;;  %vm5096_vm12 = vmand %vm4828_vm9, %vm8694_vm8  ;;  %vm3757_vm8 = vcmp.ge.s32.totalorder %v3623_v17, 0  ;;  %vm3892_vm9 = vcmp.lt.s32.totalorder %v3624_v44, 576  ;;  %v3473_v13 = vadd.s32 33, %v3339_v7 }
 0x2b4   :  { %v3249_v43 = vadd.f32 %v6461_v1, %v8221_v9  ;;  %v3152_v49 = vpop.f32.mrb[17].mxu0  ;;  %vm5364_vm14 = vmand %vm5096_vm12, %vm8702_vm7  ;;  %v3626_v58 = vsub.s32 %v3489_v42, %v7755_v16  ;;  %v3361_v30 = vadd.s32 520, %v7743_v15 }
 0x2b5   :  { %v3231_v53 = vadd.f32 %v8155_v24, %v3152_v49  ;;  %v6462_v38 = vpop.f32.mrb[18].mxu0  ;;  %v5498_v2 = vsel %vm5364_vm14, 0.00390625, %v6841_v3  ;;  %vm4008_vm15 = vmand %vm3740_vm10, %vm3874_vm11  ;;  %vm8738_vm11 = vcmp.ge.s32.totalorder %v4159_v39, 1  ;;  %v3610_v1 = vsub.s32 %v3473_v13, %v7755_v16 }
 0x2b6   :  { %v3258_v9 = vadd.f32 %v6462_v38, %v8236_v4  ;;  %v3155_v25 = vpop.f32.mrb[19].mxu0  ;;  %v3285_v31 = vmax.f32 %v3249_v43, 0.0  ;;  %v5604_v12 = vpack.c.bf16 %v5498_v2, %v6841_v3  ;;  %vm4544_vm4 = vmand %vm4008_vm15, %vm8718_vm13  ;;  %vm8744_vm13 = vcmp.ge.s32.totalorder %v4160_v29, 1 }
 0x2b7   :  { %v3240_v21 = vadd.f32 %v8172_v63, %v3155_v25  ;;  %v3337_v63 = vadd.s32 328, %v7743_v15  ;;  %v3267_v48 = vmax.f32 %v3231_v53, 0.0  ;;  %vm4812_vm1 = vmand %vm4544_vm4, %vm4678_vm0  ;;  %vm4695_vm0 = vcmp.le.s32.totalorder %v4159_v39, 16 }
 0x2b8   :  { %v3294_v51 = vmax.f32 %v3258_v9, 0.0  ;;  %6321 = vmatprep.subr.bf16.mxu1 %v5604_v12  ;;  %vm5080_vm7 = vmand %vm4812_vm1, %vm8727_vm3  ;;  %vm4696_vm3 = vcmp.le.s32.totalorder %v4160_v29, 16  ;;  %vm3741_vm1 = vcmp.ge.s32.totalorder %v3607_v32, 0  ;;  %v4162_v61 = vshra.s32 %v3626_v58, 5 }
 0x2b9   :  { %v3276_v50 = vmax.f32 %v3240_v21, 0.0  ;;  %v3471_v11 = vadd.s32 33, %v3337_v63  ;;  %vm5348_vm10 = vmand %vm5080_vm7, %vm5214_vm5  ;;  %v4296_v43 = vand.u32 31, %v3489_v42  ;;  %v3490_v49 = vadd.s32 33, %v3356_v45 }
 0x2ba   :  { %v8714_v55 = vpack.c.bf16 %v3294_v51, %v3285_v31  ;;  %v5482_v14 = vsel %vm5348_vm10, 0.00390625, %v6841_v3  ;;  %vm4025_vm12 = vmand %vm3757_vm8, %vm3891_vm6  ;;  %vm3875_vm8 = vcmp.lt.s32.totalorder %v3607_v32, 576  ;;  %vm8755_vm10 = vcmp.ge.s32.totalorder %v4143_v56, 1 }
 0x2bb   :  { %v8722_v5 = vpack.c.bf16 %v3276_v50, %v3267_v48  ;;  %v3608_v36 = vsub.s32 %v3471_v11, %v7755_v16  ;;  %v5596_v22 = vpack.c.bf16 %v5482_v14, %v6841_v3  ;;  %vm4026_vm14 = vmand %vm3758_vm2, %vm3892_vm9  ;;  %v4146_v53 = vshra.s32 %v3610_v1, 5 }
 0x2bc   :  { %vm4561_vm15 = vmand %vm4025_vm12, %vm8738_vm11  ;;  %v3340_v38 = vadd.s32 352, %v7743_v15  ;;  %v4280_v62 = vand.u32 31, %v3473_v13  ;;  %v3627_v23 = vsub.s32 %v3490_v49, %v7755_v16  ;;  %v3628_v9 = vsub.s32 %v3491_v0, %v7755_v16 }
 0x2bd   :  { %6322 = vmatpush3.bf16.msra.mxu1 %v5596_v22  ;;  %vm4562_vm4 = vmand %vm4026_vm14, %vm8744_vm13  ;;  %v4144_v18 = vshra.s32 %v3608_v36, 5  ;;  %vm3742_vm7 = vcmp.ge.s32.totalorder %v3608_v36, 0  ;;  %vm3876_vm2 = vcmp.lt.s32.totalorder %v3608_v36, 576  ;;  %vm4679_vm14 = vcmp.le.s32.totalorder %v4143_v56, 16 }
 0x2be   :  { %vm4829_vm5 = vmand %vm4561_vm15, %vm4695_vm0  ;;  %v3474_v41 = vadd.s32 33, %v3340_v38  ;;  %v4163_v21 = vshra.s32 %v3627_v23, 5  ;;  %v3475_v4 = vadd.s32 33, %v3341_v35  ;;  %v4164_v31 = vshra.s32 %v3628_v9, 5 }
 0x2bf   :  { %vm4830_vm6 = vmand %vm4562_vm4, %vm4696_vm3  ;;  %vm8760_vm12 = vcmp.ge.s32.totalorder %v4144_v18, 1  ;;  %vm4680_vm15 = vcmp.le.s32.totalorder %v4144_v18, 16  ;;  %v3359_v51 = vadd.s32 504, %v7743_v15  ;;  %v3343_v2 = vadd.s32 376, %v7743_v15 }
 0x2c0   :  { %vm6217_vm9 = vmpackc.low %vm4830_vm6, %vm4829_vm5  ;;  %vm3760_vm5 = vcmp.ge.s32.totalorder %v3626_v58, 0  ;;  %vm8771_vm6 = vcmp.ge.s32.totalorder %v4162_v61, 1  ;;  %v3611_v17 = vsub.s32 %v3474_v41, %v7755_v16  ;;  %v3612_v48 = vsub.s32 %v3475_v4, %v7755_v16 }
 0x2c1   :  { %6323 = vmatprep.subr.msk.bf16.mxu1 %vm6217_vm9, %v6840_v28  ;;  %vm4009_vm11 = vmand %vm3741_vm1, %vm3875_vm8  ;;  %vm3894_vm1 = vcmp.lt.s32.totalorder %v3626_v58, 576  ;;  %v3493_v54 = vadd.s32 33, %v3359_v51  ;;  %v3477_v12 = vadd.s32 33, %v3343_v2  ;;  %v3376_v32 = vadd.s32 640, %v7743_v15 }
 0x2c2   :  { %vm4010_vm13 = vmand %vm3742_vm7, %vm3876_vm2  ;;  %vm4698_vm2 = vcmp.le.s32.totalorder %v4162_v61, 16  ;;  %v4147_v6 = vshra.s32 %v3611_v17, 5  ;;  %v4148_v39 = vshra.s32 %v3612_v48, 5  ;;  %v3377_v36 = vadd.s32 648, %v7743_v15 }
 0x2c3   :  { %vm4545_vm0 = vmand %vm4009_vm11, %vm8755_vm10  ;;  %vm4966_vm10 = vcmp.ge.s32.totalorder %v4296_v43, 1  ;;  %v3630_v11 = vsub.s32 %v3493_v54, %v7755_v16  ;;  %v3614_v14 = vsub.s32 %v3477_v12, %v7755_v16  ;;  %v4300_v10 = vand.u32 31, %v3493_v54 }
 0x2c4   :  { %vm4546_vm3 = vmand %vm4010_vm13, %vm8760_vm12  ;;  %vm5234_vm12 = vcmp.le.s32.totalorder %v4296_v43, 16  ;;  %v3510_v42 = vadd.s32 33, %v3376_v32  ;;  %v3511_v7 = vadd.s32 33, %v3377_v36  ;;  %v3360_v18 = vadd.s32 512, %v7743_v15 }
 0x2c5   :  { %vm4813_vm4 = vmand %vm4545_vm0, %vm4679_vm14  ;;  %vm3744_vm14 = vcmp.ge.s32.totalorder %v3610_v1, 0  ;;  %vm3878_vm0 = vcmp.lt.s32.totalorder %v3610_v1, 576  ;;  %v4166_v33 = vshra.s32 %v3630_v11, 5  ;;  %v4150_v56 = vshra.s32 %v3614_v14, 5 }
 0x2c6   :  { %vm4814_vm8 = vmand %vm4546_vm3, %vm4680_vm15  ;;  %vm8782_vm3 = vcmp.ge.s32.totalorder %v4146_v53, 1  ;;  %v4284_v58 = vand.u32 31, %v3477_v12  ;;  %v3647_v13 = vsub.s32 %v3510_v42, %v7755_v16  ;;  %v3648_v60 = vsub.s32 %v3511_v7, %v7755_v16 }
 0x2c7   :  { %vm6209_vm7 = vmpackc.low %vm4814_vm8, %vm4813_vm4  ;;  %vm8787_vm8 = vcmp.ge.s32.totalorder %v4280_v62, 1  ;;  %v3494_v61 = vadd.s32 33, %v3360_v18  ;;  %v3495_v49 = vadd.s32 33, %v3361_v30  ;;  %v3365_v12 = vadd.s32 552, %v7743_v15 }
 0x2c8   :  { %6324 = vmatpush3.bf16.msk.msra.mxu1 %vm6209_vm7, %v6840_v28  ;;  %vm4028_vm9 = vmand %vm3760_vm5, %vm3894_vm1  ;;  %vm4682_vm5 = vcmp.le.s32.totalorder %v4146_v53, 16  ;;  %vm5218_vm7 = vcmp.le.s32.totalorder %v4280_v62, 16  ;;  %v4183_v43 = vshra.s32 %v3647_v13, 5  ;;  %v4184_v0 = vshra.s32 %v3648_v60, 5 }
 0x2c9   :  { %vm4564_vm11 = vmand %vm4028_vm9, %vm8771_vm6  ;;  %vm3761_vm9 = vcmp.ge.s32.totalorder %v3627_v23, 0  ;;  %v3379_v53 = vadd.s32 664, %v7743_v15  ;;  %v3631_v38 = vsub.s32 %v3494_v61, %v7755_v16  ;;  %v3383_v42 = vadd.s32 696, %v7743_v15 }
 0x2ca   :  { %vm4832_vm13 = vmand %vm4564_vm11, %vm4698_vm2 }
 0x2cb   :  { %vm5100_vm15 = vmand %vm4832_vm13, %vm4966_vm10  ;;  %vm3895_vm10 = vcmp.lt.s32.totalorder %v3627_v23, 576  ;;  %vm3896_vm13 = vcmp.lt.s32.totalorder %v3628_v9, 576  ;;  %v3632_v23 = vsub.s32 %v3495_v49, %v7755_v16  ;;  %v3513_v25 = vadd.s32 33, %v3379_v53 }
 0x2cc   :  { %vm5368_vm4 = vmand %vm5100_vm15, %vm5234_vm12  ;;  %vm3762_vm12 = vcmp.ge.s32.totalorder %v3628_v9, 0  ;;  %v4167_v59 = vshra.s32 %v3631_v38, 5  ;;  %v3385_v53 = vadd.s32 712, %v7743_v15 }
 0x2cd   :  { %v5502_v24 = vsel %vm5368_vm4, 0.00390625, %v6841_v3  ;;  %vm4012_vm1 = vmand %vm3744_vm14, %vm3878_vm0  ;;  %vm8798_vm0 = vcmp.ge.s32.totalorder %v4163_v21, 1  ;;  %v3650_v4 = vsub.s32 %v3513_v25, %v7755_v16 }
 0x2ce   :  { %v5606_v40 = vpack.c.bf16 %v5502_v24, %v6841_v3  ;;  %vm4548_vm6 = vmand %vm4012_vm1, %vm8782_vm3  ;;  %vm8804_vm3 = vcmp.ge.s32.totalorder %v4164_v31, 1  ;;  %v3363_v24 = vadd.s32 536, %v7743_v15  ;;  %v3519_v9 = vadd.s32 33, %v3385_v53 }
 0x2cf   :  { %vm4816_vm2 = vmand %vm4548_vm6, %vm4682_vm5  ;;  %vm4699_vm5 = vcmp.le.s32.totalorder %v4163_v21, 16  ;;  %v4168_v21 = vshra.s32 %v3632_v23, 5  ;;  %v4186_v63 = vshra.s32 %v3650_v4, 5 }
 0x2d0   :  { %6325 = vmatprep.subr.bf16.mxu1 %v5606_v40  ;;  %vm5084_vm11 = vmand %vm4816_vm2, %vm8787_vm8  ;;  %vm4700_vm8 = vcmp.le.s32.totalorder %v4164_v31, 16  ;;  %vm3745_vm2 = vcmp.ge.s32.totalorder %v3611_v17, 0  ;;  %v3497_v40 = vadd.s32 33, %v3363_v24 }
 0x2d1   :  { %vm5352_vm14 = vmand %vm5084_vm11, %vm5218_vm7  ;;  %vm3746_vm11 = vcmp.ge.s32.totalorder %v3612_v48, 0 }
 0x2d2   :  { %v5486_v50 = vsel %vm5352_vm14, 0.00390625, %v6841_v3  ;;  %vm4029_vm15 = vmand %vm3761_vm9, %vm3895_vm10  ;;  %vm3879_vm9 = vcmp.lt.s32.totalorder %v3611_v17, 576  ;;  %vm8815_vm14 = vcmp.ge.s32.totalorder %v4147_v6, 1  ;;  %v3380_v17 = vadd.s32 672, %v7743_v15 }
 0x2d3   :  { %v5598_v46 = vpack.c.bf16 %v5486_v50, %v6841_v3  ;;  %vm4030_vm4 = vmand %vm3762_vm12, %vm3896_vm13  ;;  %vm3880_vm12 = vcmp.lt.s32.totalorder %v3612_v48, 576  ;;  %v3634_v48 = vsub.s32 %v3497_v40, %v7755_v16 }
 0x2d4   :  { %vm4565_vm1 = vmand %vm4029_vm15, %vm8798_vm0  ;;  %vm8820_vm15 = vcmp.ge.s32.totalorder %v4148_v39, 1  ;;  %v3514_v50 = vadd.s32 33, %v3380_v17 }
 0x2d5   :  { %6326 = vmatpush3.bf16.msra.mxu1 %v5598_v46  ;;  %vm4566_vm6 = vmand %vm4030_vm4, %vm8804_vm3  ;;  %vm4683_vm4 = vcmp.le.s32.totalorder %v4147_v6, 16  ;;  %v4170_v46 = vshra.s32 %v3634_v48, 5  ;;  %v3364_v6 = vadd.s32 544, %v7743_v15 }
 0x2d6   :  { %vm4833_vm7 = vmand %vm4565_vm1, %vm4699_vm5  ;;  %vm4684_vm1 = vcmp.le.s32.totalorder %v4148_v39, 16  ;;  %v4304_v39 = vand.u32 31, %v3497_v40 }
 0x2d7   :  { %vm4834_vm10 = vmand %vm4566_vm6, %vm4700_vm8 }
 0x2d8   :  { %vm6219_vm13 = vmpackc.low %vm4834_vm10, %vm4833_vm7  ;;  %vm3764_vm7 = vcmp.ge.s32.totalorder %v3630_v11, 0  ;;  %vm8831_vm10 = vcmp.ge.s32.totalorder %v4166_v33, 1 }
 0x2d9   :  { %6327 = vmatprep.subr.msk.bf16.mxu1 %vm6219_vm13, %v6840_v28  ;;  %vm4013_vm0 = vmand %vm3745_vm2, %vm3879_vm9  ;;  %vm3898_vm2 = vcmp.lt.s32.totalorder %v3630_v11, 576  ;;  %v3651_v11 = vsub.s32 %v3514_v50, %v7755_v16  ;;  %v3387_v50 = vadd.s32 728, %v7743_v15 }
 0x2da   :  { %vm4014_vm3 = vmand %vm3746_vm11, %vm3880_vm12  ;;  %vm4702_vm12 = vcmp.le.s32.totalorder %v4166_v33, 16 }
 0x2db   :  { %vm4549_vm5 = vmand %vm4013_vm0, %vm8815_vm14  ;;  %vm4970_vm14 = vcmp.ge.s32.totalorder %v4300_v10, 1  ;;  %v4187_v36 = vshra.s32 %v3651_v11, 5 }
 0x2dc   :  { %vm4550_vm8 = vmand %vm4014_vm3, %vm8820_vm15  ;;  %vm5238_vm15 = vcmp.le.s32.totalorder %v4300_v10, 16 }
 0x2dd   :  { %vm4817_vm6 = vmand %vm4549_vm5, %vm4683_vm4  ;;  %vm3748_vm4 = vcmp.ge.s32.totalorder %v3614_v14, 0  ;;  %vm3882_vm5 = vcmp.lt.s32.totalorder %v3614_v14, 576  ;;  %v3499_v14 = vadd.s32 33, %v3365_v12  ;;  %v3371_v12 = vadd.s32 600, %v7743_v15 }
 0x2de   :  { %vm4818_vm9 = vmand %vm4550_vm8, %vm4684_vm1  ;;  %vm8842_vm8 = vcmp.ge.s32.totalorder %v4150_v56, 1 }
 0x2df   :  { %vm6211_vm11 = vmpackc.low %vm4818_vm9, %vm4817_vm6  ;;  %vm8847_vm9 = vcmp.ge.s32.totalorder %v4284_v58, 1 }
 0x2e0   :  { %6328 = vmatpush3.bf16.msk.msra.mxu1 %vm6211_vm11, %v6840_v28  ;;  %vm4032_vm13 = vmand %vm3764_vm7, %vm3898_vm2  ;;  %vm4686_vm7 = vcmp.le.s32.totalorder %v4150_v56, 16  ;;  %vm5222_vm11 = vcmp.le.s32.totalorder %v4284_v58, 16  ;;  %v3636_v56 = vsub.s32 %v3499_v14, %v7755_v16  ;;  %v3388_v14 = vadd.s32 736, %v7743_v15 }
 0x2e1   :  { %vm4568_vm0 = vmand %vm4032_vm13, %vm8831_vm10  ;;  %vm3781_vm13 = vcmp.ge.s32.totalorder %v3647_v13, 0 }
 0x2e2   :  { %vm4836_vm3 = vmand %vm4568_vm0, %vm4702_vm12  ;;  %v4172_v61 = vshra.s32 %v3636_v56, 5  ;;  %v3522_v7 = vadd.s32 33, %v3388_v14 }
 0x2e3   :  { %vm5104_vm1 = vmand %vm4836_vm3, %vm4970_vm14  ;;  %vm3915_vm14 = vcmp.lt.s32.totalorder %v3647_v13, 576  ;;  %vm3916_vm3 = vcmp.lt.s32.totalorder %v3648_v60, 576  ;;  %v3517_v13 = vadd.s32 33, %v3383_v42 }
 0x2e4   :  { %vm5372_vm6 = vmand %vm5104_vm1, %vm5238_vm15  ;;  %vm3782_vm15 = vcmp.ge.s32.totalorder %v3648_v60, 0  ;;  %v3367_v60 = vadd.s32 568, %v7743_v15 }
 0x2e5   :  { %v5506_v37 = vsel %vm5372_vm6, 0.00390625, %v6841_v3  ;;  %vm4016_vm2 = vmand %vm3748_vm4, %vm3882_vm5  ;;  %vm8858_vm5 = vcmp.ge.s32.totalorder %v4183_v43, 1  ;;  %v4324_v62 = vand.u32 31, %v3517_v13 }
 0x2e6   :  { %v5608_v27 = vpack.c.bf16 %v5506_v37, %v6841_v3  ;;  %vm4552_vm10 = vmand %vm4016_vm2, %vm8842_vm8  ;;  %vm8864_vm8 = vcmp.ge.s32.totalorder %v4184_v0, 1  ;;  %v3654_v37 = vsub.s32 %v3517_v13, %v7755_v16  ;;  %v3501_v1 = vadd.s32 33, %v3367_v60 }
 0x2e7   :  { %vm4820_vm12 = vmand %vm4552_vm10, %vm4686_vm7  ;;  %vm4719_vm7 = vcmp.le.s32.totalorder %v4183_v43, 16  ;;  %v3372_v13 = vadd.s32 608, %v7743_v15  ;;  %v3659_v60 = vsub.s32 %v3522_v7, %v7755_v16 }
 0x2e8   :  { %6329 = vmatprep.subr.bf16.mxu1 %v5608_v27  ;;  %vm5088_vm0 = vmand %vm4820_vm12, %vm8847_vm9  ;;  %vm4720_vm9 = vcmp.le.s32.totalorder %v4184_v0, 16  ;;  %vm3765_vm12 = vcmp.ge.s32.totalorder %v3631_v38, 0  ;;  %v3384_v27 = vadd.s32 704, %v7743_v15  ;;  %v4190_v0 = vshra.s32 %v3654_v37, 5 }
 0x2e9   :  { %vm5356_vm4 = vmand %vm5088_vm0, %vm5222_vm11  ;;  %vm3766_vm0 = vcmp.ge.s32.totalorder %v3632_v23, 0  ;;  %v4308_v24 = vand.u32 31, %v3501_v1 }
 0x2ea   :  { %v5490_v35 = vsel %vm5356_vm4, 0.00390625, %v6841_v3  ;;  %vm4049_vm1 = vmand %vm3781_vm13, %vm3915_vm14  ;;  %vm3899_vm13 = vcmp.lt.s32.totalorder %v3631_v38, 576  ;;  %vm8876_vm4 = vcmp.ge.s32.totalorder %v4167_v59, 1  ;;  %v3638_v38 = vsub.s32 %v3501_v1, %v7755_v16 }
 0x2eb   :  { %v5600_v41 = vpack.c.bf16 %v5490_v35, %v6841_v3  ;;  %vm4050_vm6 = vmand %vm3782_vm15, %vm3916_vm3  ;;  %vm3900_vm15 = vcmp.lt.s32.totalorder %v3632_v23, 576  ;;  %v3518_v23 = vadd.s32 33, %v3384_v27  ;;  %v3506_v1 = vadd.s32 33, %v3372_v13 }
 0x2ec   :  { %vm4585_vm2 = vmand %vm4049_vm1, %vm8858_vm5  ;;  %vm8882_vm1 = vcmp.ge.s32.totalorder %v4168_v21, 1  ;;  %v4195_v27 = vshra.s32 %v3659_v60, 5 }
 0x2ed   :  { %6330 = vmatpush3.bf16.msra.mxu1 %v5600_v41  ;;  %vm4586_vm10 = vmand %vm4050_vm6, %vm8864_vm8  ;;  %vm4703_vm6 = vcmp.le.s32.totalorder %v4167_v59, 16  ;;  %v3368_v41 = vadd.s32 576, %v7743_v15  ;;  %v3655_v59 = vsub.s32 %v3518_v23, %v7755_v16  ;;  %v3643_v23 = vsub.s32 %v3506_v1, %v7755_v16 }
 0x2ee   :  { %vm4853_vm11 = vmand %vm4585_vm2, %vm4719_vm7  ;;  %vm4704_vm2 = vcmp.le.s32.totalorder %v4168_v21, 16  ;;  %v3369_v21 = vadd.s32 584, %v7743_v15 }
 0x2ef   :  { %vm4854_vm14 = vmand %vm4586_vm10, %vm4720_vm9  ;;  %v3502_v31 = vadd.s32 33, %v3368_v41 }
 0x2f0   :  { %5751 = vmatmul.mubr.bf16.vlgmr.msra.gmra.mrb[24].mxu1 %v8219_v47  ;;  %vm6229_vm3 = vmpackc.low %vm4854_vm14, %vm4853_vm11  ;;  %v3381_v47 = vadd.s32 680, %v7743_v15  ;;  %vm3784_vm11 = vcmp.ge.s32.totalorder %v3650_v4, 0  ;;  %vm8893_vm14 = vcmp.ge.s32.totalorder %v4186_v63, 1 }
 0x2f1   :  { %6343 = vmatprep.subr.msk.bf16.mxu1 %vm6229_vm3, %v6840_v28  ;;  %5758 = vmatprep.mubr.bf16.mxu1 %v8280_v8  ;;  %vm4033_vm5 = vmand %vm3765_vm12, %vm3899_vm13  ;;  %v4320_v8 = vand.u32 31, %v3513_v25  ;;  %vm3918_vm12 = vcmp.lt.s32.totalorder %v3650_v4, 576  ;;  %v4174_v25 = vshra.s32 %v3638_v38, 5  ;;  %v3656_v4 = vsub.s32 %v3519_v9, %v7755_v16 }
 0x2f2   :  { %vm4034_vm8 = vmand %vm3766_vm0, %vm3900_vm15  ;;  %v3515_v54 = vadd.s32 33, %v3381_v47  ;;  %vm4722_vm15 = vcmp.le.s32.totalorder %v4186_v63, 16  ;;  %v4191_v63 = vshra.s32 %v3655_v59, 5  ;;  %v3503_v47 = vadd.s32 33, %v3369_v21 }
 0x2f3   :  { %vm4569_vm7 = vmand %vm4033_vm5, %vm8876_vm4  ;;  %vm8898_vm4 = vcmp.ge.s32.totalorder %v4320_v8, 1  ;;  %v3639_v44 = vsub.s32 %v3502_v31, %v7755_v16  ;;  %v3375_v21 = vadd.s32 632, %v7743_v15 }
 0x2f4   :  { %vm4570_vm9 = vmand %vm4034_vm8, %vm8882_vm1  ;;  %vm5258_vm1 = vcmp.le.s32.totalorder %v4320_v8, 16  ;;  %v3652_v29 = vsub.s32 %v3515_v54, %v7755_v16  ;;  %v4192_v8 = vshra.s32 %v3656_v4, 5 }
 0x2f5   :  { %vm4837_vm10 = vmand %vm4569_vm7, %vm4703_vm6  ;;  %vm3768_vm6 = vcmp.ge.s32.totalorder %v3634_v48, 0  ;;  %vm3902_vm7 = vcmp.lt.s32.totalorder %v3634_v48, 576 }
 0x2f6   :  { %vm4838_vm13 = vmand %vm4570_vm9, %vm4704_vm2  ;;  %vm8912_vm9 = vcmp.ge.s32.totalorder %v4170_v46, 1  ;;  %v4188_v10 = vshra.s32 %v3652_v29, 5 }
 0x2f7   :  { %vm6221_vm0 = vmpackc.low %vm4838_vm13, %vm4837_vm10  ;;  %vm8917_vm13 = vcmp.ge.s32.totalorder %v4304_v39, 1 }
 0x2f8   :  { %6344 = vmatpush3.bf16.msk.msra.mxu1 %vm6221_vm0, %v6840_v28  ;;  %vm4052_vm3 = vmand %vm3784_vm11, %vm3918_vm12  ;;  %vm4706_vm11 = vcmp.le.s32.totalorder %v4170_v46, 16  ;;  %vm5242_vm0 = vcmp.le.s32.totalorder %v4304_v39, 16  ;;  %v3640_v46 = vsub.s32 %v3503_v47, %v7755_v16  ;;  %v3521_v39 = vadd.s32 33, %v3387_v50 }
 0x2f9   :  { %vm4588_vm5 = vmand %vm4052_vm3, %vm8893_vm14  ;;  %5759 = vmatmul.mubr.bf16.gmra.mrb[28].mxu1 %v8473_v57  ;;  %v3498_v57 = vadd.s32 33, %v3364_v6  ;;  %vm3785_vm3 = vcmp.ge.s32.totalorder %v3651_v11, 0  ;;  %v3424_v47 = vadd.s32 1024, %v7743_v15  ;;  %v3427_v6 = vadd.s32 1048, %v7743_v15 }
 0x2fa   :  { %vm4856_vm8 = vmand %vm4588_vm5, %vm4722_vm15  ;;  %5799 = vmatprep.mubr.bf16.mxu1 %v8610_v52  ;;  %v4176_v19 = vshra.s32 %v3640_v46, 5 }
 0x2fb   :  { %vm5124_vm2 = vmand %vm4856_vm8, %vm8898_vm4  ;;  %vm3919_vm4 = vcmp.lt.s32.totalorder %v3651_v11, 576  ;;  %vm3920_vm8 = vcmp.lt.s32.totalorder %v3652_v29, 576  ;;  %v3635_v22 = vsub.s32 %v3498_v57, %v7755_v16  ;;  %v3658_v57 = vsub.s32 %v3521_v39, %v7755_v16 }
 0x2fc   :  { %vm5392_vm10 = vmand %vm5124_vm2, %vm5258_vm1  ;;  %vm3786_vm1 = vcmp.ge.s32.totalorder %v3652_v29, 0  ;;  %v4175_v29 = vshra.s32 %v3639_v44, 5  ;;  %v3558_v54 = vadd.s32 33, %v3424_v47 }
 0x2fd   :  { %v5526_v32 = vsel %vm5392_vm10, 0.00390625, %v6841_v3  ;;  %vm4036_vm12 = vmand %vm3768_vm6, %vm3902_vm7  ;;  %vm8928_vm7 = vcmp.ge.s32.totalorder %v4187_v36, 1  ;;  %v4171_v45 = vshra.s32 %v3635_v22, 5 }
 0x2fe   :  { %v5618_v52 = vpack.c.bf16 %v5526_v32, %v6841_v3  ;;  %vm4572_vm14 = vmand %vm4036_vm12, %vm8912_vm9  ;;  %vm8934_vm9 = vcmp.ge.s32.totalorder %v4188_v10, 1  ;;  %v3505_v32 = vadd.s32 33, %v3371_v12 }
 0x2ff   :  { %vm4840_vm15 = vmand %vm4572_vm14, %vm4706_vm11  ;;  %vm4723_vm11 = vcmp.le.s32.totalorder %v4187_v36, 16  ;;  %v3428_v36 = vadd.s32 1056, %v7743_v15 }
 0x300   :  { %6345 = vmatprep.subr.bf16.mxu1 %v5618_v52  ;;  %vm5108_vm5 = vmand %vm4840_vm15, %vm8917_vm13  ;;  %vm4724_vm13 = vcmp.le.s32.totalorder %v4188_v10, 16  ;;  %vm3769_vm15 = vcmp.ge.s32.totalorder %v3635_v22, 0  ;;  %v4194_v52 = vshra.s32 %v3658_v57, 5  ;;  %v3389_v10 = vadd.s32 744, %v7743_v15 }
 0x301   :  { %vm5376_vm6 = vmand %vm5108_vm5, %vm5242_vm0  ;;  %vm3770_vm5 = vcmp.ge.s32.totalorder %v3636_v56, 0  ;;  %v3642_v42 = vsub.s32 %v3505_v32, %v7755_v16  ;;  %v3562_v7 = vadd.s32 33, %v3428_v36 }
 0x302   :  { %v5510_v18 = vsel %vm5376_vm6, 0.00390625, %v6841_v3  ;;  %vm4053_vm2 = vmand %vm3785_vm3, %vm3919_vm4  ;;  %vm3903_vm3 = vcmp.lt.s32.totalorder %v3635_v22, 576  ;;  %vm8945_vm6 = vcmp.ge.s32.totalorder %v4171_v45, 1  ;;  %v4328_v22 = vand.u32 31, %v3521_v39 }
 0x303   :  { %v5610_v30 = vpack.c.bf16 %v5510_v18, %v6841_v3  ;;  %vm4054_vm10 = vmand %vm3786_vm1, %vm3920_vm8  ;;  %vm3904_vm1 = vcmp.lt.s32.totalorder %v3636_v56, 576  ;;  %v3523_v18 = vadd.s32 33, %v3389_v10  ;;  %v4178_v58 = vshra.s32 %v3642_v42, 5 }
 0x304   :  { %vm4589_vm12 = vmand %vm4053_vm2, %vm8928_vm7  ;;  %vm8950_vm2 = vcmp.ge.s32.totalorder %v4172_v61, 1  ;;  %v3429_v10 = vadd.s32 1064, %v7743_v15 }
 0x305   :  { %6346 = vmatpush3.bf16.msra.mxu1 %v5610_v30  ;;  %vm4590_vm14 = vmand %vm4054_vm10, %vm8934_vm9  ;;  %vm4707_vm10 = vcmp.le.s32.totalorder %v4171_v45, 16  ;;  %v4312_v30 = vand.u32 31, %v3505_v32  ;;  %v3373_v45 = vadd.s32 616, %v7743_v15 }
 0x306   :  { %vm4857_vm0 = vmand %vm4589_vm12, %vm4723_vm11  ;;  %vm4708_vm12 = vcmp.le.s32.totalorder %v4172_v61, 16  ;;  %v3660_v61 = vsub.s32 %v3523_v18, %v7755_v16 }
 0x307   :  { %vm4858_vm4 = vmand %vm4590_vm14, %vm4724_vm13 }
 0x308   :  { %vm6231_vm8 = vmpackc.low %vm4858_vm4, %vm4857_vm0  ;;  %vm3788_vm0 = vcmp.ge.s32.totalorder %v3654_v37, 0  ;;  %vm8961_vm4 = vcmp.ge.s32.totalorder %v4190_v0, 1 }
 0x309   :  { %6347 = vmatprep.subr.msk.bf16.mxu1 %vm6231_vm8, %v6840_v28  ;;  %vm4037_vm7 = vmand %vm3769_vm15, %vm3903_vm3  ;;  %vm3922_vm15 = vcmp.lt.s32.totalorder %v3654_v37, 576 }
 0x30a   :  { %vm4038_vm9 = vmand %vm3770_vm5, %vm3904_vm1  ;;  %vm4726_vm1 = vcmp.le.s32.totalorder %v4190_v0, 16  ;;  %v3507_v0 = vadd.s32 33, %v3373_v45  ;;  %v3699_v45 = vsub.s32 %v3562_v7, %v7755_v16 }
 0x30b   :  { %vm4573_vm11 = vmand %vm4037_vm7, %vm8945_vm6  ;;  %vm4994_vm6 = vcmp.ge.s32.totalorder %v4324_v62, 1 }
 0x30c   :  { %vm4574_vm13 = vmand %vm4038_vm9, %vm8950_vm2  ;;  %vm5262_vm2 = vcmp.le.s32.totalorder %v4324_v62, 16  ;;  %v3391_v62 = vadd.s32 760, %v7743_v15  ;;  %v3644_v9 = vsub.s32 %v3507_v0, %v7755_v16 }
 0x30d   :  { %vm4841_vm14 = vmand %vm4573_vm11, %vm4707_vm10  ;;  %vm3772_vm10 = vcmp.ge.s32.totalorder %v3638_v38, 0  ;;  %vm3906_vm11 = vcmp.lt.s32.totalorder %v3638_v38, 576  ;;  %v4196_v38 = vshra.s32 %v3660_v61, 5 }
 0x30e   :  { %vm4842_vm3 = vmand %vm4574_vm13, %vm4708_vm12  ;;  %vm8972_vm13 = vcmp.ge.s32.totalorder %v4174_v25, 1  ;;  %v4180_v40 = vshra.s32 %v3644_v9, 5 }
 0x30f   :  { %vm6223_vm5 = vmpackc.low %vm4842_vm3, %vm4841_vm14  ;;  %vm8977_vm3 = vcmp.ge.s32.totalorder %v4308_v24, 1 }
 0x310   :  { %6348 = vmatpush3.bf16.msk.msra.mxu1 %vm6223_vm5, %v6840_v28  ;;  %vm4056_vm8 = vmand %vm3788_vm0, %vm3922_vm15  ;;  %vm4710_vm0 = vcmp.le.s32.totalorder %v4174_v25, 16  ;;  %vm5246_vm5 = vcmp.le.s32.totalorder %v4308_v24, 16  ;;  %v3525_v24 = vadd.s32 33, %v3391_v62 }
 0x311   :  { %vm4592_vm7 = vmand %vm4056_vm8, %vm8961_vm4  ;;  %vm3789_vm8 = vcmp.ge.s32.totalorder %v3655_v59, 0 }
 0x312   :  { %vm4860_vm9 = vmand %vm4592_vm7, %vm4726_vm1  ;;  %v3662_v31 = vsub.s32 %v3525_v24, %v7755_v16 }
 0x313   :  { %vm5128_vm12 = vmand %vm4860_vm9, %vm4994_vm6  ;;  %vm3923_vm6 = vcmp.lt.s32.totalorder %v3655_v59, 576  ;;  %vm3924_vm9 = vcmp.lt.s32.totalorder %v3656_v4, 576 }
 0x314   :  { %vm5396_vm14 = vmand %vm5128_vm12, %vm5262_vm2  ;;  %vm3790_vm2 = vcmp.ge.s32.totalorder %v3656_v4, 0  ;;  %v4179_v4 = vshra.s32 %v3643_v23, 5 }
 0x315   :  { %v5530_v51 = vsel %vm5396_vm14, 0.00390625, %v6841_v3  ;;  %vm4040_vm15 = vmand %vm3772_vm10, %vm3906_vm11  ;;  %vm8988_vm11 = vcmp.ge.s32.totalorder %v4191_v63, 1 }
 0x316   :  { %v5620_v48 = vpack.c.bf16 %v5530_v51, %v6841_v3  ;;  %vm4576_vm4 = vmand %vm4040_vm15, %vm8972_vm13  ;;  %vm8994_vm13 = vcmp.ge.s32.totalorder %v4192_v8, 1  ;;  %v3509_v51 = vadd.s32 33, %v3375_v21 }
 0x317   :  { %vm4844_vm1 = vmand %vm4576_vm4, %vm4710_vm0  ;;  %vm4727_vm0 = vcmp.le.s32.totalorder %v4191_v63, 16 }
 0x318   :  { %6349 = vmatprep.subr.bf16.mxu1 %v5620_v48  ;;  %vm5112_vm7 = vmand %vm4844_vm1, %vm8977_vm3  ;;  %vm4728_vm3 = vcmp.le.s32.totalorder %v4192_v8, 16  ;;  %vm3773_vm1 = vcmp.ge.s32.totalorder %v3639_v44, 0  ;;  %v4198_v48 = vshra.s32 %v3662_v31, 5  ;;  %v3425_v8 = vadd.s32 1032, %v7743_v15 }
 0x319   :  { %vm5380_vm10 = vmand %vm5112_vm7, %vm5246_vm5  ;;  %vm3774_vm7 = vcmp.ge.s32.totalorder %v3640_v46, 0  ;;  %v3646_v50 = vsub.s32 %v3509_v51, %v7755_v16  ;;  %v4316_v39 = vand.u32 31, %v3509_v51 }
 0x31a   :  { %v5514_v2 = vsel %vm5380_vm10, 0.00390625, %v6841_v3  ;;  %vm4057_vm12 = vmand %vm3789_vm8, %vm3923_vm6  ;;  %vm3907_vm8 = vcmp.lt.s32.totalorder %v3639_v44, 576  ;;  %vm9005_vm10 = vcmp.ge.s32.totalorder %v4175_v29, 1  ;;  %v4332_v44 = vand.u32 31, %v3525_v24 }
 0x31b   :  { %v5612_v11 = vpack.c.bf16 %v5514_v2, %v6841_v3  ;;  %vm4058_vm14 = vmand %vm3790_vm2, %vm3924_vm9  ;;  %vm3908_vm2 = vcmp.lt.s32.totalorder %v3640_v46, 576  ;;  %v3559_v46 = vadd.s32 33, %v3425_v8  ;;  %v4182_v2 = vshra.s32 %v3646_v50, 5 }
 0x31c   :  { %vm4593_vm15 = vmand %vm4057_vm12, %vm8988_vm11  ;;  %vm9010_vm12 = vcmp.ge.s32.totalorder %v4176_v19, 1 }
 0x31d   :  { %6350 = vmatpush3.bf16.msra.mxu1 %v5612_v11  ;;  %vm4594_vm4 = vmand %vm4058_vm14, %vm8994_vm13  ;;  %vm4711_vm14 = vcmp.le.s32.totalorder %v4175_v29, 16  ;;  %v3695_v11 = vsub.s32 %v3558_v54, %v7755_v16  ;;  %v3696_v12 = vsub.s32 %v3559_v46, %v7755_v16  ;;  %v9193_v54 = vld [vmem:[%s9237_s1 + $0x28] sm:$0x1] }
 0x31e   :  { %vm4861_vm5 = vmand %vm4593_vm15, %vm4727_vm0  ;;  %vm4712_vm15 = vcmp.le.s32.totalorder %v4176_v19, 16  ;;  %v3561_v19 = vadd.s32 33, %v3427_v6  ;;  %v6844_v6 = vmov 32   ;;  %6033 = vrot.lane.b32.xlu0 %v9193_v54, %s6825_s24 }
 0x31f   :  { %vm4862_vm6 = vmand %vm4594_vm4, %vm4728_vm3  ;;  %v4231_v33 = vshra.s32 %v3695_v11, 5  ;;  %6811 = vset.pattern.permute.xlu1 %v6844_v6  ;;  %6812 = vset.pattern.permute.xlu0 %v6844_v6 }
 0x320   :  { %vm6233_vm9 = vmpackc.low %vm4862_vm6, %vm4861_vm5  ;;  %vm3792_vm5 = vcmp.ge.s32.totalorder %v3658_v57, 0  ;;  %vm9021_vm6 = vcmp.ge.s32.totalorder %v4194_v52, 1 }
 0x321   :  { %6351 = vmatprep.subr.msk.bf16.mxu1 %vm6233_vm9, %v6840_v28  ;;  %vm4041_vm11 = vmand %vm3773_vm1, %vm3907_vm8  ;;  %vm3926_vm1 = vcmp.lt.s32.totalorder %v3658_v57, 576 }
 0x322   :  { %vm4042_vm13 = vmand %vm3774_vm7, %vm3908_vm2  ;;  %vm4730_vm2 = vcmp.le.s32.totalorder %v4194_v52, 16  ;;  %v4232_v52 = vshra.s32 %v3696_v12, 5 }
 0x323   :  { %vm4577_vm0 = vmand %vm4041_vm11, %vm9005_vm10  ;;  %vm4998_vm10 = vcmp.ge.s32.totalorder %v4328_v22, 1 }
 0x324   :  { %vm4578_vm3 = vmand %vm4042_vm13, %vm9010_vm12  ;;  %vm5266_vm12 = vcmp.le.s32.totalorder %v4328_v22, 16 }
 0x325   :  { %vm4845_vm4 = vmand %vm4577_vm0, %vm4711_vm14  ;;  %vm3776_vm14 = vcmp.ge.s32.totalorder %v3642_v42, 0  ;;  %vm3910_vm0 = vcmp.lt.s32.totalorder %v3642_v42, 576  ;;  %v3698_v42 = vsub.s32 %v3561_v19, %v7755_v16 }
 0x326   :  { %vm4846_vm8 = vmand %vm4578_vm3, %vm4712_vm15  ;;  %vm9032_vm3 = vcmp.ge.s32.totalorder %v4178_v58, 1 }
 0x327   :  { %vm6225_vm7 = vmpackc.low %vm4846_vm8, %vm4845_vm4  ;;  %vm9037_vm8 = vcmp.ge.s32.totalorder %v4312_v30, 1 }
 0x328   :  { %6352 = vmatpush3.bf16.msk.msra.mxu1 %vm6225_vm7, %v6840_v28  ;;  %vm4060_vm9 = vmand %vm3792_vm5, %vm3926_vm1  ;;  %vm4714_vm5 = vcmp.le.s32.totalorder %v4178_v58, 16  ;;  %vm5250_vm7 = vcmp.le.s32.totalorder %v4312_v30, 16  ;;  %v3563_v58 = vadd.s32 33, %v3429_v10  ;;  %v4234_v30 = vshra.s32 %v3698_v42, 5 }
 0x329   :  { %vm4596_vm11 = vmand %vm4060_vm9, %vm9021_vm6  ;;  %vm3793_vm9 = vcmp.ge.s32.totalorder %v3659_v60, 0 }
 0x32a   :  { %vm4864_vm13 = vmand %vm4596_vm11, %vm4730_vm2  ;;  %v3700_v37 = vsub.s32 %v3563_v58, %v7755_v16  ;;  %v4235_v16 = vshra.s32 %v3699_v45, 5 }
 0x32b   :  { %vm5132_vm15 = vmand %vm4864_vm13, %vm4998_vm10  ;;  %vm3927_vm10 = vcmp.lt.s32.totalorder %v3659_v60, 576  ;;  %vm3928_vm13 = vcmp.lt.s32.totalorder %v3660_v61, 576  ;;  %v4368_v60 = vand.u32 31, %v3561_v19 }
 0x32c   :  { %vm5400_vm4 = vmand %vm5132_vm15, %vm5266_vm12  ;;  %vm3794_vm12 = vcmp.ge.s32.totalorder %v3660_v61, 0 }
 0x32d   :  { %v5534_v43 = vsel %vm5400_vm4, 0.00390625, %v6841_v3  ;;  %vm4044_vm1 = vmand %vm3776_vm14, %vm3910_vm0  ;;  %vm9048_vm0 = vcmp.ge.s32.totalorder %v4195_v27, 1 }
 0x32e   :  { %v5622_v53 = vpack.c.bf16 %v5534_v43, %v6841_v3  ;;  %vm4580_vm6 = vmand %vm4044_vm1, %vm9032_vm3  ;;  %vm9054_vm3 = vcmp.ge.s32.totalorder %v4196_v38, 1 }
 0x32f   :  { %vm4848_vm2 = vmand %vm4580_vm6, %vm4714_vm5  ;;  %vm4731_vm5 = vcmp.le.s32.totalorder %v4195_v27, 16 }
 0x330   :  { %6353 = vmatprep.subr.bf16.mxu1 %v5622_v53  ;;  %vm5116_vm11 = vmand %vm4848_vm2, %vm9037_vm8  ;;  %vm4732_vm8 = vcmp.le.s32.totalorder %v4196_v38, 16  ;;  %vm3777_vm2 = vcmp.ge.s32.totalorder %v3643_v23, 0 }
 0x331   :  { %vm5384_vm14 = vmand %vm5116_vm11, %vm5250_vm7  ;;  %vm3778_vm11 = vcmp.ge.s32.totalorder %v3644_v9, 0 }
 0x332   :  { %v5518_v25 = vsel %vm5384_vm14, 0.00390625, %v6841_v3  ;;  %vm4061_vm15 = vmand %vm3793_vm9, %vm3927_vm10  ;;  %vm3911_vm9 = vcmp.lt.s32.totalorder %v3643_v23, 576  ;;  %vm9065_vm14 = vcmp.ge.s32.totalorder %v4179_v4, 1 }
 0x333   :  { %v5614_v59 = vpack.c.bf16 %v5518_v25, %v6841_v3  ;;  %vm4062_vm4 = vmand %vm3794_vm12, %vm3928_vm13  ;;  %vm3912_vm12 = vcmp.lt.s32.totalorder %v3644_v9, 576 }
 0x334   :  { %vm4597_vm1 = vmand %vm4061_vm15, %vm9048_vm0  ;;  %vm9070_vm15 = vcmp.ge.s32.totalorder %v4180_v40, 1 }
 0x335   :  { %6354 = vmatpush3.bf16.msra.mxu1 %v5614_v59  ;;  %vm4598_vm6 = vmand %vm4062_vm4, %vm9054_vm3  ;;  %vm4715_vm4 = vcmp.le.s32.totalorder %v4179_v4, 16 }
 0x336   :  { %vm4865_vm7 = vmand %vm4597_vm1, %vm4731_vm5  ;;  %vm4716_vm1 = vcmp.le.s32.totalorder %v4180_v40, 16 }
 0x337   :  { %vm4866_vm10 = vmand %vm4598_vm6, %vm4732_vm8 }
 0x338   :  { %vm6235_vm13 = vmpackc.low %vm4866_vm10, %vm4865_vm7  ;;  %vm3796_vm7 = vcmp.ge.s32.totalorder %v3662_v31, 0  ;;  %vm4466_vm10 = vcmp.ge.s32.totalorder %v4198_v48, 1 }
 0x339   :  { %6355 = vmatprep.subr.msk.bf16.mxu1 %vm6235_vm13, %v6840_v28  ;;  %vm4045_vm0 = vmand %vm3777_vm2, %vm3911_vm9  ;;  %vm3930_vm2 = vcmp.lt.s32.totalorder %v3662_v31, 576 }
 0x33a   :  { %vm4046_vm3 = vmand %vm3778_vm11, %vm3912_vm12  ;;  %vm4734_vm12 = vcmp.le.s32.totalorder %v4198_v48, 16 }
 0x33b   :  { %vm4581_vm5 = vmand %vm4045_vm0, %vm9065_vm14  ;;  %vm5002_vm14 = vcmp.ge.s32.totalorder %v4332_v44, 1 }
 0x33c   :  { %vm4582_vm8 = vmand %vm4046_vm3, %vm9070_vm15  ;;  %vm5270_vm3 = vcmp.le.s32.totalorder %v4332_v44, 16 }
 0x33d   :  { %vm4849_vm6 = vmand %vm4581_vm5, %vm4715_vm4  ;;  %vm3780_vm4 = vcmp.ge.s32.totalorder %v3646_v50, 0  ;;  %vm3914_vm5 = vcmp.lt.s32.totalorder %v3646_v50, 576 }
 0x33e   :  { %vm4850_vm9 = vmand %vm4582_vm8, %vm4716_vm1  ;;  %vm9085_vm8 = vcmp.ge.s32.totalorder %v4182_v2, 1 }
 0x33f   :  { %vm6227_vm11 = vmpackc.low %vm4850_vm9, %vm4849_vm6  ;;  %vm4718_vm9 = vcmp.le.s32.totalorder %v4182_v2, 16  ;;  %v5914_v2 = vld [vmem:[%s9237_s1 + $0x20] sm:$0xff] }
 0x340   :  { %6356 = vmatpush3.bf16.msk.msra.mxu1 %vm6227_vm11, %v6840_v28  ;;  %vm4064_vm13 = vmand %vm3796_vm7, %vm3930_vm2  ;;  %vm9090_vm2 = vcmp.ge.s32.totalorder %v4316_v39, 1  ;;  %vm5254_vm11 = vcmp.le.s32.totalorder %v4316_v39, 16  ;;  %5917 = vperm.xlu1 %6811, %v5914_v2  }
 0x341   :  { %vm4600_vm0 = vmand %vm4064_vm13, %vm4466_vm10  ;;  %vm3829_vm13 = vcmp.ge.s32.totalorder %v3695_v11, 0 }
 0x342   :  { %vm4868_vm15 = vmand %vm4600_vm0, %vm4734_vm12 }
 0x343   :  { %vm5136_vm1 = vmand %vm4868_vm15, %vm5002_vm14  ;;  %vm3963_vm14 = vcmp.lt.s32.totalorder %v3695_v11, 576  ;;  %vm3964_vm15 = vcmp.lt.s32.totalorder %v3696_v12, 576 }
 0x344   :  { %vm5404_vm6 = vmand %vm5136_vm1, %vm5270_vm3  ;;  %vm3830_vm3 = vcmp.ge.s32.totalorder %v3696_v12, 0 }
 0x345   :  { %v5538_v57 = vsel %vm5404_vm6, 0.00390625, %v6841_v3  ;;  %vm4048_vm7 = vmand %vm3780_vm4, %vm3914_vm5  ;;  %vm9102_vm5 = vcmp.ge.s32.totalorder %v4231_v33, 1 }
 0x346   :  { %v5624_v14 = vpack.c.bf16 %v5538_v57, %v6841_v3  ;;  %vm4584_vm10 = vmand %vm4048_vm7, %vm9085_vm8  ;;  %vm9107_vm8 = vcmp.ge.s32.totalorder %v4232_v52, 1 }
 0x347   :  { %vm4852_vm12 = vmand %vm4584_vm10, %vm4718_vm9  ;;  %vm4767_vm9 = vcmp.le.s32.totalorder %v4231_v33, 16 }
 0x348   :  { %6357 = vmatprep.subr.bf16.mxu1 %v5624_v14  ;;  %vm5120_vm0 = vmand %vm4852_vm12, %vm9090_vm2  ;;  %vm4768_vm2 = vcmp.le.s32.totalorder %v4232_v52, 16  ;;  %vm3832_vm12 = vcmp.ge.s32.totalorder %v3698_v42, 0 }
 0x349   :  { %vm5388_vm4 = vmand %vm5120_vm0, %vm5254_vm11  ;;  %vm9122_vm0 = vcmp.ge.s32.totalorder %v4234_v30, 1 }
 0x34a   :  { %v5522_v56 = vsel %vm5388_vm4, 0.00390625, %v6841_v3  ;;  %vm4097_vm1 = vmand %vm3829_vm13, %vm3963_vm14  ;;  %vm3966_vm13 = vcmp.lt.s32.totalorder %v3698_v42, 576 }
 0x34b   :  { %v5616_v13 = vpack.c.bf16 %v5522_v56, %v6841_v3  ;;  %vm4098_vm6 = vmand %vm3830_vm3, %vm3964_vm15  ;;  %vm4770_vm15 = vcmp.le.s32.totalorder %v4234_v30, 16 }
 0x34c   :  { %vm4633_vm7 = vmand %vm4097_vm1, %vm9102_vm5  ;;  %vm9131_vm5 = vcmp.ge.s32.totalorder %v4368_v60, 1 }
 0x34d   :  { %6358 = vmatpush3.bf16.msra.mxu1 %v5616_v13  ;;  %vm4634_vm10 = vmand %vm4098_vm6, %vm9107_vm8  ;;  %vm5306_vm8 = vcmp.le.s32.totalorder %v4368_v60, 16 }
 0x34e   :  { %vm9117_vm11 = vmand %vm4633_vm7, %vm4767_vm9  ;;  %vm3833_vm9 = vcmp.ge.s32.totalorder %v3699_v45, 0  ;;  %vm3967_vm7 = vcmp.lt.s32.totalorder %v3699_v45, 576 }
 0x34f   :  { %vm4902_vm14 = vmand %vm4634_vm10, %vm4768_vm2  ;;  %vm3834_vm10 = vcmp.ge.s32.totalorder %v3700_v37, 0 }
 0x350   :  { %5800 = vmatmul.mubr.bf16.vlgmr.msra.gmra.mrb[32].mxu1 %v8591_v20  ;;  %vm6253_vm3 = vmpackc.low %vm4902_vm14, %vm9117_vm11  ;;  %v4236_v20 = vshra.s32 %v3700_v37, 5  ;;  %vm3968_vm11 = vcmp.lt.s32.totalorder %v3700_v37, 576  ;;  %vm5662_vm14 = vcmask 392192  }
 0x351   :  { %5807 = vmatprep.mubr.bf16.mxu1 %v8670_v26  ;;  %6463 = vmatprep.subr.msk.bf16.mxu1 %vm6253_vm3, %v6840_v28  ;;  %vm4100_vm4 = vmand %vm3832_vm12, %vm3966_vm13  ;;  %vm9142_vm13 = vcmp.ge.s32.totalorder %v4235_v16, 1 }
 0x352   :  { %6464 = vmatpush3.bf16.msk.msra.mxu1 %vm6253_vm3, %v6840_v28  ;;  %vm4636_vm1 = vmand %vm4100_vm4, %vm9122_vm0  ;;  %vm9149_vm3 = vcmp.ge.s32.totalorder %v4236_v20, 1  ;;  %vm4771_vm4 = vcmp.le.s32.totalorder %v4235_v16, 16 }
 0x353   :  { %vm4904_vm6 = vmand %vm4636_vm1, %vm4770_vm15  ;;  %vm4772_vm1 = vcmp.le.s32.totalorder %v4236_v20, 16 }
 0x354   :  { %vm5172_vm2 = vmand %vm4904_vm6, %vm9131_vm5 }
 0x355   :  { %vm5440_vm12 = vmand %vm5172_vm2, %vm5306_vm8  ;;  %vm6843_vm2 = vmmov 0  }
 0x356   :  { %v5574_v23 = vsel %vm5440_vm12, 0.00390625, %v6841_v3  ;;  %vm4101_vm0 = vmand %vm3833_vm9, %vm3967_vm7  ;;  %vm6037_vm12 = vcmask 8192  }
 0x357   :  { %v5642_v9 = vpack.c.bf16 %v5574_v23, %v6841_v3  ;;  %vm4102_vm15 = vmand %vm3834_vm10, %vm3968_vm11  ;;  %vm6001_vm10 = vcmask 15360   ;;  %vm5920_vm11 = vcmask 261120  }
 0x358   :  { %5808 = vmatmul.mubr.bf16.gmra.mrb[36].mxu1 %v8660_v34  ;;  %vm4637_vm5 = vmand %vm4101_vm0, %vm9142_vm13 }
 0x359   :  { %v6387_v49 = vpop.f32.mrb[20].mxu0  ;;  %6465 = vmatprep.subr.bf16.mxu1 %v5642_v9  ;;  %6469 = vmatprep.mubr.msk.bf16.mxu1 %vm5662_vm14, %v8722_v5  ;;  %vm4638_vm8 = vmand %vm4102_vm15, %vm9149_vm3 }
 0x35a   :  { %v6388_v27 = vpop.f32.mrb[21].mxu0  ;;  %6466 = vmatpush3.bf16.msra.mxu1 %v5642_v9  ;;  %vm4905_vm6 = vmand %vm4637_vm5, %vm4771_vm4 }
 0x35b   :  { %v9138_v26 = vadd.f32 %v6388_v27, %v6387_v49  ;;  %v6390_v0 = vpop.f32.mrb[22].mxu0  ;;  %vm4906_vm9 = vmand %vm4638_vm8, %vm4772_vm1 }
 0x35c   :  { %v6391_v53 = vpop.f32.mrb[23].mxu0  ;;  %vm6255_vm7 = vmpackc.low %vm4906_vm9, %vm4905_vm6 }
 0x35d   :  { %v9146_v62 = vadd.f32 %v6391_v53, %v6390_v0  ;;  %6467 = vmatprep.subr.msk.bf16.mxu1 %vm6255_vm7, %v6840_v28 }
 0x35e   :  { %6468 = vmatpush3.bf16.msk.msra.mxu1 %vm6255_vm7, %v6840_v28  ;;  %v6842_v28 = vmov 0.0|0.0  }
 0x35f   :  { %6484 = vmatprep.subr.bf16.mxu1 %v6842_v28 }
 0x361   :  { %v6393_v25 = vpop.f32.mrb[24].mxu0  ;;  %6470 = vmatmul.mubr.msk.bf16.vlgmr.msra.gmra.mrb[40].mxu1 %vm5662_vm14, %v8714_v55  ;;  %vm6057_vm14 = vcmask 32800  }
 0x362   :  { %v6394_v41 = vpop.f32.mrb[25].mxu0  ;;  %6481 = vmatprep.mubr.msk.f32.mxu1 %vm6843_vm2, %v6841_v3 }
 0x363   :  { %v9161_v24 = vadd.f32 %v6394_v41, %v6393_v25  ;;  %v6396_v59 = vpop.f32.mrb[26].mxu0 }
 0x364   :  { %v6397_v34 = vpop.f32.mrb[27].mxu0 }
 0x365   :  { %v9164_v21 = vadd.f32 %v6397_v34, %v6396_v59 }
 0x371   :  { %v6303_v5 = vpop.f32.mrb[16].mxu1 }
 0x372   :  { %v6304_v4 = vpop.f32.mrb[17].mxu1 }
 0x373   :  { %v6305_v40 = vadd.f32 %v6304_v4, %v6303_v5  ;;  %v6306_v31 = vpop.f32.mrb[18].mxu1 }
 0x374   :  { %v6307_v51 = vpop.f32.mrb[19].mxu1 }
 0x375   :  { %v6308_v17 = vadd.f32 %v6307_v51, %v6306_v31 }
 0x379   :  { %v6309_v63 = vpop.f32.mrb[20].mxu1 }
 0x37a   :  { %v6310_v47 = vpop.f32.mrb[21].mxu1 }
 0x37b   :  { %v6311_v48 = vadd.f32 %v6310_v47, %v6309_v63  ;;  %v6312_v8 = vpop.f32.mrb[22].mxu1 }
 0x37c   :  { %v6313_v50 = vpop.f32.mrb[23].mxu1 }
 0x37d   :  { %v6314_v44 = vadd.f32 %v6313_v50, %v6312_v8 }
 0x390   :  { %v6034_v5 = vpop.permute.xlu0 %6033 }
 0x391   :  { %v6041_v4 = vsel %vm6037_vm12, %v6034_v5, 0.0 }
 0x392   :  { %6042 = vadd.xlane.f32.xlu1 %v6041_v4 }
 0x3c3   :  { %v6331_v55 = vpop.f32.mrb[24].mxu1 }
 0x3c4   :  { %v6332_v46 = vpop.f32.mrb[25].mxu1 }
 0x3c5   :  { %v6333_v39 = vadd.f32 %v6332_v46, %v6331_v55  ;;  %v6334_v11 = vpop.f32.mrb[26].mxu1 }
 0x3c6   :  { %v6335_v12 = vpop.f32.mrb[27].mxu1 }
 0x3c7   :  { %v5753_v29 = vadd.f32 %v6333_v39, %v6305_v40  ;;  %v6336_v19 = vadd.f32 %v6335_v12, %v6334_v11  ;;  %v5918_v40 = vpop.permute.xlu1 %5917 }
 0x3c9   :  { %v5756_v57 = vadd.f32 %v6336_v19, %v6308_v17 }
 0x3cc   :  { %v6337_v32 = vpop.f32.mrb[28].mxu1 }
 0x3cd   :  { %v6338_v33 = vpop.f32.mrb[29].mxu1 }
 0x3ce   :  { %v6339_v36 = vadd.f32 %v6338_v33, %v6337_v32  ;;  %v6340_v14 = vpop.f32.mrb[30].mxu1  ;;  %v5997_v32 = vsub.s32 0, %v7743_v15  ;;  %v5994_v33 = vcvt.s32.f32 %v7743_v15 }
 0x3cf   :  { %v6341_v52 = vpop.f32.mrb[31].mxu1 }
 0x3d0   :  { %v5761_v10 = vadd.f32 %v6339_v36, %v6311_v48  ;;  %v6342_v42 = vadd.f32 %v6341_v52, %v6340_v14  ;;  %v5998_v36 = vrot.slane %v9193_v54, %v5997_v32 }
 0x3d2   :  { %v5764_v22 = vadd.f32 %v6342_v42, %v6314_v44  ;;  %vm5999_vm13 = vcmp.eq.f32.partialorder %v5994_v33, %v5998_v36 }
 0x3d3   :  { %v6000_v42 = vsel %vm5999_vm13, 1.0, %v6841_v3 }
 0x423   :  { %v6359_v7 = vpop.f32.mrb[32].mxu1 }
 0x424   :  { %v6360_v56 = vpop.f32.mrb[33].mxu1 }
 0x425   :  { %v6361_v18 = vadd.f32 %v6360_v56, %v6359_v7  ;;  %v6362_v58 = vpop.f32.mrb[34].mxu1 }
 0x426   :  { %v6363_v13 = vpop.f32.mrb[35].mxu1 }
 0x427   :  { %v5802_v30 = vadd.f32 %v6361_v18, %v5753_v29  ;;  %v6364_v60 = vadd.f32 %v6363_v13, %v6362_v58 }
 0x429   :  { %v5805_v45 = vadd.f32 %v6364_v60, %v5756_v57  ;;  %v5851_v61 = vadd.f32 %v9138_v26, %v5802_v30 }
 0x42b   :  { %v6365_v37 = vpop.f32.mrb[36].mxu1  ;;  %v5854_v1 = vadd.f32 %v9146_v62, %v5805_v45 }
 0x42c   :  { %v6366_v43 = vpop.f32.mrb[37].mxu1 }
 0x42d   :  { %v6367_v16 = vadd.f32 %v6366_v43, %v6365_v37  ;;  %v6368_v49 = vpop.f32.mrb[38].mxu1  ;;  %v6043_v37 = vpop.xlane.xlu1 %6042 }
 0x42e   :  { %v6369_v20 = vpop.f32.mrb[39].mxu1 }
 0x42f   :  { %v5810_v27 = vadd.f32 %v6367_v16, %v5761_v10  ;;  %v6370_v0 = vadd.f32 %v6369_v20, %v6368_v49 }
 0x431   :  { %v5813_v53 = vadd.f32 %v6370_v0, %v5764_v22  ;;  %v5859_v38 = vadd.f32 %v9161_v24, %v5810_v27 }
 0x433   :  { %v5862_v23 = vadd.f32 %v9164_v21, %v5813_v53 }
 0x434   :  { %v6471_v35 = vpop.f32.mrb[40].mxu1 }
 0x435   :  { %v5908_v9 = vadd.f32 %v6471_v35, %v5859_v38  ;;  %v5899_v25 = vpop.f32.mrb[41].mxu1 }
 0x436   :  { %v5900_v41 = vadd.f32 %v5899_v25, %v5851_v61  ;;  %v6472_v26 = vpop.f32.mrb[42].mxu1 }
 0x437   :  { %6054 = vst.msk [vmem:[%s9238_s2 + $0x10] sm:$0xff] %vm6001_vm10, %v5908_v9  ;;  %v5911_v62 = vadd.f32 %v6472_v26, %v5862_v23  ;;  %v5902_v59 = vpop.f32.mrb[43].mxu1 }
 0x438   :  { %6052 = vst.msk [vmem:[%s9238_s2] sm:$0xff] %vm6001_vm10, %v5900_v41  ;;  %v5903_v24 = vadd.f32 %v5902_v59, %v5854_v1  ;;  %v6044_v1 = vmax.f32 %v6043_v37, 1e-08 }
 0x439   :  { %v6488_v34 = vpack.c.bf16 %v5911_v62, %v5908_v9  ;;  %6055 = vst.msk [vmem:[%s9238_s2 + $0x18] sm:$0xff] %vm6001_vm10, %v5911_v62 }
 0x43a   :  { %v6485_v21 = vpack.c.bf16 %v5903_v24, %v5900_v41  ;;  %6053 = vst.msk [vmem:[%s9238_s2 + $0x8] sm:$0xff] %vm6001_vm10, %v5903_v24 }
 0x43c   :  { %6486 = vmatpush3.bf16.msra.mxu1 %v6485_v21 }
 0x43d   :  { %6487 = vmatprep.subr.bf16.mxu1 %v6842_v28 }
 0x440   :  { %6489 = vmatpush3.bf16.msra.mxu1 %v6488_v34 }
 0x443   :  { %6482 = vmatmul.mubr.msk.f32.vlgmr.msra.gmra.mrb[44].mxu1 %vm5920_vm11, %v5914_v2 }
 0x516   :  { %v5989_v31 = vpop.f32.mrb[44].mxu1 }
 0x517   :  { %v5990_v51 = vadd.f32 %v5989_v31, %v5918_v40  ;;  %v6483_v17 = vpop.f32.mrb[45].mxu1 }
 0x519   :  { %v6002_v63 = vsel %vm6001_vm10, %v5990_v51, -inf  ;;  %6056 = vst.msk [vmem:[%s9238_s2 + $0x20] sm:$0xff] %vm6001_vm10, %v5990_v51 }
 0x51a   :  { %v6003_v47 = vrot.slane %v6002_v63, 4 }
 0x51c   :  { %v6004_v48 = vmax.f32 %v6002_v63, %v6003_v47 }
 0x51e   :  { %v6005_v8 = vrot.slane %v6004_v48, 2 }
 0x520   :  { %v6006_v50 = vmax.f32 %v6004_v48, %v6005_v8 }
 0x522   :  { %v6007_v44 = vrot.slane %v6006_v50, 1 }
 0x524   :  { %v6008_v28 = vmax.f32 %v6006_v50, %v6007_v44 }
 0x526   :  { %v6009_v55 = vsub.f32 %v5990_v51, %v6008_v28 }
 0x528   :  { %v6010_v46 = vmul.f32 1.442695, %v6009_v55 }
 0x52a   :  { %6817 = vpow2.f32 %v6010_v46 }
 0x534   :  { %v6818_v2 = vpop.eup %6817 }
 0x535   :  { %v6012_v6 = vsel %vm6001_vm10, %v6818_v2, 0.0 }
 0x536   :  { %v6013_v39 = vrot.slane %v6012_v6, 4 }
 0x538   :  { %v6014_v11 = vadd.f32 %v6013_v39, %v6012_v6 }
 0x53a   :  { %v6015_v12 = vrot.slane %v6014_v11, 2 }
 0x53c   :  { %v6016_v29 = vadd.f32 %v6015_v12, %v6014_v11 }
 0x53e   :  { %v6017_v19 = vrot.slane %v6016_v29, 1 }
 0x540   :  { %v6018_v57 = vadd.f32 %v6017_v19, %v6016_v29 }
 0x542   :  { %6819 = vlog2.f32 %v6018_v57 }
 0x543   :  { %6821 = vrcp.f32 %v6044_v1 }
 0x54c   :  { %v6820_v14 = vpop.eup %6819 }
 0x54d   :  { %v6020_v52 = vmul.f32 0.6931472, %v6820_v14  ;;  %v6822_v43 = vpop.eup %6821 }
 0x54f   :  { %v6021_v10 = vadd.f32 %v6020_v52, %v6008_v28 }
 0x551   :  { %v6022_v22 = vsub.f32 %v5990_v51, %v6021_v10 }
 0x553   :  { %v6023_v7 = vmul.f32 %v6022_v22, %v6000_v42 }
 0x555   :  { %v6024_v56 = vsel %vm6001_vm10, %v6023_v7, 0.0 }
 0x556   :  { %v6025_v18 = vrot.slane %v6024_v56, 4 }
 0x558   :  { %v6026_v58 = vadd.f32 %v6025_v18, %v6024_v56 }
 0x55a   :  { %v6027_v13 = vrot.slane %v6026_v58, 2 }
 0x55c   :  { %v6028_v30 = vadd.f32 %v6027_v13, %v6026_v58 }
 0x55e   :  { %v6029_v60 = vrot.slane %v6028_v30, 1 }
 0x560   :  { %v6030_v45 = vadd.f32 %v6029_v60, %v6028_v30 }
 0x562   :  { %v6031_v61 = vsub.f32 0.0, %v6030_v45 }
 0x564   :  { %v6036_v15 = vmul.f32 %v6034_v5, %v6031_v61 }
 0x566   :  { %v6038_v54 = vsel %vm6037_vm12, %v6036_v15, 0.0 }
 0x567   :  { %6039 = vadd.xlane.f32.xlu0 %v6038_v54 }
 0x5f4   :  { %v6040_v3 = vpop.xlane.xlu0 %6039 }
 0x5f5   :  { %v6046_v16 = vmul.f32 %v6822_v43, %v6040_v3 }
 0x5f7   :  { %6058 = vst.msk [vmem:[%s9238_s2 + $0x20] sm:$0x1] %vm6057_vm14, %v6046_v16 }

</bundles_post_ra>
